<compile_context>
chip_gen: v5e
topology: v5e:2x2
jax: 0.10.0
libtpu: 0.0.40
codegen_flags: <defaults>
</compile_context>

<pallas_src>
import jax
import jax.numpy as jnp
from jax.experimental import pallas as pl
from jax.experimental.pallas import tpu as pltpu

_LANE = 128


def _round_up(x, m):
    return (x + m - 1) // m * m


def _batch_tile(b):
    """Batch tile: whole batch when small, else a sublane-aligned divisor.

    Capped at 32 so the in-kernel f32 conv accumulator (BT*N*Dp*4 B ~ 4 MiB at
    BT=32, N=256) plus double-buffered inputs stays well under v7x's 64 MiB
    physical VMEM while the "parallel" batch axis still feeds both v7x
    TensorCores.  v5e/v6e (128 MiB VMEM) could take larger tiles.
    """
    if b <= 32:
        return b
    for bt in (32, 16, 8):
        if b % bt == 0:
            return bt
    return b


# ----------------------------- Pallas kernel -------------------------------

def fused_model_kernel(x_ref, w_ref, b_ref, wh_ref, bh_ref, out_ref):
    """Fused conv3x3 + bias + ReLU + GAP + eigenbasis-folded head.

    x:   [BT, H+2, W+2, Cin]  spatially padded, channel-last input tile
    w:   [9, Cin, Dp]         conv weight per kernel offset (lane-padded D)
    b:   [1, Dp]              conv bias (f32)
    wh:  [Dp, Cp]             eigenbasis @ linear.weight^T (f32, lane-padded)
    bh:  [1, Cp]              linear bias (f32)
    out: [BT, Cp]             logits (padded class dim; sliced outside)
    """
    bt = out_ref.shape[0]
    hp2, wp2, cin = x_ref.shape[1], x_ref.shape[2], x_ref.shape[3]
    h, w = hp2 - 2, wp2 - 2
    n = h * w
    dp = w_ref.shape[2]

    xt = x_ref[...]                                        # [BT, H+2, W+2, Cin]

    # Conv as 9 accumulating matmuls over statically shifted views (the 9
    # im2col columns are built on-chip; nothing is materialized in HBM).
    acc = jnp.zeros((bt * n, dp), jnp.float32)
    for k in range(9):
        i, j = divmod(k, 3)
        xs = xt[:, i:i + h, j:j + w, :]                    # [BT, H, W, Cin]
        xs2 = xs.reshape(bt * n, cin)                      # [BT*N, Cin]
        acc = acc + jnp.dot(xs2, w_ref[k],
                            preferred_element_type=jnp.float32)

    acc = jnp.maximum(acc + b_ref[...], 0.0)               # bias + ReLU (f32)
    feat = jnp.mean(acc.reshape(bt, n, dp), axis=1)        # GAP -> [BT, Dp] f32

    # Head stays in f32 (tiny matmul, keeps the eigenbasis projection exact).
    out_ref[...] = (jnp.dot(feat, wh_ref[...],
                            preferred_element_type=jnp.float32)
                    + bh_ref[...])


# --------------------------- one-time weight prep ---------------------------

def prepare_params(params, matmul_dtype=jnp.bfloat16):
    """Hoisted out of the forward: transpose / eigenbasis-fold / pad / cast."""
    conv_w = params['conv_w']            # [D, Cin, 3, 3]
    conv_b = params['conv_b']            # [D]
    eigenbasis = params['eigenbasis']    # [D, D]
    lin_w = params['lin_w']              # [C, D]
    lin_b = params['lin_b']              # [C]

    D, Cin = conv_w.shape[0], conv_w.shape[1]
    C = lin_w.shape[0]
    Dp = _round_up(D, _LANE)
    Cp = _round_up(C, _LANE)

    # [D, Cin, 3, 3] -> [9, Cin, D]: w_off[k][c, d] = conv_w[d, c, i, j], k=i*3+j
    w_off = jnp.transpose(conv_w, (2, 3, 1, 0)).reshape(9, Cin, D)
    w_off = jnp.pad(w_off, ((0, 0), (0, 0), (0, Dp - D))).astype(matmul_dtype)

    b2d = jnp.pad(conv_b.reshape(1, D),
                  ((0, 0), (0, Dp - D))).astype(jnp.float32)

    # Fold the projector into the head weight: feat @ (E @ W^T) + b  (f32).
    w_head = jnp.pad(eigenbasis @ lin_w.T,
                     ((0, Dp - D), (0, Cp - C))).astype(jnp.float32)
    b_head = jnp.pad(lin_b.reshape(1, C),
                     ((0, 0), (0, Cp - C))).astype(jnp.float32)

    return dict(w_off=w_off, b2d=b2d, w_head=w_head, b_head=b_head,
                dims=(D, Cin, C, Dp, Cp), matmul_dtype=matmul_dtype)


# ------------------------------ JAX wrapper --------------------------------

def our_model_forward(x, prepared):
    """OurModel forward: feat = backbone(x); out = linear(feat @ eigenbasis)."""
    B, Cin, H, W = x.shape
    D, Cin_p, C, Dp, Cp = prepared['dims']
    assert Cin == Cin_p
    mm_dtype = prepared['matmul_dtype']
    N = H * W
    Hp2, Wp2 = H + 2, W + 2

    # NCHW -> spatially padded NHWC; only 1x the input bytes go to the kernel.
    x_pad = jnp.pad(jnp.transpose(x, (0, 2, 3, 1)),
                    ((0, 0), (1, 1), (1, 1), (0, 0))).astype(mm_dtype)

    BT = _batch_tile(B)
    n_tiles = B // BT

    mm_bytes = jnp.dtype(mm_dtype).itemsize
    cost = pl.CostEstimate(
        flops=2 * B * N * (9 * Cin) * Dp + 2 * B * Dp * Cp,
        transcendentals=0,
        bytes_accessed=(B * Hp2 * Wp2 * Cin * mm_bytes      # input tile stream
                        + 9 * Cin * Dp * mm_bytes           # conv weight
                        + Dp * 4                             # conv bias
                        + Dp * Cp * 4 + Cp * 4               # head weight/bias
                        + B * Cp * 4))                       # logits out

    out_pad = pl.pallas_call(
        fused_model_kernel,
        out_shape=jax.ShapeDtypeStruct((B, Cp), jnp.float32),
        grid=(n_tiles,),
        in_specs=[
            pl.BlockSpec((BT, Hp2, Wp2, Cin), lambda i: (i, 0, 0, 0)),
            pl.BlockSpec((9, Cin, Dp), lambda i: (0, 0, 0)),
            pl.BlockSpec((1, Dp), lambda i: (0, 0)),
            pl.BlockSpec((Dp, Cp), lambda i: (0, 0)),
            pl.BlockSpec((1, Cp), lambda i: (0, 0)),
        ],
        out_specs=pl.BlockSpec((BT, Cp), lambda i: (i, 0)),
        compiler_params=pltpu.CompilerParams(
            dimension_semantics=("parallel",),
            vmem_limit_bytes=48 * 1024 * 1024),
        cost_estimate=cost,
    )(x_pad, prepared['w_off'], prepared['b2d'],
      prepared['w_head'], prepared['b_head'])

    return out_pad[:, :C]


# --------------------------- parameter creation -----------------------------

def init_params(key, cin, feat_dim, num_classes, k):
    k1, k2, k3, k4, k5 = jax.random.split(key, 5)
    conv_w = 0.1 * jax.random.normal(k1, (feat_dim, cin, 3, 3), jnp.float32)
    conv_b = 0.1 * jax.random.normal(k2, (feat_dim,), jnp.float32)
    lin_w = 0.1 * jax.random.normal(k3, (num_classes, feat_dim), jnp.float32)
    lin_b = 0.1 * jax.random.normal(k4, (num_classes,), jnp.float32)
    # "eigenvectors": orthonormal columns; keep first k and form v @ v^T
    evecs, _ = jnp.linalg.qr(jax.random.normal(k5, (feat_dim, feat_dim),
                                               jnp.float32))
    v = evecs[:, :k]
    eigenbasis = v @ v.T                                   # [D, D] projector
    return dict(conv_w=conv_w, conv_b=conv_b,
                lin_w=lin_w, lin_b=lin_b, eigenbasis=eigenbasis)


def _reference(x, params):
    """Plain-JAX reference in the original (un-folded) formulation."""
    conv_w, conv_b = params['conv_w'], params['conv_b']
    B, Cin, H, W = x.shape
    xp = jnp.pad(x, ((0, 0), (0, 0), (1, 1), (1, 1)))
    out = jnp.broadcast_to(conv_b[None, :, None, None],
                           (B, conv_w.shape[0], H, W))
    for i in range(3):
        for j in range(3):
            out = out + jnp.einsum('bchw,dc->bdhw',
                                   xp[:, :, i:i + H, j:j + W],
                                   conv_w[:, :, i, j])
    feat = jnp.maximum(out, 0.0).mean(axis=(2, 3))         # [B, D]
    return (feat @ params['eigenbasis']) @ params['lin_w'].T + params['lin_b']


if __name__ == "__main__":
    B, Cin, H, W = 2, 4, 16, 16      # NCHW input
    D = 32                           # backbone feature dim
    K = 8                            # number of eigenvectors kept
    NUM_CLASSES = 100                # CIFAR-100 head

    key = jax.random.PRNGKey(0)
    kx, kp = jax.random.split(key)
    x = jax.random.normal(kx, (B, Cin, H, W), jnp.float32)
    params = init_params(kp, Cin, D, NUM_CLASSES, K)

    ref = _reference(x, params)

    # f32 MXU operands: tight numerical check against the reference.
    prep_f32 = prepare_params(params, matmul_dtype=jnp.float32)
    out_f32 = our_model_forward(x, prep_f32)
    jax.block_until_ready(out_f32)
    assert out_f32.shape == (B, NUM_CLASSES)
    assert jnp.allclose(out_f32, ref, atol=1e-4, rtol=1e-4)

    # bf16 MXU operands (default, MXU-native on v5e/v6e/v7x): looser check.
    prep_bf16 = prepare_params(params)               # matmul_dtype=bfloat16
    out_bf16 = our_model_forward(x, prep_bf16)
    jax.block_until_ready(out_bf16)
    assert out_bf16.shape == (B, NUM_CLASSES)
    assert jnp.allclose(out_bf16, ref, atol=2e-1, rtol=1e-1)

    print("KERNEL_OK")
</pallas_src>

<mosaic_0001>
module attributes {stable_mosaic.version = 11 : i64} {
  func.func @fused_model_kernel(%arg0: i32, %arg1: memref<2x18x18x4xf32, #tpu.memory_space<vmem>>, %arg2: memref<9x4x128xf32, #tpu.memory_space<vmem>>, %arg3: memref<1x128xf32, #tpu.memory_space<vmem>>, %arg4: memref<128x128xf32, #tpu.memory_space<vmem>>, %arg5: memref<1x128xf32, #tpu.memory_space<vmem>>, %arg6: memref<2x128xf32, #tpu.memory_space<vmem>>) attributes {dimension_semantics = [#tpu.dimension_semantics<parallel>], iteration_bounds = array<i64: 1>, scalar_prefetch = 0 : i64, scratch_operands = 0 : i64, tpu.core_type = #tpu.core_type<tc>, window_params = [{transform_indices = @transform_0, window_bounds = array<i64: 2, 18, 18, 4>}, {pipeline_mode = #tpu.pipeline_mode<synchronous>, transform_indices = @transform_1, window_bounds = array<i64: 9, 4, 128>}, {pipeline_mode = #tpu.pipeline_mode<synchronous>, transform_indices = @transform_2, window_bounds = array<i64: 1, 128>}, {pipeline_mode = #tpu.pipeline_mode<synchronous>, transform_indices = @transform_3, window_bounds = array<i64: 128, 128>}, {pipeline_mode = #tpu.pipeline_mode<synchronous>, transform_indices = @transform_4, window_bounds = array<i64: 1, 128>}, {transform_indices = @transform_5, window_bounds = array<i64: 2, 128>}]} {
    %c0 = arith.constant 0 : index
    %c0_0 = arith.constant 0 : index
    %c0_1 = arith.constant 0 : index
    %c0_2 = arith.constant 0 : index
    %0 = vector.load %arg1[%c0, %c0_0, %c0_1, %c0_2] : memref<2x18x18x4xf32, #tpu.memory_space<vmem>>, vector<2x18x18x4xf32>
    %cst = arith.constant 0.000000e+00 : f32
    %1 = vector.broadcast %cst : f32 to vector<512x128xf32>
    %2 = vector.extract_strided_slice %0 {offsets = [0, 0, 0, 0], sizes = [2, 16, 16, 4], strides = [1, 1, 1, 1]} : vector<2x18x18x4xf32> to vector<2x16x16x4xf32>
    %3 = vector.shape_cast %2 : vector<2x16x16x4xf32> to vector<512x4xf32>
    %c0_3 = arith.constant 0 : index
    %c0_4 = arith.constant 0 : index
    %c0_5 = arith.constant 0 : index
    %4 = vector.load %arg2[%c0_3, %c0_4, %c0_5] : memref<9x4x128xf32, #tpu.memory_space<vmem>>, vector<1x4x128xf32>
    %5 = vector.shape_cast %4 : vector<1x4x128xf32> to vector<4x128xf32>
    %cst_6 = arith.constant dense<0.000000e+00> : vector<512x128xf32>
    %6 = tpu.matmul %3, %5, %cst_6 {dimension_numbers = #tpu.dot_dimension_numbers<[1], [0], [0], [1], [0, 0, 1, 1], [], []>} : vector<512x4xf32>, vector<4x128xf32>, vector<512x128xf32> -> vector<512x128xf32>
    %7 = arith.addf %1, %6 : vector<512x128xf32>
    %8 = vector.extract_strided_slice %0 {offsets = [0, 0, 1, 0], sizes = [2, 16, 16, 4], strides = [1, 1, 1, 1]} : vector<2x18x18x4xf32> to vector<2x16x16x4xf32>
    %9 = vector.shape_cast %8 : vector<2x16x16x4xf32> to vector<512x4xf32>
    %c1 = arith.constant 1 : index
    %c0_7 = arith.constant 0 : index
    %c0_8 = arith.constant 0 : index
    %10 = vector.load %arg2[%c1, %c0_7, %c0_8] : memref<9x4x128xf32, #tpu.memory_space<vmem>>, vector<1x4x128xf32>
    %11 = vector.shape_cast %10 : vector<1x4x128xf32> to vector<4x128xf32>
    %cst_9 = arith.constant dense<0.000000e+00> : vector<512x128xf32>
    %12 = tpu.matmul %9, %11, %cst_9 {dimension_numbers = #tpu.dot_dimension_numbers<[1], [0], [0], [1], [0, 0, 1, 1], [], []>} : vector<512x4xf32>, vector<4x128xf32>, vector<512x128xf32> -> vector<512x128xf32>
    %13 = arith.addf %7, %12 : vector<512x128xf32>
    %14 = vector.extract_strided_slice %0 {offsets = [0, 0, 2, 0], sizes = [2, 16, 16, 4], strides = [1, 1, 1, 1]} : vector<2x18x18x4xf32> to vector<2x16x16x4xf32>
    %15 = vector.shape_cast %14 : vector<2x16x16x4xf32> to vector<512x4xf32>
    %c2 = arith.constant 2 : index
    %c0_10 = arith.constant 0 : index
    %c0_11 = arith.constant 0 : index
    %16 = vector.load %arg2[%c2, %c0_10, %c0_11] : memref<9x4x128xf32, #tpu.memory_space<vmem>>, vector<1x4x128xf32>
    %17 = vector.shape_cast %16 : vector<1x4x128xf32> to vector<4x128xf32>
    %cst_12 = arith.constant dense<0.000000e+00> : vector<512x128xf32>
    %18 = tpu.matmul %15, %17, %cst_12 {dimension_numbers = #tpu.dot_dimension_numbers<[1], [0], [0], [1], [0, 0, 1, 1], [], []>} : vector<512x4xf32>, vector<4x128xf32>, vector<512x128xf32> -> vector<512x128xf32>
    %19 = arith.addf %13, %18 : vector<512x128xf32>
    %20 = vector.extract_strided_slice %0 {offsets = [0, 1, 0, 0], sizes = [2, 16, 16, 4], strides = [1, 1, 1, 1]} : vector<2x18x18x4xf32> to vector<2x16x16x4xf32>
    %21 = vector.shape_cast %20 : vector<2x16x16x4xf32> to vector<512x4xf32>
    %c3 = arith.constant 3 : index
    %c0_13 = arith.constant 0 : index
    %c0_14 = arith.constant 0 : index
    %22 = vector.load %arg2[%c3, %c0_13, %c0_14] : memref<9x4x128xf32, #tpu.memory_space<vmem>>, vector<1x4x128xf32>
    %23 = vector.shape_cast %22 : vector<1x4x128xf32> to vector<4x128xf32>
    %cst_15 = arith.constant dense<0.000000e+00> : vector<512x128xf32>
    %24 = tpu.matmul %21, %23, %cst_15 {dimension_numbers = #tpu.dot_dimension_numbers<[1], [0], [0], [1], [0, 0, 1, 1], [], []>} : vector<512x4xf32>, vector<4x128xf32>, vector<512x128xf32> -> vector<512x128xf32>
    %25 = arith.addf %19, %24 : vector<512x128xf32>
    %26 = vector.extract_strided_slice %0 {offsets = [0, 1, 1, 0], sizes = [2, 16, 16, 4], strides = [1, 1, 1, 1]} : vector<2x18x18x4xf32> to vector<2x16x16x4xf32>
    %27 = vector.shape_cast %26 : vector<2x16x16x4xf32> to vector<512x4xf32>
    %c4 = arith.constant 4 : index
    %c0_16 = arith.constant 0 : index
    %c0_17 = arith.constant 0 : index
    %28 = vector.load %arg2[%c4, %c0_16, %c0_17] : memref<9x4x128xf32, #tpu.memory_space<vmem>>, vector<1x4x128xf32>
    %29 = vector.shape_cast %28 : vector<1x4x128xf32> to vector<4x128xf32>
    %cst_18 = arith.constant dense<0.000000e+00> : vector<512x128xf32>
    %30 = tpu.matmul %27, %29, %cst_18 {dimension_numbers = #tpu.dot_dimension_numbers<[1], [0], [0], [1], [0, 0, 1, 1], [], []>} : vector<512x4xf32>, vector<4x128xf32>, vector<512x128xf32> -> vector<512x128xf32>
    %31 = arith.addf %25, %30 : vector<512x128xf32>
    %32 = vector.extract_strided_slice %0 {offsets = [0, 1, 2, 0], sizes = [2, 16, 16, 4], strides = [1, 1, 1, 1]} : vector<2x18x18x4xf32> to vector<2x16x16x4xf32>
    %33 = vector.shape_cast %32 : vector<2x16x16x4xf32> to vector<512x4xf32>
    %c5 = arith.constant 5 : index
    %c0_19 = arith.constant 0 : index
    %c0_20 = arith.constant 0 : index
    %34 = vector.load %arg2[%c5, %c0_19, %c0_20] : memref<9x4x128xf32, #tpu.memory_space<vmem>>, vector<1x4x128xf32>
    %35 = vector.shape_cast %34 : vector<1x4x128xf32> to vector<4x128xf32>
    %cst_21 = arith.constant dense<0.000000e+00> : vector<512x128xf32>
    %36 = tpu.matmul %33, %35, %cst_21 {dimension_numbers = #tpu.dot_dimension_numbers<[1], [0], [0], [1], [0, 0, 1, 1], [], []>} : vector<512x4xf32>, vector<4x128xf32>, vector<512x128xf32> -> vector<512x128xf32>
    %37 = arith.addf %31, %36 : vector<512x128xf32>
    %38 = vector.extract_strided_slice %0 {offsets = [0, 2, 0, 0], sizes = [2, 16, 16, 4], strides = [1, 1, 1, 1]} : vector<2x18x18x4xf32> to vector<2x16x16x4xf32>
    %39 = vector.shape_cast %38 : vector<2x16x16x4xf32> to vector<512x4xf32>
    %c6 = arith.constant 6 : index
    %c0_22 = arith.constant 0 : index
    %c0_23 = arith.constant 0 : index
    %40 = vector.load %arg2[%c6, %c0_22, %c0_23] : memref<9x4x128xf32, #tpu.memory_space<vmem>>, vector<1x4x128xf32>
    %41 = vector.shape_cast %40 : vector<1x4x128xf32> to vector<4x128xf32>
    %cst_24 = arith.constant dense<0.000000e+00> : vector<512x128xf32>
    %42 = tpu.matmul %39, %41, %cst_24 {dimension_numbers = #tpu.dot_dimension_numbers<[1], [0], [0], [1], [0, 0, 1, 1], [], []>} : vector<512x4xf32>, vector<4x128xf32>, vector<512x128xf32> -> vector<512x128xf32>
    %43 = arith.addf %37, %42 : vector<512x128xf32>
    %44 = vector.extract_strided_slice %0 {offsets = [0, 2, 1, 0], sizes = [2, 16, 16, 4], strides = [1, 1, 1, 1]} : vector<2x18x18x4xf32> to vector<2x16x16x4xf32>
    %45 = vector.shape_cast %44 : vector<2x16x16x4xf32> to vector<512x4xf32>
    %c7 = arith.constant 7 : index
    %c0_25 = arith.constant 0 : index
    %c0_26 = arith.constant 0 : index
    %46 = vector.load %arg2[%c7, %c0_25, %c0_26] : memref<9x4x128xf32, #tpu.memory_space<vmem>>, vector<1x4x128xf32>
    %47 = vector.shape_cast %46 : vector<1x4x128xf32> to vector<4x128xf32>
    %cst_27 = arith.constant dense<0.000000e+00> : vector<512x128xf32>
    %48 = tpu.matmul %45, %47, %cst_27 {dimension_numbers = #tpu.dot_dimension_numbers<[1], [0], [0], [1], [0, 0, 1, 1], [], []>} : vector<512x4xf32>, vector<4x128xf32>, vector<512x128xf32> -> vector<512x128xf32>
    %49 = arith.addf %43, %48 : vector<512x128xf32>
    %50 = vector.extract_strided_slice %0 {offsets = [0, 2, 2, 0], sizes = [2, 16, 16, 4], strides = [1, 1, 1, 1]} : vector<2x18x18x4xf32> to vector<2x16x16x4xf32>
    %51 = vector.shape_cast %50 : vector<2x16x16x4xf32> to vector<512x4xf32>
    %c8 = arith.constant 8 : index
    %c0_28 = arith.constant 0 : index
    %c0_29 = arith.constant 0 : index
    %52 = vector.load %arg2[%c8, %c0_28, %c0_29] : memref<9x4x128xf32, #tpu.memory_space<vmem>>, vector<1x4x128xf32>
    %53 = vector.shape_cast %52 : vector<1x4x128xf32> to vector<4x128xf32>
    %cst_30 = arith.constant dense<0.000000e+00> : vector<512x128xf32>
    %54 = tpu.matmul %51, %53, %cst_30 {dimension_numbers = #tpu.dot_dimension_numbers<[1], [0], [0], [1], [0, 0, 1, 1], [], []>} : vector<512x4xf32>, vector<4x128xf32>, vector<512x128xf32> -> vector<512x128xf32>
    %55 = arith.addf %49, %54 : vector<512x128xf32>
    %c0_31 = arith.constant 0 : index
    %c0_32 = arith.constant 0 : index
    %56 = vector.load %arg3[%c0_31, %c0_32] : memref<1x128xf32, #tpu.memory_space<vmem>>, vector<1x128xf32>
    %57 = vector.broadcast %56 : vector<1x128xf32> to vector<512x128xf32>
    %58 = arith.addf %55, %57 : vector<512x128xf32>
    %cst_33 = arith.constant 0.000000e+00 : f32
    %59 = vector.broadcast %cst_33 : f32 to vector<512x128xf32>
    %60 = arith.maximumf %58, %59 : vector<512x128xf32>
    %61 = vector.shape_cast %60 : vector<512x128xf32> to vector<2x256x128xf32>
    %cst_34 = arith.constant dense<0.000000e+00> : vector<2x128xf32>
    %62 = vector.multi_reduction <add>, %61, %cst_34 [1] : vector<2x256x128xf32> to vector<2x128xf32>
    %cst_35 = arith.constant 2.560000e+02 : f32
    %63 = vector.broadcast %cst_35 : f32 to vector<2x128xf32>
    %64 = arith.divf %62, %63 : vector<2x128xf32>
    %c0_36 = arith.constant 0 : index
    %c0_37 = arith.constant 0 : index
    %65 = vector.load %arg4[%c0_36, %c0_37] : memref<128x128xf32, #tpu.memory_space<vmem>>, vector<128x128xf32>
    %cst_38 = arith.constant dense<0.000000e+00> : vector<2x128xf32>
    %66 = tpu.matmul %64, %65, %cst_38 {dimension_numbers = #tpu.dot_dimension_numbers<[1], [0], [0], [1], [0, 0, 1, 1], [], []>} : vector<2x128xf32>, vector<128x128xf32>, vector<2x128xf32> -> vector<2x128xf32>
    %c0_39 = arith.constant 0 : index
    %c0_40 = arith.constant 0 : index
    %67 = vector.load %arg5[%c0_39, %c0_40] : memref<1x128xf32, #tpu.memory_space<vmem>>, vector<1x128xf32>
    %68 = vector.broadcast %67 : vector<1x128xf32> to vector<2x128xf32>
    %69 = arith.addf %66, %68 : vector<2x128xf32>
    %c0_41 = arith.constant 0 : index
    %c0_42 = arith.constant 0 : index
    %70 = vector.load %arg6[%c0_41, %c0_42] : memref<2x128xf32, #tpu.memory_space<vmem>>, vector<2x128xf32>
    tpu.vector_store %arg6[%c0_41, %c0_42], %69 {strides = array<i32>} : memref<2x128xf32, #tpu.memory_space<vmem>>, vector<2x128xf32>,
    return
  }
  func.func @transform_0(%arg0: i32) -> (i32, i32, i32, i32) {
    %c0_i32 = arith.constant 0 : i32
    %c0_i32_0 = arith.constant 0 : i32
    %c0_i32_1 = arith.constant 0 : i32
    %c0_i32_2 = arith.constant 0 : i32
    return %arg0, %c0_i32, %c0_i32_0, %c0_i32_1 : i32, i32, i32, i32
  }
  func.func @transform_1(%arg0: i32) -> (i32, i32, i32) {
    %c0_i32 = arith.constant 0 : i32
    %c0_i32_0 = arith.constant 0 : i32
    %c0_i32_1 = arith.constant 0 : i32
    %c0_i32_2 = arith.constant 0 : i32
    return %c0_i32, %c0_i32_0, %c0_i32_1 : i32, i32, i32
  }
  func.func @transform_2(%arg0: i32) -> (i32, i32) {
    %c0_i32 = arith.constant 0 : i32
    %c0_i32_0 = arith.constant 0 : i32
    %c0_i32_1 = arith.constant 0 : i32
    return %c0_i32, %c0_i32_0 : i32, i32
  }
  func.func @transform_3(%arg0: i32) -> (i32, i32) {
    %c0_i32 = arith.constant 0 : i32
    %c0_i32_0 = arith.constant 0 : i32
    %c0_i32_1 = arith.constant 0 : i32
    return %c0_i32, %c0_i32_0 : i32, i32
  }
  func.func @transform_4(%arg0: i32) -> (i32, i32) {
    %c0_i32 = arith.constant 0 : i32
    %c0_i32_0 = arith.constant 0 : i32
    %c0_i32_1 = arith.constant 0 : i32
    return %c0_i32, %c0_i32_0 : i32, i32
  }
  func.func @transform_5(%arg0: i32) -> (i32, i32) {
    %c0_i32 = arith.constant 0 : i32
    %c0_i32_0 = arith.constant 0 : i32
    return %arg0, %c0_i32 : i32, i32
  }
}

</mosaic_0001>

<bundles_post_ra>
// kernel: tpu_custom_call.1
= control target key start
LH: loop header
LB: loop body
LE: loop exit
PB: predicated region body
PF: predicated region fallthrough
CT: control target
= control target key end

     0   :  { %vm518_vm0 = vcmask 1043456   ;;  %vm226_vm1 = vcmask 1046528   ;;  %vm389_vm2 = vcmask 31744   ;;  %s7734_s0 = inlined_call_operand.vmem [shape: f32[2,18,18,4], index: 0, kind: input, shape index: {}]   ;;  %s7735_s1 = inlined_call_operand.vmem [shape: f32[9,4,128], index: 1, kind: input, shape index: {}]   ;;  %s7736_s2 = inlined_call_operand.vmem [shape: f32[1,128], index: 2, kind: input, shape index: {}]   ;;  %s7737_s3 = inlined_call_operand.vmem [shape: f32[128,128], index: 3, kind: input, shape index: {}]   ;;  %s7738_s4 = inlined_call_operand.vmem [shape: f32[1,128], index: 4, kind: input, shape index: {}]   ;;  %s7739_s5 = inlined_call_operand.hbm [shape: f32[2,128], index: 5, kind: output, shape index: {}]  }
   0x1   :  { %v3683_v0 = vld [vmem:[%s7735_s1 + $0x4] sm:$0xf]  ;;  %v4467_v1 = vld [vmem:[%s7734_s0 + $0xc8] sm:$0xff]  ;;  %v47_v2 = vld [vmem:[%s7734_s0 + $0xd0] sm:$0x3] }
   0x2   :  { %4276 = vmatpush.msk.msra.mxu1 %vm518_vm0, %v3683_v0  ;;  %4277 = vmatpush.msk.msra.mxu2 %vm518_vm0, %v3683_v0  ;;  %v7740_v3 = vrot.slane %v4467_v1, 1  ;;  %v270_v4 = vrot.slane %v47_v2, 1  ;;  %v66_v5 = vld [vmem:[%s7734_s0 + $0x168] sm:$0xff]  ;;  %v67_v6 = vld [vmem:[%s7734_s0 + $0x170] sm:$0xff]  ;;  %v4488_v10 = vld [vmem:[%s7734_s0 + $0x260] sm:$0xff] }
   0x3   :  { %v302_v7 = vrot.slane %v66_v5, 1  ;;  %v303_v8 = vrot.slane %v67_v6, 1  ;;  %v3814_v9 = vld [vmem:[%s7735_s1 + $0x8] sm:$0xf]  ;;  %4278 = vmatpush.msk.msra.mxu3 %vm518_vm0, %v3683_v0  ;;  %v4493_v11 = vld [vmem:[%s7734_s0 + $0xd8] sm:$0xff]  ;;  %3684 = vmatpush.msk.msra.mxu0 %vm518_vm0, %v3683_v0  ;;  %v7741_v14 = vrot.slane %v4488_v10, 1 }
   0x4   :  { %v4499_v12 = vsel %vm226_vm1, %v7740_v3, %v270_v4  ;;  %3815 = vmatpush.msk.msrb.mxu2 %vm518_vm0, %v3814_v9  ;;  %v98_v13 = vld [vmem:[%s7734_s0 + $0x268] sm:$0x3]  ;;  %v3880_v15 = vld [vmem:[%s7735_s1 + $0xc] sm:$0xf]  ;;  %v4512_v16 = vld [vmem:[%s7734_s0 + $0xe0] sm:$0xff]  ;;  %v272_v21 = vrot.slane %v4493_v11, 1 }
   0x5   :  { %7910 = vst [vmem:[#allocation5_spill] sm:$0xff] %v4499_v12  ;;  %3702 = vmatmul.msk.f32.vlgmr.msra.gmra.mxu1 %vm389_vm2, %v4499_v12  ;;  %v4517_v17 = vsel %vm226_vm1, %v302_v7, %v303_v8  ;;  %v345_v18 = vrot.slane %v98_v13, 1  ;;  %3881 = vmatpush.msk.msrb.mxu3 %vm518_vm0, %v3880_v15  ;;  %v68_v19 = vld [vmem:[%s7734_s0 + $0x178] sm:$0x3]  ;;  %v4526_v20 = vld [vmem:[%s7734_s0] sm:$0xff]  ;;  %v273_v22 = vrot.slane %v4512_v16, 1 }
   0x6   :  { %7911 = vst [vmem:[#allocation6_spill] sm:$0xff] %v4517_v17  ;;  %3715 = vmatmul.msk.f32.vlgmr.msra.gmra.mxu2 %vm389_vm2, %v4517_v17  ;;  %v4535_v23 = vld [vmem:[%s7734_s0 + $0x8] sm:$0xff]  ;;  %v227_v24 = vrot.slane %v4526_v20, 1  ;;  %v99_v25 = vld [vmem:[%s7734_s0 + $0x270] sm:$0xff]  ;;  %v100_v26 = vld [vmem:[%s7734_s0 + $0x278] sm:$0xff]  ;;  %v305_v28 = vrot.slane %v68_v19, 1 }
   0x7   :  { %v4547_v27 = vsel %vm226_vm1, %v7741_v14, %v345_v18  ;;  %v228_v29 = vrot.slane %v4535_v23, 1  ;;  %v3946_v30 = vld [vmem:[%s7735_s1 + $0x10] sm:$0xf]  ;;  %v347_v33 = vrot.slane %v99_v25, 1  ;;  %v348_v34 = vrot.slane %v100_v26, 1  ;;  %v76_v40 = vld [vmem:[%s7734_s0 + $0x1b8] sm:$0xff] }
   0x8   :  { %7912 = vst [vmem:[#allocation7_spill] sm:$0xff] %v4547_v27  ;;  %3732 = vmatmul.msk.f32.vlgmr.msra.gmra.mxu3 %vm389_vm2, %v4547_v27  ;;  %3947 = vmatpush.msk.msrb.mxu0 %vm518_vm0, %v3946_v30  ;;  %v4559_v31 = vld [vmem:[%s7734_s0 + $0x10] sm:$0x3]  ;;  %v4563_v35 = vsel %vm226_vm1, %v272_v21, %v273_v22  ;;  %v4567_v36 = vsel %vm226_vm1, %v303_v8, %v305_v28  ;;  %v4572_v37 = vld [vmem:[%s7734_s0 + $0xe8] sm:$0x3]  ;;  %v308_v45 = vrot.slane %v76_v40, 1 }
   0x9   :  { %v229_v32 = vsel %vm226_vm1, %v227_v24, %v228_v29  ;;  %7913 = vst [vmem:[#allocation8_spill] sm:$0xff] %v4563_v35  ;;  %v230_v38 = vrot.slane %v4559_v31, 1  ;;  %v75_v39 = vld [vmem:[%s7734_s0 + $0x1b0] sm:$0xff]  ;;  %v4584_v41 = vsel %vm226_vm1, %v347_v33, %v348_v34  ;;  %v275_v42 = vrot.slane %v4572_v37, 1  ;;  %v101_v43 = vld [vmem:[%s7734_s0 + $0x280] sm:$0x3] }
   0xa   :  { %3685 = vmatmul.msk.f32.vlgmr.msra.gmra.mxu0 %vm389_vm2, %v229_v32  ;;  %7914 = vst [vmem:[#allocation9_spill] sm:$0xff] %v4567_v36  ;;  %v307_v44 = vrot.slane %v75_v39, 1  ;;  %v129_v47 = vld [vmem:[%s7735_s1] sm:$0xf]  ;;  %v4601_v48 = vld [vmem:[%s7734_s0 + $0x18] sm:$0xff]  ;;  %v350_v50 = vrot.slane %v101_v43, 1 }
   0xb   :  { %7915 = vst [vmem:[#allocation10_spill] sm:$0xff] %v4584_v41  ;;  %v231_v46 = vsel %vm226_vm1, %v228_v29, %v230_v38  ;;  %v4606_v49 = vld [vmem:[%s7734_s0 + $0x20] sm:$0xff]  ;;  %3749 = vmatpush.msk.msrb.mxu1 %vm518_vm0, %v129_v47  ;;  %v4610_v51 = vsel %vm226_vm1, %v273_v22, %v275_v42  ;;  %v4616_v52 = vld [vmem:[%s7734_s0 + $0xf0] sm:$0xff]  ;;  %v4621_v53 = vld [vmem:[%s7734_s0 + $0xf8] sm:$0xff]  ;;  %v232_v55 = vrot.slane %v4601_v48, 1 }
   0xc   :  { %v309_v54 = vsel %vm226_vm1, %v307_v44, %v308_v45  ;;  %v233_v56 = vrot.slane %v4606_v49, 1 }
   0xd   :  { %3703 = vmatmul.msk.f32.gmra.mxu1 %vm389_vm2, %v4563_v35 }
   0xe   :  { %3716 = vmatmul.msk.f32.gmra.mxu2 %vm389_vm2, %v4567_v36 }
  0x10   :  { %3733 = vmatmul.msk.f32.gmra.mxu3 %vm389_vm2, %v4584_v41 }
  0x12   :  { %3686 = vmatmul.msk.f32.gmra.mxu0 %vm389_vm2, %v231_v46 }
  0x13   :  { %10 = vsyncpa [#allocation3], 0  ;;  %v77_v57 = vld [vmem:[%s7734_s0 + $0x1c0] sm:$0x3]  ;;  %v4632_v58 = vsel %vm226_vm1, %v348_v34, %v350_v50  ;;  %v277_v59 = vrot.slane %v4616_v52, 1  ;;  %v278_v60 = vrot.slane %v4621_v53, 1  ;;  %v4644_v0 = vsel %vm226_vm1, %v232_v55, %v233_v56 }
  0x14   :  { %7916 = vst [vmem:[#allocation11_spill] sm:$0xff] %v4632_v58  ;;  %v102_v61 = vld [vmem:[%s7734_s0 + $0x288] sm:$0xff]  ;;  %v103_v62 = vld [vmem:[%s7734_s0 + $0x290] sm:$0xff]  ;;  %v310_v63 = vrot.slane %v77_v57, 1  ;;  %v4662_v8 = vld [vmem:[%s7734_s0 + $0x100] sm:$0x3] }
  0x15   :  { %3704 = vmatmul.msk.f32.gmra.mxu1 %vm389_vm2, %v4610_v51  ;;  %v4651_v2 = vld [vmem:[%s7734_s0 + $0x28] sm:$0x3]  ;;  %v352_v4 = vrot.slane %v102_v61, 1  ;;  %v353_v5 = vrot.slane %v103_v62, 1  ;;  %v4654_v6 = vsel %vm226_vm1, %v277_v59, %v278_v60  ;;  %7917 = vst [vmem:[#allocation12_spill] sm:$0xff] %v4662_v8  ;;  %v79_v15 = vld [vmem:[%s7734_s0 + $0x1d0] sm:$0xff] }
  0x16   :  { %3717 = vmatmul.msk.f32.gmra.mxu2 %vm389_vm2, %v309_v54  ;;  %v311_v7 = vsel %vm226_vm1, %v308_v45, %v310_v63  ;;  %v235_v9 = vrot.slane %v4651_v2, 1  ;;  %v78_v13 = vld [vmem:[%s7734_s0 + $0x1c8] sm:$0xff]  ;;  %v280_v19 = vrot.slane %v4662_v8, 1  ;;  %v104_v21 = vld [vmem:[%s7734_s0 + $0x298] sm:$0x3]  ;;  %v313_v24 = vrot.slane %v79_v15, 1 }
  0x17   :  { %v4674_v18 = vsel %vm226_vm1, %v352_v4, %v353_v5  ;;  %v312_v22 = vrot.slane %v78_v13, 1  ;;  %v4689_v26 = vld [vmem:[%s7734_s0 + $0x30] sm:$0xff]  ;;  %v4694_v28 = vld [vmem:[%s7734_s0 + $0x38] sm:$0xff]  ;;  %v355_v29 = vrot.slane %v104_v21, 1  ;;  %v4707_v33 = vld [vmem:[%s7734_s0 + $0x108] sm:$0xff]  ;;  %vm1071_vm3 = vcmask 1045504  }
  0x18   :  { %3734 = vmatmul.msk.f32.gmra.mxu3 %vm389_vm2, %v4632_v58  ;;  %7918 = vst [vmem:[#allocation13_spill] sm:$0xff] %v4674_v18  ;;  %v4682_v25 = vsel %vm226_vm1, %v233_v56, %v235_v9  ;;  %v4697_v30 = vsel %vm226_vm1, %v278_v60, %v280_v19  ;;  %v4712_v34 = vld [vmem:[%s7734_s0 + $0x110] sm:$0xff]  ;;  %v237_v38 = vrot.slane %v4689_v26, 1  ;;  %v238_v39 = vrot.slane %v4694_v28, 1  ;;  %v80_v40 = vld [vmem:[%s7734_s0 + $0x1d8] sm:$0x3] }
  0x19   :  { %v4702_v32 = vsel %vm226_vm1, %v312_v22, %v313_v24  ;;  %v4722_v42 = vsel %vm226_vm1, %v353_v5, %v355_v29  ;;  %v282_v43 = vrot.slane %v4707_v33, 1  ;;  %v283_v44 = vrot.slane %v4712_v34, 1  ;;  %v105_v45 = vld [vmem:[%s7734_s0 + $0x2a0] sm:$0xff]  ;;  %v106_v46 = vld [vmem:[%s7734_s0 + $0x2a8] sm:$0xff]  ;;  %v4755_v60 = vld [vmem:[%s7734_s0 + $0x118] sm:$0x3] }
  0x1a   :  { %3687 = vmatmul.msk.f32.gmra.mxu0 %vm389_vm2, %v4644_v0  ;;  %7919 = vst [vmem:[#allocation14_spill] sm:$0xff] %v4702_v32  ;;  %v315_v47 = vrot.slane %v80_v40, 1  ;;  %v4735_v50 = vsel %vm226_vm1, %v237_v38, %v238_v39  ;;  %v4742_v54 = vld [vmem:[%s7734_s0 + $0x40] sm:$0x3]  ;;  %v357_v55 = vrot.slane %v105_v45, 1  ;;  %v358_v56 = vrot.slane %v106_v46, 1 }
  0x1b   :  { %7920 = vst [vmem:[#allocation15_spill] sm:$0xff] %v4722_v42  ;;  %v4745_v57 = vsel %vm226_vm1, %v282_v43, %v283_v44  ;;  %v240_v61 = vrot.slane %v4742_v54, 1  ;;  %v81_v62 = vld [vmem:[%s7734_s0 + $0x1e0] sm:$0xff]  ;;  %v82_v63 = vld [vmem:[%s7734_s0 + $0x1e8] sm:$0xff]  ;;  %v285_v5 = vrot.slane %v4755_v60, 1  ;;  %v4788_v21 = vld [vmem:[%s7734_s0 + $0x50] sm:$0xff] }
  0x1c   :  { %7921 = vst [vmem:[#allocation16_spill] sm:$0xff] %v4735_v50  ;;  %v4750_v59 = vsel %vm226_vm1, %v313_v24, %v315_v47  ;;  %v4767_v4 = vsel %vm226_vm1, %v357_v55, %v358_v56  ;;  %v317_v9 = vrot.slane %v81_v62, 1  ;;  %v318_v13 = vrot.slane %v82_v63, 1  ;;  %v4783_v19 = vld [vmem:[%s7734_s0 + $0x48] sm:$0xff]  ;;  %v4801_v38 = vld [vmem:[%s7734_s0 + $0x120] sm:$0xff]  ;;  %v108_v55 = vld [vmem:[%s7734_s0 + $0x2b8] sm:$0xff] }
  0x1d   :  { %3705 = vmatmul.msk.f32.gmra.mxu1 %vm389_vm2, %v4654_v6  ;;  %7922 = vst [vmem:[#allocation17_spill] sm:$0xff] %v4745_v57  ;;  %v4776_v15 = vsel %vm226_vm1, %v238_v39, %v240_v61  ;;  %v4791_v24 = vsel %vm226_vm1, %v283_v44, %v285_v5  ;;  %v4806_v39 = vld [vmem:[%s7734_s0 + $0x128] sm:$0xff]  ;;  %v242_v40 = vrot.slane %v4783_v19, 1  ;;  %v243_v43 = vrot.slane %v4788_v21, 1  ;;  %v83_v44 = vld [vmem:[%s7734_s0 + $0x1f0] sm:$0x3] }
  0x1e   :  { %3718 = vmatmul.msk.f32.gmra.mxu2 %vm389_vm2, %v311_v7  ;;  %7923 = vst [vmem:[#allocation18_spill] sm:$0xff] %v4750_v59  ;;  %v107_v7 = vld [vmem:[%s7734_s0 + $0x2b0] sm:$0x3]  ;;  %v4796_v29 = vsel %vm226_vm1, %v317_v9, %v318_v13  ;;  %v287_v46 = vrot.slane %v4801_v38, 1  ;;  %v288_v47 = vrot.slane %v4806_v39, 1  ;;  %v109_v61 = vld [vmem:[%s7734_s0 + $0x2c0] sm:$0xff] }
  0x1f   :  { %7924 = vst [vmem:[#allocation19_spill] sm:$0xff] %v4755_v60  ;;  %v360_v22 = vrot.slane %v107_v7, 1  ;;  %v320_v62 = vrot.slane %v83_v44, 1  ;;  %v4829_v63 = vsel %vm226_vm1, %v242_v40, %v243_v43  ;;  %v362_v5 = vrot.slane %v108_v55, 1  ;;  %v4849_v40 = vld [vmem:[%s7734_s0 + $0x130] sm:$0x3] }
  0x20   :  { %3735 = vmatmul.msk.f32.gmra.mxu3 %vm389_vm2, %v4674_v18  ;;  %7925 = vst [vmem:[#allocation20_spill] sm:$0xff] %v4767_v4  ;;  %v363_v7 = vrot.slane %v109_v61, 1  ;;  %v4839_v9 = vsel %vm226_vm1, %v287_v46, %v288_v47  ;;  %v84_v55 = vld [vmem:[%s7734_s0 + $0x1f8] sm:$0xff]  ;;  %v85_v46 = vld [vmem:[%s7734_s0 + $0x200] sm:$0xff]  ;;  %v290_v61 = vrot.slane %v4849_v40, 1  ;;  %v111_v58 = vld [vmem:[%s7734_s0 + $0x2d0] sm:$0xff] }
  0x21   :  { %7926 = vst [vmem:[#allocation21_spill] sm:$0xff] %v4776_v15  ;;  %v4816_v45 = vsel %vm226_vm1, %v358_v56, %v360_v22  ;;  %v4836_v56 = vld [vmem:[%s7734_s0 + $0x58] sm:$0x3]  ;;  %v4844_v22 = vsel %vm226_vm1, %v318_v13, %v320_v62  ;;  %v110_v62 = vld [vmem:[%s7734_s0 + $0x2c8] sm:$0x3]  ;;  %v322_v3 = vrot.slane %v84_v55, 1 }
  0x22   :  { %3688 = vmatmul.msk.f32.gmra.mxu0 %vm389_vm2, %v4682_v25  ;;  %7927 = vst [vmem:[#allocation22_spill] sm:$0xff] %v4791_v24  ;;  %v245_v44 = vrot.slane %v4836_v56, 1  ;;  %v4861_v13 = vsel %vm226_vm1, %v362_v5, %v363_v7  ;;  %v323_v14 = vrot.slane %v85_v46, 1  ;;  %v4877_v5 = vld [vmem:[%s7734_s0 + $0x60] sm:$0xff]  ;;  %v4885_v55 = vsel %vm226_vm1, %v288_v47, %v290_v61  ;;  %v86_v61 = vld [vmem:[%s7734_s0 + $0x208] sm:$0x3] }
  0x23   :  { %7928 = vst [vmem:[#allocation23_spill] sm:$0xff] %v4796_v29  ;;  %v4900_v46 = vld [vmem:[%s7734_s0 + $0x140] sm:$0xff]  ;;  %v112_v41 = vld [vmem:[%s7734_s0 + $0x2d8] sm:$0xff]  ;;  %v325_v27 = vrot.slane %v86_v61, 1  ;;  %vm3643_vm5 = vcmask 1041409   ;;  %s4430_s8 = smov [#allocation2]  }
  0x24   :  { %7929 = vst [vmem:[#allocation24_spill] sm:$0xff] %v4806_v39  ;;  %v293_v18 = vrot.slane %v4900_v46, 1  ;;  %s3672_s9 = sshll.u32 %s4430_s8, 4  ;;  %s3674_s12 = sshll.u32 %s7739_s5, 4  ;;  %s3673_s9 = int_to_ptr.vmem [resolvable:$true] %s3672_s9  ;;  %s3675_s12 = int_to_ptr.hbm [resolvable:$true] %s3674_s12 }
  0x25   :  { %3706 = vmatmul.msk.f32.gmra.mxu1 %vm389_vm2, %v4697_v30  ;;  %7930 = vst [vmem:[#allocation25_spill] sm:$0xff] %v4816_v45  ;;  %v4938_v61 = vsel %vm226_vm1, %v323_v14, %v325_v27 }
  0x26   :  { %3719 = vmatmul.msk.f32.gmra.mxu2 %vm389_vm2, %v4702_v32  ;;  %7931 = vst [vmem:[#allocation26_spill] sm:$0xff] %v4829_v63 }
  0x27   :  { %7932 = vst [vmem:[#allocation27_spill] sm:$0xff] %v4839_v9 }
  0x28   :  { %3736 = vmatmul.msk.f32.gmra.mxu3 %vm389_vm2, %v4722_v42  ;;  %7933 = vst [vmem:[#allocation28_spill] sm:$0xff] %v4844_v22  ;;  %v365_v42 = vrot.slane %v110_v62, 1  ;;  %v247_v62 = vrot.slane %v4877_v5, 1 }
  0x29   :  { %7934 = vst [vmem:[#allocation29_spill] sm:$0xff] %v4849_v40  ;;  %v115_v40 = vld [vmem:[%s7734_s0 + $0x2f0] sm:$0xff] }
  0x2a   :  { %3689 = vmatmul.msk.f32.gmra.mxu0 %vm389_vm2, %v4735_v50  ;;  %7935 = vst [vmem:[#allocation30_spill] sm:$0xff] %v4861_v13 }
  0x2b   :  { %7937 = vst [vmem:[#allocation32_spill] sm:$0xff] %v4885_v55 }
  0x2c   :  { %7940 = vst [vmem:[#allocation35_spill] sm:$0xff] %v4900_v46 }
  0x2d   :  { %3707 = vmatmul.msk.f32.gmra.mxu1 %vm389_vm2, %v4745_v57  ;;  %7944 = vst [vmem:[#allocation39_spill] sm:$0xff] %v4938_v61 }
  0x2e   :  { %3720 = vmatmul.msk.f32.gmra.mxu2 %vm389_vm2, %v4750_v59 }
  0x30   :  { %3737 = vmatmul.msk.f32.gmra.mxu3 %vm389_vm2, %v4767_v4  ;;  %v4882_v4 = vld [vmem:[%s7734_s0 + $0x68] sm:$0xff] }
  0x31   :  { %v248_v47 = vrot.slane %v4882_v4, 1 }
  0x32   :  { %3690 = vmatmul.msk.f32.gmra.mxu0 %vm389_vm2, %v4776_v15 }
  0x35   :  { %3708 = vmatmul.msk.f32.gmra.mxu1 %vm389_vm2, %v4791_v24 }
  0x36   :  { %3721 = vmatmul.msk.f32.gmra.mxu2 %vm389_vm2, %v4796_v29 }
  0x38   :  { %3738 = vmatmul.msk.f32.gmra.mxu3 %vm389_vm2, %v4816_v45  ;;  %v4870_v45 = vsel %vm226_vm1, %v243_v43, %v245_v44  ;;  %v4890_v43 = vsel %vm226_vm1, %v322_v3, %v323_v14  ;;  %v4895_v44 = vld [vmem:[%s7734_s0 + $0x138] sm:$0xff]  ;;  %v4910_v3 = vsel %vm226_vm1, %v363_v7, %v365_v42  ;;  %v4930_v42 = vld [vmem:[%s7734_s0 + $0x70] sm:$0x3]  ;;  %v367_v7 = vrot.slane %v111_v58, 1 }
  0x39   :  { %7936 = vst [vmem:[#allocation31_spill] sm:$0xff] %v4870_v45  ;;  %v88_v58 = vld [vmem:[%s7734_s0 + $0x218] sm:$0xff] }
  0x3a   :  { %3691 = vmatmul.msk.f32.gmra.mxu0 %vm389_vm2, %v4829_v63  ;;  %7938 = vst [vmem:[#allocation33_spill] sm:$0xff] %v4890_v43  ;;  %v328_v32 = vrot.slane %v88_v58, 1  ;;  %v4994_v58 = vld [vmem:[%s7734_s0 + $0x158] sm:$0xff] }
  0x3b   :  { %7939 = vst [vmem:[#allocation34_spill] sm:$0xff] %v4895_v44 }
  0x3c   :  { %7941 = vst [vmem:[#allocation36_spill] sm:$0xff] %v4910_v3 }
  0x3d   :  { %3709 = vmatmul.msk.f32.gmra.mxu1 %vm389_vm2, %v4839_v9  ;;  %7951 = vst [vmem:[#allocation46_spill] sm:$0xff] %v4994_v58 }
  0x3e   :  { %3722 = vmatmul.msk.f32.gmra.mxu2 %vm389_vm2, %v4844_v22  ;;  %v4923_v22 = vsel %vm226_vm1, %v247_v62, %v248_v47  ;;  %v4943_v62 = vld [vmem:[%s7734_s0 + $0x148] sm:$0x3] }
  0x3f   :  { %7942 = vst [vmem:[#allocation37_spill] sm:$0xff] %v4923_v22  ;;  %v295_v27 = vrot.slane %v4943_v62, 1 }
  0x40   :  { %3739 = vmatmul.msk.f32.gmra.mxu3 %vm389_vm2, %v4861_v13  ;;  %v292_v13 = vrot.slane %v4895_v44, 1  ;;  %7945 = vst [vmem:[#allocation40_spill] sm:$0xff] %v4943_v62  ;;  %v298_v62 = vrot.slane %v4994_v58, 1 }
  0x42   :  { %3692 = vmatmul.msk.f32.gmra.mxu0 %vm389_vm2, %v4870_v45  ;;  %v4933_v29 = vsel %vm226_vm1, %v292_v13, %v293_v18  ;;  %v113_v13 = vld [vmem:[%s7734_s0 + $0x2e0] sm:$0x3] }
  0x43   :  { %7943 = vst [vmem:[#allocation38_spill] sm:$0xff] %v4933_v29  ;;  %v370_v17 = vrot.slane %v113_v13, 1 }
  0x45   :  { %3710 = vmatmul.msk.f32.gmra.mxu1 %vm389_vm2, %v4885_v55 }
  0x46   :  { %3723 = vmatmul.msk.f32.gmra.mxu2 %vm389_vm2, %v4890_v43  ;;  %v368_v43 = vrot.slane %v112_v41, 1  ;;  %v87_v41 = vld [vmem:[%s7734_s0 + $0x210] sm:$0xff] }
  0x47   :  { %v327_v59 = vrot.slane %v87_v41, 1  ;;  %v4979_v41 = vsel %vm226_vm1, %v293_v18, %v295_v27  ;;  %v89_v27 = vld [vmem:[%s7734_s0 + $0x220] sm:$0x3] }
  0x48   :  { %3740 = vmatmul.msk.f32.gmra.mxu3 %vm389_vm2, %v4910_v3  ;;  %v250_v3 = vrot.slane %v4930_v42, 1  ;;  %v4955_v14 = vsel %vm226_vm1, %v367_v7, %v368_v43  ;;  %v4971_v7 = vld [vmem:[%s7734_s0 + $0x78] sm:$0xff]  ;;  %7948 = vst [vmem:[#allocation43_spill] sm:$0xff] %v4979_v41  ;;  %v330_v55 = vrot.slane %v89_v27, 1 }
  0x49   :  { %7946 = vst [vmem:[#allocation41_spill] sm:$0xff] %v4955_v14  ;;  %v252_v13 = vrot.slane %v4971_v7, 1 }
  0x4a   :  { %3693 = vmatmul.msk.f32.gmra.mxu0 %vm389_vm2, %v4923_v22  ;;  %v4964_v36 = vsel %vm226_vm1, %v248_v47, %v250_v3  ;;  %v4984_v47 = vsel %vm226_vm1, %v327_v59, %v328_v32  ;;  %v4989_v3 = vld [vmem:[%s7734_s0 + $0x150] sm:$0xff]  ;;  %v5004_v59 = vsel %vm226_vm1, %v368_v43, %v370_v17  ;;  %v5024_v17 = vld [vmem:[%s7734_s0 + $0x88] sm:$0x3]  ;;  %v5032_v27 = vsel %vm226_vm1, %v328_v32, %v330_v55 }
  0x4b   :  { %7947 = vst [vmem:[#allocation42_spill] sm:$0xff] %v4964_v36 }
  0x4c   :  { %7949 = vst [vmem:[#allocation44_spill] sm:$0xff] %v4984_v47 }
  0x4d   :  { %3711 = vmatmul.msk.f32.gmra.mxu1 %vm389_vm2, %v4933_v29  ;;  %7950 = vst [vmem:[#allocation45_spill] sm:$0xff] %v4989_v3  ;;  %v114_v29 = vld [vmem:[%s7734_s0 + $0x2e8] sm:$0xff] }
  0x4e   :  { %3724 = vmatmul.msk.f32.gmra.mxu2 %vm389_vm2, %v4938_v61  ;;  %v4976_v61 = vld [vmem:[%s7734_s0 + $0x80] sm:$0xff]  ;;  %7952 = vst [vmem:[#allocation47_spill] sm:$0xff] %v5004_v59  ;;  %v372_v43 = vrot.slane %v114_v29, 1  ;;  %v90_v29 = vld [vmem:[%s7734_s0 + $0x228] sm:$0xff] }
  0x4f   :  { %v253_v18 = vrot.slane %v4976_v61, 1  ;;  %7955 = vst [vmem:[#allocation50_spill] sm:$0xff] %v5032_v27 }
  0x50   :  { %3741 = vmatmul.msk.f32.gmra.mxu3 %vm389_vm2, %v4955_v14  ;;  %v297_v14 = vrot.slane %v4989_v3, 1  ;;  %v332_v3 = vrot.slane %v90_v29, 1 }
  0x52   :  { %3694 = vmatmul.msk.f32.gmra.mxu0 %vm389_vm2, %v4964_v36  ;;  %v5027_v58 = vsel %vm226_vm1, %v297_v14, %v298_v62  ;;  %v116_v14 = vld [vmem:[%s7734_s0 + $0x2f8] sm:$0x3] }
  0x53   :  { %7954 = vst [vmem:[#allocation49_spill] sm:$0xff] %v5027_v58 }
  0x55   :  { %3712 = vmatmul.msk.f32.gmra.mxu1 %vm389_vm2, %v4979_v41  ;;  %v5017_v41 = vsel %vm226_vm1, %v252_v13, %v253_v18  ;;  %v5037_v13 = vld [vmem:[%s7734_s0 + $0x160] sm:$0x3] }
  0x56   :  { %3725 = vmatmul.msk.f32.gmra.mxu2 %vm389_vm2, %v4984_v47  ;;  %7953 = vst [vmem:[#allocation48_spill] sm:$0xff] %v5017_v41  ;;  %v373_v47 = vrot.slane %v115_v40, 1  ;;  %v91_v40 = vld [vmem:[%s7734_s0 + $0x230] sm:$0xff]  ;;  %v300_v55 = vrot.slane %v5037_v13, 1 }
  0x57   :  { %7956 = vst [vmem:[#allocation51_spill] sm:$0xff] %v5037_v13  ;;  %v333_v46 = vrot.slane %v91_v40, 1  ;;  %v375_v13 = vrot.slane %v116_v14, 1 }
  0x58   :  { %3742 = vmatmul.msk.f32.gmra.mxu3 %vm389_vm2, %v5004_v59  ;;  %v255_v59 = vrot.slane %v5024_v17, 1  ;;  %v5049_v32 = vsel %vm226_vm1, %v372_v43, %v373_v47  ;;  %v5065_v43 = vld [vmem:[%s7734_s0 + $0x90] sm:$0xff]  ;;  %v5073_v29 = vsel %vm226_vm1, %v298_v62, %v300_v55  ;;  %v118_v55 = vld [vmem:[%s7734_s0 + $0x308] sm:$0xff] }
  0x59   :  { %7957 = vst [vmem:[#allocation52_spill] sm:$0xff] %v5049_v32  ;;  %v5088_v62 = vsel %vm226_vm1, %v373_v47, %v375_v13  ;;  %v5106_v47 = vld [vmem:[%s7734_s0 + $0xa0] sm:$0x3] }
  0x5a   :  { %3695 = vmatmul.msk.f32.gmra.mxu0 %vm389_vm2, %v5017_v41  ;;  %v5058_v9 = vsel %vm226_vm1, %v253_v18, %v255_v59  ;;  %7959 = vst [vmem:[#allocation54_spill] sm:$0xff] %v5073_v29  ;;  %v5078_v18 = vsel %vm226_vm1, %v332_v3, %v333_v46  ;;  %v257_v59 = vrot.slane %v5065_v43, 1  ;;  %v117_v3 = vld [vmem:[%s7734_s0 + $0x300] sm:$0xff] }
  0x5b   :  { %7958 = vst [vmem:[#allocation53_spill] sm:$0xff] %v5058_v9  ;;  %v377_v13 = vrot.slane %v117_v3, 1 }
  0x5c   :  { %7960 = vst [vmem:[#allocation55_spill] sm:$0xff] %v5078_v18 }
  0x5d   :  { %3713 = vmatmul.msk.f32.gmra.mxu1 %vm389_vm2, %v5027_v58  ;;  %7961 = vst [vmem:[#allocation56_spill] sm:$0xff] %v5088_v62 }
  0x5e   :  { %3726 = vmatmul.msk.f32.gmra.mxu2 %vm389_vm2, %v5032_v27  ;;  %v5070_v27 = vld [vmem:[%s7734_s0 + $0x98] sm:$0xff] }
  0x5f   :  { %v258_v40 = vrot.slane %v5070_v27, 1 }
  0x60   :  { %3743 = vmatmul.msk.f32.gmra.mxu3 %vm389_vm2, %v5049_v32  ;;  %v92_v32 = vld [vmem:[%s7734_s0 + $0x238] sm:$0x3] }
  0x61   :  { %v335_v14 = vrot.slane %v92_v32, 1  ;;  %v5099_v58 = vsel %vm226_vm1, %v257_v59, %v258_v40  ;;  %v260_v32 = vrot.slane %v5106_v47, 1  ;;  %v93_v59 = vld [vmem:[%s7734_s0 + $0x240] sm:$0xff] }
  0x62   :  { %3696 = vmatmul.msk.f32.gmra.mxu0 %vm389_vm2, %v5058_v9  ;;  %7962 = vst [vmem:[#allocation57_spill] sm:$0xff] %v5099_v58 }
  0x63   :  { %v5134_v44 = vsel %vm226_vm1, %v258_v40, %v260_v32  ;;  %v4144_v40 = vld [vmem:[%s7735_s1 + $0x1c] sm:$0xf]  ;;  %v4012_v32 = vld [vmem:[%s7735_s1 + $0x14] sm:$0xf] }
  0x64   :  { %7965 = vst [vmem:[#allocation60_spill] sm:$0xff] %v5134_v44  ;;  %4145 = vmatpush.msk.msra.mxu3 %vm518_vm0, %v4144_v40  ;;  %4013 = vmatpush.msk.msra.mxu1 %vm518_vm0, %v4012_v32  ;;  %v121_v32 = vld [vmem:[%s7734_s0 + $0x320] sm:$0xff] }
  0x65   :  { %3714 = vmatmul.msk.f32.gmra.mxu1 %vm389_vm2, %v5073_v29  ;;  %v5111_v29 = vsel %vm226_vm1, %v333_v46, %v335_v14  ;;  %v119_v46 = vld [vmem:[%s7734_s0 + $0x310] sm:$0x3]  ;;  %v337_v14 = vrot.slane %v93_v59, 1  ;;  %v383_v57 = vrot.slane %v121_v32, 1 }
  0x66   :  { %3727 = vmatmul.msk.f32.gmra.mxu2 %vm389_vm2, %v5078_v18  ;;  %v378_v18 = vrot.slane %v118_v55, 1  ;;  %7963 = vst [vmem:[#allocation58_spill] sm:$0xff] %v5111_v29  ;;  %v4078_v55 = vld [vmem:[%s7735_s1 + $0x18] sm:$0xf] }
  0x67   :  { %4079 = vmatpush.msk.msra.mxu2 %vm518_vm0, %v4078_v55 }
  0x68   :  { %3744 = vmatmul.msk.f32.gmra.mxu3 %vm389_vm2, %v5088_v62  ;;  %v94_v62 = vld [vmem:[%s7734_s0 + $0x248] sm:$0xff]  ;;  %v5123_v3 = vsel %vm226_vm1, %v377_v13, %v378_v18 }
  0x69   :  { %7964 = vst [vmem:[#allocation59_spill] sm:$0xff] %v5123_v3  ;;  %v338_v60 = vrot.slane %v94_v62, 1  ;;  %v5142_v13 = vld [vmem:[%s7734_s0 + $0xa8] sm:$0xff]  ;;  %v380_v62 = vrot.slane %v119_v46, 1  ;;  %v95_v46 = vld [vmem:[%s7734_s0 + $0x250] sm:$0x3] }
  0x6a   :  { %3697 = vmatmul.msk.f32.gmra.mxu0 %vm389_vm2, %v5099_v58  ;;  %v262_v55 = vrot.slane %v5142_v13, 1  ;;  %v340_v24 = vrot.slane %v95_v46, 1 }
  0x6b   :  { %v5160_v59 = vsel %vm226_vm1, %v337_v14, %v338_v60  ;;  %v5170_v40 = vsel %vm226_vm1, %v378_v18, %v380_v62  ;;  %v120_v14 = vld [vmem:[%s7734_s0 + $0x318] sm:$0xff]  ;;  %v4210_v62 = vld [vmem:[%s7735_s1 + $0x20] sm:$0xf] }
  0x6c   :  { %7966 = vst [vmem:[#allocation61_spill] sm:$0xff] %v5160_v59  ;;  %v5188_v18 = vld [vmem:[%s7734_s0 + $0xb8] sm:$0x3]  ;;  %4211 = vmatpush.msk.msra.mxu0 %vm518_vm0, %v4210_v62  ;;  %v5221_v62 = vld [vmem:[%s7734_s0 + $0xc0] sm:$0xff] }
  0x6d   :  { %3750 = vmatmul.msk.f32.vlgmr.msrb.gmra.mxu1 %vm389_vm2, %v4526_v20  ;;  %7967 = vst [vmem:[#allocation62_spill] sm:$0xff] %v5170_v40  ;;  %v265_v46 = vrot.slane %v5188_v18, 1 }
  0x6e   :  { %3728 = vmatmul.msk.f32.gmra.mxu2 %vm389_vm2, %v5111_v29  ;;  %v5147_v29 = vld [vmem:[%s7734_s0 + $0xb0] sm:$0xff] }
  0x70   :  { %3745 = vmatmul.msk.f32.gmra.mxu3 %vm389_vm2, %v5123_v3  ;;  %v263_v3 = vrot.slane %v5147_v29, 1 }
  0x72   :  { %3698 = vmatmul.msk.f32.gmra.mxu0 %vm389_vm2, %v5134_v44  ;;  %v5181_v39 = vsel %vm226_vm1, %v262_v55, %v263_v3  ;;  %v5197_v55 = vsel %vm226_vm1, %v338_v60, %v340_v24  ;;  %v122_v60 = vld [vmem:[%s7734_s0 + $0x328] sm:$0x3]  ;;  %v5214_v32 = vsel %vm226_vm1, %v263_v3, %v265_v46  ;;  %v267_v3 = vrot.slane %v5221_v62, 1 }
  0x73   :  { %7968 = vst [vmem:[#allocation63_spill] sm:$0xff] %v5181_v39 }
  0x74   :  { %7969 = vst [vmem:[#allocation64_spill] sm:$0xff] %v5197_v55 }
  0x75   :  { %3751 = vmatmul.msk.f32.gmra.mxu1 %vm389_vm2, %v4535_v23  ;;  %7971 = vst [vmem:[#allocation66_spill] sm:$0xff] %v5214_v32 }
  0x76   :  { %3729 = vmatmul.msk.f32.gmra.mxu2 %vm389_vm2, %v5160_v59  ;;  %v382_v59 = vrot.slane %v120_v14, 1 }
  0x78   :  { %3746 = vmatmul.msk.f32.gmra.mxu3 %vm389_vm2, %v5170_v40  ;;  %v96_v40 = vld [vmem:[%s7734_s0 + $0x258] sm:$0xff]  ;;  %v5206_v14 = vsel %vm226_vm1, %v382_v59, %v383_v57  ;;  %v385_v59 = vrot.slane %v122_v60, 1 }
  0x79   :  { %7970 = vst [vmem:[#allocation65_spill] sm:$0xff] %v5206_v14  ;;  %v342_v24 = vrot.slane %v96_v40, 1 }
  0x7a   :  { %3699 = vmatmul.msk.f32.gmra.mxu0 %vm389_vm2, %v5181_v39  ;;  %v5236_v46 = vsel %vm226_vm1, %v383_v57, %v385_v59 }
  0x7b   :  { %7974 = vst [vmem:[#allocation68_spill] sm:$0xff] %v5236_v46 }
  0x7d   :  { %3752 = vmatmul.msk.f32.gmra.mxu1 %vm389_vm2, %v4601_v48 }
  0x7e   :  { %3730 = vmatmul.msk.f32.gmra.mxu2 %vm389_vm2, %v5197_v55  ;;  %v7972_v55 = vrot.slane %v4488_v10, 1  ;;  %v1073_v10 = vrot.slane %v4535_v23, 2 }
  0x80   :  { %3747 = vmatmul.msk.f32.gmra.mxu3 %vm389_vm2, %v5206_v14  ;;  %v5230_v40 = vsel %vm226_vm1, %v342_v24, %v7972_v55  ;;  %v1072_v14 = vrot.slane %v4526_v20, 2  ;;  %v7975_v55 = vrot.slane %v4467_v1, 1 }
  0x81   :  { %7973 = vst [vmem:[#allocation67_spill] sm:$0xff] %v5230_v40 }
  0x82   :  { %v5223_v8 = vpop.f32.mrf.mxu1  ;;  %3700 = vmatmul.msk.f32.gmra.mxu0 %vm389_vm2, %v5214_v32  ;;  %v5247_v24 = vsel %vm226_vm1, %v267_v3, %v7975_v55  ;;  %v1074_v20 = vsel %vm1071_vm3, %v1072_v14, %v1073_v10  ;;  %v1075_v3 = vrot.slane %v4559_v31, 2 }
  0x83   :  { %7976 = vst [vmem:[#allocation69_spill] sm:$0xff] %v5247_v24 }
  0x85   :  { %3753 = vmatmul.msk.f32.gmra.mxu1 %vm389_vm2, %v4606_v49 }
  0x86   :  { %3731 = vmatmul.msk.f32.gmra.mxu2 %vm389_vm2, %v5230_v40 }
  0x87   :  { %v5240_v60 = vpop.f32.mrf.mxu0 }
  0x88   :  { %3748 = vmatmul.msk.f32.gmra.mxu3 %vm389_vm2, %v5236_v46 }
  0x89   :  { %v5251_v57 = vpop.f32.mrf.mxu2 }
  0x8a   :  { %7977 = vst [vmem:[#allocation70_spill] sm:$0xff] %v5251_v57  ;;  %v5253_v59 = vpop.f32.mrf.mxu1  ;;  %3701 = vmatmul.msk.f32.gmra.mxu0 %vm389_vm2, %v5247_v24 }
  0x8b   :  { %v5257_v40 = vpop.f32.mrf.mxu3 }
  0x8c   :  { %7978 = vst [vmem:[#allocation71_spill] sm:$0xff] %v5257_v40  ;;  %v1076_v40 = vsel %vm1071_vm3, %v1073_v10, %v1075_v3 }
  0x8d   :  { %3754 = vmatmul.msk.f32.gmra.mxu1 %vm389_vm2, %v4689_v26 }
  0x8e   :  { %3816 = vmatmul.msk.f32.vlgmr.msrb.gmra.mxu2 %vm389_vm2, %v1074_v20  ;;  %v1077_v20 = vrot.slane %v4601_v48, 2 }
  0x8f   :  { %v5263_v23 = vpop.f32.mrf.mxu0 }
  0x90   :  { %3882 = vmatmul.msk.f32.vlgmr.msrb.gmra.mxu3 %vm389_vm2, %v4601_v48 }
  0x91   :  { %v5268_v55 = vpop.f32.mrf.mxu2 }
  0x92   :  { %7979 = vst [vmem:[#allocation72_spill] sm:$0xff] %v5268_v55  ;;  %v5270_v46 = vpop.f32.mrf.mxu1  ;;  %3948 = vmatmul.msk.f32.vlgmr.msrb.gmra.mxu0 %vm389_vm2, %v4644_v0  ;;  %v1078_v55 = vrot.slane %v4606_v49, 2 }
  0x93   :  { %v5274_v14 = vpop.f32.mrf.mxu3 }
  0x94   :  { %7980 = vst [vmem:[#allocation73_spill] sm:$0xff] %v5274_v14  ;;  %v1082_v14 = vrot.slane %v4689_v26, 2 }
  0x95   :  { %3755 = vmatmul.msk.f32.gmra.mxu1 %vm389_vm2, %v4694_v28 }
  0x96   :  { %3817 = vmatmul.msk.f32.gmra.mxu2 %vm389_vm2, %v1076_v40  ;;  %v5295_v40 = vsel %vm1071_vm3, %v1077_v20, %v1078_v55 }
  0x97   :  { %v5280_v31 = vpop.f32.mrf.mxu0  ;;  %7982 = vst [vmem:[#allocation75_spill] sm:$0xff] %v5295_v40 }
  0x98   :  { %3883 = vmatmul.msk.f32.gmra.mxu3 %vm389_vm2, %v4606_v49  ;;  %v1080_v49 = vrot.slane %v4651_v2, 2 }
  0x99   :  { %v5286_v57 = vpop.f32.mrf.mxu2 }
  0x9a   :  { %v5288_v0 = vpop.f32.mrf.mxu1  ;;  %3949 = vmatmul.msk.f32.gmra.mxu0 %vm389_vm2, %v4682_v25 }
  0x9b   :  { %v5292_v10 = vpop.f32.mrf.mxu3 }
  0x9c   :  { %7981 = vst [vmem:[#allocation74_spill] sm:$0xff] %v5292_v10  ;;  %v5315_v10 = vsel %vm1071_vm3, %v1078_v55, %v1080_v49 }
  0x9d   :  { %3756 = vmatmul.msk.f32.gmra.mxu1 %vm389_vm2, %v4783_v19  ;;  %7984 = vst [vmem:[#allocation77_spill] sm:$0xff] %v5315_v10 }
  0x9e   :  { %3818 = vmatmul.msk.f32.gmra.mxu2 %vm389_vm2, %v5295_v40  ;;  %v1083_v40 = vrot.slane %v4694_v28, 2 }
  0x9f   :  { %v5301_v48 = vpop.f32.mrf.mxu0 }
  0xa0   :  { %3884 = vmatmul.msk.f32.gmra.mxu3 %vm389_vm2, %v4689_v26  ;;  %v5336_v49 = vsel %vm1071_vm3, %v1082_v14, %v1083_v40 }
  0xa1   :  { %v5306_v3 = vpop.f32.mrf.mxu2  ;;  %7986 = vst [vmem:[#allocation79_spill] sm:$0xff] %v5336_v49 }
  0xa2   :  { %v5308_v25 = vpop.f32.mrf.mxu1  ;;  %3950 = vmatmul.msk.f32.gmra.mxu0 %vm389_vm2, %v4735_v50 }
  0xa3   :  { %v5312_v20 = vpop.f32.mrf.mxu3 }
  0xa4   :  { %7983 = vst [vmem:[#allocation76_spill] sm:$0xff] %v5312_v20 }
  0xa5   :  { %3757 = vmatmul.msk.f32.gmra.mxu1 %vm389_vm2, %v4788_v21 }
  0xa6   :  { %3819 = vmatmul.msk.f32.gmra.mxu2 %vm389_vm2, %v5315_v10 }
  0xa7   :  { %v5321_v2 = vpop.f32.mrf.mxu0 }
  0xa8   :  { %3885 = vmatmul.msk.f32.gmra.mxu3 %vm389_vm2, %v4694_v28  ;;  %v1085_v28 = vrot.slane %v4742_v54, 2 }
  0xa9   :  { %v5327_v50 = vpop.f32.mrf.mxu2 }
  0xaa   :  { %v5329_v20 = vpop.f32.mrf.mxu1  ;;  %3951 = vmatmul.msk.f32.gmra.mxu0 %vm389_vm2, %v4776_v15 }
  0xab   :  { %v5333_v55 = vpop.f32.mrf.mxu3 }
  0xac   :  { %7985 = vst [vmem:[#allocation78_spill] sm:$0xff] %v5333_v55  ;;  %v5356_v55 = vsel %vm1071_vm3, %v1083_v40, %v1085_v28 }
  0xad   :  { %3758 = vmatmul.msk.f32.gmra.mxu1 %vm389_vm2, %v4877_v5  ;;  %7989 = vst [vmem:[#allocation82_spill] sm:$0xff] %v5356_v55 }
  0xae   :  { %3820 = vmatmul.msk.f32.gmra.mxu2 %vm389_vm2, %v5336_v49  ;;  %v1087_v49 = vrot.slane %v4783_v19, 2 }
  0xaf   :  { %v5342_v26 = vpop.f32.mrf.mxu0 }
  0xb0   :  { %3886 = vmatmul.msk.f32.gmra.mxu3 %vm389_vm2, %v4783_v19 }
  0xb1   :  { %v5347_v10 = vpop.f32.mrf.mxu2 }
  0xb2   :  { %7987 = vst [vmem:[#allocation80_spill] sm:$0xff] %v5347_v10  ;;  %v5349_v15 = vpop.f32.mrf.mxu1  ;;  %3952 = vmatmul.msk.f32.gmra.mxu0 %vm389_vm2, %v4829_v63  ;;  %v1088_v10 = vrot.slane %v4788_v21, 2 }
  0xb3   :  { %v5353_v14 = vpop.f32.mrf.mxu3 }
  0xb4   :  { %7988 = vst [vmem:[#allocation81_spill] sm:$0xff] %v5353_v14  ;;  %v5377_v28 = vsel %vm1071_vm3, %v1087_v49, %v1088_v10 }
  0xb5   :  { %3759 = vmatmul.msk.f32.gmra.mxu1 %vm389_vm2, %v4882_v4  ;;  %7991 = vst [vmem:[#allocation84_spill] sm:$0xff] %v5377_v28 }
  0xb6   :  { %3821 = vmatmul.msk.f32.gmra.mxu2 %vm389_vm2, %v5356_v55 }
  0xb7   :  { %v5362_v54 = vpop.f32.mrf.mxu0 }
  0xb8   :  { %3887 = vmatmul.msk.f32.gmra.mxu3 %vm389_vm2, %v4788_v21  ;;  %v1090_v21 = vrot.slane %v4836_v56, 2 }
  0xb9   :  { %v5368_v63 = vpop.f32.mrf.mxu2 }
  0xba   :  { %v5370_v14 = vpop.f32.mrf.mxu1  ;;  %3953 = vmatmul.msk.f32.gmra.mxu0 %vm389_vm2, %v4870_v45 }
  0xbb   :  { %v5374_v40 = vpop.f32.mrf.mxu3 }
  0xbc   :  { %7990 = vst [vmem:[#allocation83_spill] sm:$0xff] %v5374_v40  ;;  %v5397_v40 = vsel %vm1071_vm3, %v1088_v10, %v1090_v21 }
  0xbd   :  { %3760 = vmatmul.msk.f32.gmra.mxu1 %vm389_vm2, %v4971_v7  ;;  %7994 = vst [vmem:[#allocation87_spill] sm:$0xff] %v5397_v40 }
  0xbe   :  { %3822 = vmatmul.msk.f32.gmra.mxu2 %vm389_vm2, %v5377_v28  ;;  %v1092_v28 = vrot.slane %v4877_v5, 2 }
  0xbf   :  { %v5383_v19 = vpop.f32.mrf.mxu0 }
  0xc0   :  { %3888 = vmatmul.msk.f32.gmra.mxu3 %vm389_vm2, %v4877_v5 }
  0xc1   :  { %v5388_v55 = vpop.f32.mrf.mxu2 }
  0xc2   :  { %7992 = vst [vmem:[#allocation85_spill] sm:$0xff] %v5388_v55  ;;  %v5390_v45 = vpop.f32.mrf.mxu1  ;;  %3954 = vmatmul.msk.f32.gmra.mxu0 %vm389_vm2, %v4923_v22  ;;  %v1093_v55 = vrot.slane %v4882_v4, 2 }
  0xc3   :  { %v5394_v49 = vpop.f32.mrf.mxu3 }
  0xc4   :  { %7993 = vst [vmem:[#allocation86_spill] sm:$0xff] %v5394_v49  ;;  %v5418_v21 = vsel %vm1071_vm3, %v1092_v28, %v1093_v55 }
  0xc5   :  { %3761 = vmatmul.msk.f32.gmra.mxu1 %vm389_vm2, %v4976_v61  ;;  %7996 = vst [vmem:[#allocation89_spill] sm:$0xff] %v5418_v21 }
  0xc6   :  { %3823 = vmatmul.msk.f32.gmra.mxu2 %vm389_vm2, %v5397_v40 }
  0xc7   :  { %v5403_v56 = vpop.f32.mrf.mxu0 }
  0xc8   :  { %3889 = vmatmul.msk.f32.gmra.mxu3 %vm389_vm2, %v4882_v4  ;;  %v1095_v4 = vrot.slane %v4930_v42, 2 }
  0xc9   :  { %v5409_v22 = vpop.f32.mrf.mxu2 }
  0xca   :  { %v5411_v49 = vpop.f32.mrf.mxu1  ;;  %3955 = vmatmul.msk.f32.gmra.mxu0 %vm389_vm2, %v4964_v36 }
  0xcb   :  { %v5415_v10 = vpop.f32.mrf.mxu3 }
  0xcc   :  { %7995 = vst [vmem:[#allocation88_spill] sm:$0xff] %v5415_v10  ;;  %v5438_v10 = vsel %vm1071_vm3, %v1093_v55, %v1095_v4 }
  0xcd   :  { %3762 = vmatmul.msk.f32.gmra.mxu1 %vm389_vm2, %v5065_v43  ;;  %7999 = vst [vmem:[#allocation92_spill] sm:$0xff] %v5438_v10 }
  0xce   :  { %3824 = vmatmul.msk.f32.gmra.mxu2 %vm389_vm2, %v5418_v21  ;;  %v1097_v21 = vrot.slane %v4971_v7, 2 }
  0xcf   :  { %v5424_v5 = vpop.f32.mrf.mxu0 }
  0xd0   :  { %3890 = vmatmul.msk.f32.gmra.mxu3 %vm389_vm2, %v4971_v7 }
  0xd1   :  { %v5429_v40 = vpop.f32.mrf.mxu2 }
  0xd2   :  { %7997 = vst [vmem:[#allocation90_spill] sm:$0xff] %v5429_v40  ;;  %v5431_v36 = vpop.f32.mrf.mxu1  ;;  %3956 = vmatmul.msk.f32.gmra.mxu0 %vm389_vm2, %v5017_v41  ;;  %v1098_v40 = vrot.slane %v4976_v61, 2 }
  0xd3   :  { %v5435_v28 = vpop.f32.mrf.mxu3 }
  0xd4   :  { %7998 = vst [vmem:[#allocation91_spill] sm:$0xff] %v5435_v28  ;;  %v5459_v4 = vsel %vm1071_vm3, %v1097_v21, %v1098_v40 }
  0xd5   :  { %3763 = vmatmul.msk.f32.gmra.mxu1 %vm389_vm2, %v5070_v27  ;;  %8001 = vst [vmem:[#allocation94_spill] sm:$0xff] %v5459_v4 }
  0xd6   :  { %3825 = vmatmul.msk.f32.gmra.mxu2 %vm389_vm2, %v5438_v10 }
  0xd7   :  { %v5444_v42 = vpop.f32.mrf.mxu0 }
  0xd8   :  { %3891 = vmatmul.msk.f32.gmra.mxu3 %vm389_vm2, %v4976_v61  ;;  %v1100_v61 = vrot.slane %v5024_v17, 2 }
  0xd9   :  { %v5450_v41 = vpop.f32.mrf.mxu2 }
  0xda   :  { %v5452_v28 = vpop.f32.mrf.mxu1  ;;  %3957 = vmatmul.msk.f32.gmra.mxu0 %vm389_vm2, %v5058_v9 }
  0xdb   :  { %v5456_v55 = vpop.f32.mrf.mxu3 }
  0xdc   :  { %8000 = vst [vmem:[#allocation93_spill] sm:$0xff] %v5456_v55  ;;  %v5479_v55 = vsel %vm1071_vm3, %v1098_v40, %v1100_v61 }
  0xdd   :  { %3764 = vmatmul.msk.f32.gmra.mxu1 %vm389_vm2, %v5142_v13  ;;  %8004 = vst [vmem:[#allocation97_spill] sm:$0xff] %v5479_v55 }
  0xde   :  { %3826 = vmatmul.msk.f32.gmra.mxu2 %vm389_vm2, %v5459_v4  ;;  %v1102_v4 = vrot.slane %v5065_v43, 2 }
  0xdf   :  { %v5465_v7 = vpop.f32.mrf.mxu0 }
  0xe0   :  { %3892 = vmatmul.msk.f32.gmra.mxu3 %vm389_vm2, %v5065_v43 }
  0xe1   :  { %v5470_v10 = vpop.f32.mrf.mxu2 }
  0xe2   :  { %8002 = vst [vmem:[#allocation95_spill] sm:$0xff] %v5470_v10  ;;  %v5472_v9 = vpop.f32.mrf.mxu1  ;;  %3958 = vmatmul.msk.f32.gmra.mxu0 %vm389_vm2, %v5099_v58  ;;  %v1103_v10 = vrot.slane %v5070_v27, 2 }
  0xe3   :  { %v5476_v21 = vpop.f32.mrf.mxu3 }
  0xe4   :  { %8003 = vst [vmem:[#allocation96_spill] sm:$0xff] %v5476_v21  ;;  %v5498_v61 = vsel %vm1071_vm3, %v1102_v4, %v1103_v10 }
  0xe5   :  { %3765 = vmatmul.msk.f32.gmra.mxu1 %vm389_vm2, %v5147_v29  ;;  %8006 = vst [vmem:[#allocation99_spill] sm:$0xff] %v5498_v61 }
  0xe6   :  { %3827 = vmatmul.msk.f32.gmra.mxu2 %vm389_vm2, %v5479_v55 }
  0xe7   :  { %v5485_v17 = vpop.f32.mrf.mxu0 }
  0xe8   :  { %3893 = vmatmul.msk.f32.gmra.mxu3 %vm389_vm2, %v5070_v27  ;;  %v1105_v27 = vrot.slane %v5106_v47, 2 }
  0xe9   :  { %v5491_v58 = vpop.f32.mrf.mxu2 }
  0xea   :  { %v879_v21 = vpop.f32.mrf.mxu1  ;;  %3959 = vmatmul.msk.f32.gmra.mxu0 %vm389_vm2, %v5134_v44 }
  0xeb   :  { %v5495_v40 = vpop.f32.mrf.mxu3 }
  0xec   :  { %8005 = vst [vmem:[#allocation98_spill] sm:$0xff] %v5495_v40  ;;  %v5516_v40 = vsel %vm1071_vm3, %v1103_v10, %v1105_v27 }
  0xed   :  { %3766 = vmatmul.msk.f32.gmra.mxu1 %vm389_vm2, %v5221_v62  ;;  %8009 = vst [vmem:[#allocation102_spill] sm:$0xff] %v5516_v40 }
  0xee   :  { %3828 = vmatmul.msk.f32.gmra.mxu2 %vm389_vm2, %v5498_v61  ;;  %v1107_v61 = vrot.slane %v5142_v13, 2 }
  0xef   :  { %v5504_v43 = vpop.f32.mrf.mxu0 }
  0xf0   :  { %3894 = vmatmul.msk.f32.gmra.mxu3 %vm389_vm2, %v5142_v13 }
  0xf1   :  { %v5509_v55 = vpop.f32.mrf.mxu2 }
  0xf2   :  { %8007 = vst [vmem:[#allocation100_spill] sm:$0xff] %v5509_v55  ;;  %v882_v44 = vpop.f32.mrf.mxu1  ;;  %3960 = vmatmul.msk.f32.gmra.mxu0 %vm389_vm2, %v5181_v39  ;;  %v1108_v55 = vrot.slane %v5147_v29, 2 }
  0xf3   :  { %v5513_v4 = vpop.f32.mrf.mxu3 }
  0xf4   :  { %8008 = vst [vmem:[#allocation101_spill] sm:$0xff] %v5513_v4 }
  0xf5   :  { %3767 = vmatmul.msk.f32.gmra.mxu1 %vm389_vm2, %v4467_v1  ;;  %v5535_v1 = vsel %vm1071_vm3, %v1107_v61, %v1108_v55 }
  0xf6   :  { %3829 = vmatmul.msk.f32.gmra.mxu2 %vm389_vm2, %v5516_v40  ;;  %8012 = vst [vmem:[#allocation105_spill] sm:$0xff] %v5535_v1  ;;  %v880_v40 = vadd.f32 %v879_v21, %v5240_v60 }
  0xf7   :  { %v5522_v47 = vpop.f32.mrf.mxu0 }
  0xf8   :  { %3895 = vmatmul.msk.f32.gmra.mxu3 %vm389_vm2, %v5147_v29  ;;  %v1110_v29 = vrot.slane %v5188_v18, 2 }
  0xf9   :  { %v5528_v39 = vpop.f32.mrf.mxu2 }
  0xfa   :  { %8010 = vst [vmem:[#allocation103_spill] sm:$0xff] %v5528_v39  ;;  %v885_v4 = vpop.f32.mrf.mxu1  ;;  %3961 = vmatmul.msk.f32.gmra.mxu0 %vm389_vm2, %v5214_v32  ;;  %v883_v39 = vadd.f32 %v882_v44, %v5263_v23 }
  0xfb   :  { %v5532_v10 = vpop.f32.mrf.mxu3  ;;  %v886_v23 = vadd.f32 %v885_v4, %v5280_v31  ;;  %v1122_v4 = vrot.slane %v4616_v52, 2 }
  0xfc   :  { %8011 = vst [vmem:[#allocation104_spill] sm:$0xff] %v5532_v10  ;;  %v1112_v10 = vrot.slane %v5221_v62, 2 }
  0xfd   :  { %3768 = vmatmul.msk.f32.gmra.mxu1 %vm389_vm2, %v4493_v11  ;;  %v5555_v11 = vsel %vm1071_vm3, %v1108_v55, %v1110_v29 }
  0xfe   :  { %3830 = vmatmul.msk.f32.gmra.mxu2 %vm389_vm2, %v5535_v1  ;;  %8015 = vst [vmem:[#allocation108_spill] sm:$0xff] %v5555_v11  ;;  %v4285_v1 = vld [vmem:[%s7734_s0 + $0xc8] sm:$0xff] }
  0xff   :  { %v5541_v13 = vpop.f32.mrf.mxu0 }
 0x100   :  { %3896 = vmatmul.msk.f32.gmra.mxu3 %vm389_vm2, %v5221_v62 }
 0x101   :  { %v5546_v27 = vpop.f32.mrf.mxu2 }
 0x102   :  { %8013 = vst [vmem:[#allocation106_spill] sm:$0xff] %v5546_v27  ;;  %v5548_v32 = vpop.f32.mrf.mxu1  ;;  %3962 = vmatmul.msk.f32.gmra.mxu0 %vm389_vm2, %v5247_v24  ;;  %v1113_v24 = vrot.slane %v4285_v1, 2 }
 0x103   :  { %v5552_v61 = vpop.f32.mrf.mxu3 }
 0x104   :  { %8014 = vst [vmem:[#allocation107_spill] sm:$0xff] %v5552_v61  ;;  %v5577_v29 = vsel %vm1071_vm3, %v1112_v10, %v1113_v24 }
 0x105   :  { %3769 = vmatmul.msk.f32.gmra.mxu1 %vm389_vm2, %v4512_v16  ;;  %8018 = vst [vmem:[#allocation111_spill] sm:$0xff] %v5577_v29 }
 0x106   :  { %3831 = vmatmul.msk.f32.gmra.mxu2 %vm389_vm2, %v5555_v11 }
 0x107   :  { %v5561_v18 = vpop.f32.mrf.mxu0 }
 0x108   :  { %3897 = vmatmul.msk.f32.gmra.mxu3 %vm389_vm2, %v4285_v1  ;;  %v4286_v1 = vld [vmem:[%s7734_s0 + $0xd0] sm:$0x3] }
 0x109   :  { %v5568_v61 = vpop.f32.mrf.mxu2  ;;  %v1115_v11 = vrot.slane %v4286_v1, 2 }
 0x10a   :  { %8016 = vst [vmem:[#allocation109_spill] sm:$0xff] %v5568_v61  ;;  %v5570_v55 = vpop.f32.mrf.mxu1  ;;  %3963 = vmatmul.msk.f32.gmra.mxu0 %vm389_vm2, %v4499_v12 }
 0x10b   :  { %v5574_v16 = vpop.f32.mrf.mxu3  ;;  %v5596_v27 = vsel %vm1071_vm3, %v1113_v24, %v1115_v11 }
 0x10c   :  { %8017 = vst [vmem:[#allocation110_spill] sm:$0xff] %v5574_v16  ;;  %v4287_v16 = vld [vmem:[%s7734_s0 + $0xd8] sm:$0xff] }
 0x10d   :  { %3770 = vmatmul.msk.f32.gmra.mxu1 %vm389_vm2, %v4616_v52 }
 0x10e   :  { %3832 = vmatmul.msk.f32.gmra.mxu2 %vm389_vm2, %v5577_v29 }
 0x10f   :  { %v1970_v62 = vpop.f32.mrf.mxu0 }
 0x110   :  { %3898 = vmatmul.msk.f32.gmra.mxu3 %vm389_vm2, %v4287_v16 }
 0x111   :  { %v1382_v10 = vpop.f32.mrf.mxu2 }
 0x112   :  { %v1574_v12 = vadd.f32 %v1382_v10, %v880_v40  ;;  %v5591_v61 = vpop.f32.mrf.mxu1  ;;  %3964 = vmatmul.msk.f32.gmra.mxu0 %vm389_vm2, %v4563_v35  ;;  %v1117_v40 = vrot.slane %v4287_v16, 2  ;;  %v4288_v10 = vld [vmem:[%s7734_s0 + $0xe0] sm:$0xff] }
 0x113   :  { %v1672_v29 = vpop.f32.mrf.mxu3  ;;  %v1118_v35 = vrot.slane %v4288_v10, 2 }
 0x114   :  { %v1864_v1 = vadd.f32 %v1672_v29, %v1574_v12 }
 0x115   :  { %3771 = vmatmul.msk.f32.gmra.mxu1 %vm389_vm2, %v4621_v53 }
 0x116   :  { %v5600_v60 = vadd.f32 %v1970_v62, %v1864_v1  ;;  %3833 = vmatmul.msk.f32.gmra.mxu2 %vm389_vm2, %v5596_v27  ;;  %v5614_v62 = vsel %vm1071_vm3, %v1117_v40, %v1118_v35 }
 0x117   :  { %v1973_v21 = vpop.f32.mrf.mxu0 }
 0x118   :  { %3899 = vmatmul.msk.f32.gmra.mxu3 %vm389_vm2, %v4288_v10 }
 0x119   :  { %v1385_v12 = vpop.f32.mrf.mxu2 }
 0x11a   :  { %v1575_v24 = vadd.f32 %v1385_v12, %v883_v39  ;;  %v5609_v11 = vpop.f32.mrf.mxu1  ;;  %3965 = vmatmul.msk.f32.gmra.mxu0 %vm389_vm2, %v4610_v51  ;;  %v1120_v39 = vrot.slane %v4572_v37, 2 }
 0x11b   :  { %v1675_v29 = vpop.f32.mrf.mxu3 }
 0x11c   :  { %v1865_v16 = vadd.f32 %v1675_v29, %v1575_v24  ;;  %v5631_v24 = vsel %vm1071_vm3, %v1118_v35, %v1120_v39 }
 0x11d   :  { %3772 = vmatmul.msk.f32.gmra.mxu1 %vm389_vm2, %v4707_v33 }
 0x11e   :  { %v5618_v1 = vadd.f32 %v1973_v21, %v1865_v16  ;;  %3834 = vmatmul.msk.f32.gmra.mxu2 %vm389_vm2, %v5614_v62  ;;  %v1123_v16 = vrot.slane %v4621_v53, 2 }
 0x11f   :  { %v1976_v44 = vpop.f32.mrf.mxu0 }
 0x120   :  { %3900 = vmatmul.msk.f32.gmra.mxu3 %vm389_vm2, %v4616_v52 }
 0x121   :  { %v1388_v10 = vpop.f32.mrf.mxu2 }
 0x122   :  { %v1576_v40 = vadd.f32 %v1388_v10, %v886_v23  ;;  %v5626_v12 = vpop.f32.mrf.mxu1  ;;  %3966 = vmatmul.msk.f32.gmra.mxu0 %vm389_vm2, %v4654_v6  ;;  %v889_v23 = vadd.f32 %v5548_v32, %v5301_v48  ;;  %v8020_v32 = vld [vmem:[#allocation12_spill] sm:$0xff] }
 0x123   :  { %v1678_v21 = vpop.f32.mrf.mxu3  ;;  %v1125_v48 = vrot.slane %v8020_v32, 2 }
 0x124   :  { %v1866_v29 = vadd.f32 %v1678_v21, %v1576_v40  ;;  %v5650_v40 = vsel %vm1071_vm3, %v1122_v4, %v1123_v16 }
 0x125   :  { %3773 = vmatmul.msk.f32.gmra.mxu1 %vm389_vm2, %v4712_v34 }
 0x126   :  { %v5635_v37 = vadd.f32 %v1976_v44, %v1866_v29  ;;  %3835 = vmatmul.msk.f32.gmra.mxu2 %vm389_vm2, %v5631_v24  ;;  %v892_v29 = vadd.f32 %v5570_v55, %v5321_v2  ;;  %v1127_v55 = vrot.slane %v4707_v33, 2 }
 0x127   :  { %v1979_v31 = vpop.f32.mrf.mxu0 }
 0x128   :  { %3901 = vmatmul.msk.f32.gmra.mxu3 %vm389_vm2, %v4621_v53 }
 0x129   :  { %v1391_v35 = vpop.f32.mrf.mxu2 }
 0x12a   :  { %v1577_v39 = vadd.f32 %v1391_v35, %v889_v23  ;;  %v5645_v10 = vpop.f32.mrf.mxu1  ;;  %3967 = vmatmul.msk.f32.gmra.mxu0 %vm389_vm2, %v4697_v30 }
 0x12b   :  { %v1681_v44 = vpop.f32.mrf.mxu3 }
 0x12c   :  { %v1867_v52 = vadd.f32 %v1681_v44, %v1577_v39  ;;  %v8021_v39 = vld [vmem:[#allocation17_spill] sm:$0xff]  ;;  %v5668_v44 = vsel %vm1071_vm3, %v1123_v16, %v1125_v48 }
 0x12d   :  { %3774 = vmatmul.msk.f32.gmra.mxu1 %vm389_vm2, %v4801_v38 }
 0x12e   :  { %v5654_v21 = vadd.f32 %v1979_v31, %v1867_v52  ;;  %3836 = vmatmul.msk.f32.gmra.mxu2 %vm389_vm2, %v5650_v40 }
 0x12f   :  { %v1982_v53 = vpop.f32.mrf.mxu0 }
 0x130   :  { %8019 = vst [vmem:[#allocation112_spill] sm:$0xff] %v5654_v21  ;;  %3902 = vmatmul.msk.f32.gmra.mxu3 %vm389_vm2, %v4707_v33  ;;  %v8022_v21 = vld [vmem:[#allocation24_spill] sm:$0xff] }
 0x131   :  { %v1394_v4 = vpop.f32.mrf.mxu2 }
 0x132   :  { %v1578_v23 = vadd.f32 %v1394_v4, %v892_v29  ;;  %v5663_v35 = vpop.f32.mrf.mxu1  ;;  %3968 = vmatmul.msk.f32.gmra.mxu0 %vm389_vm2, %v8021_v39  ;;  %v1128_v29 = vrot.slane %v4712_v34, 2  ;;  %v895_v4 = vadd.f32 %v5591_v61, %v5342_v26  ;;  %v8027_v26 = vld [vmem:[#allocation19_spill] sm:$0xff] }
 0x133   :  { %v1684_v31 = vpop.f32.mrf.mxu3  ;;  %v1130_v61 = vrot.slane %v8027_v26, 2 }
 0x134   :  { %v1868_v52 = vadd.f32 %v1684_v31, %v1578_v23 }
 0x135   :  { %3775 = vmatmul.msk.f32.gmra.mxu1 %vm389_vm2, %v8022_v21 }
 0x136   :  { %v5672_v32 = vadd.f32 %v1982_v53, %v1868_v52  ;;  %3837 = vmatmul.msk.f32.gmra.mxu2 %vm389_vm2, %v5668_v44  ;;  %v8024_v53 = vld [vmem:[#allocation22_spill] sm:$0xff]  ;;  %v5687_v52 = vsel %vm1071_vm3, %v1127_v55, %v1128_v29 }
 0x137   :  { %v1985_v2 = vpop.f32.mrf.mxu0 }
 0x138   :  { %8023 = vst [vmem:[#allocation12_spill] sm:$0xff] %v5672_v32  ;;  %3903 = vmatmul.msk.f32.gmra.mxu3 %vm389_vm2, %v4712_v34  ;;  %v8025_v32 = vld [vmem:[#allocation34_spill] sm:$0xff] }
 0x139   :  { %v1397_v16 = vpop.f32.mrf.mxu2 }
 0x13a   :  { %v1579_v48 = vadd.f32 %v1397_v16, %v895_v4  ;;  %v5682_v23 = vpop.f32.mrf.mxu1  ;;  %3969 = vmatmul.msk.f32.gmra.mxu0 %vm389_vm2, %v8024_v53  ;;  %v898_v4 = vadd.f32 %v5609_v11, %v5362_v54  ;;  %v8029_v53 = vld [vmem:[#allocation35_spill] sm:$0xff]  ;;  %v1132_v11 = vrot.slane %v4801_v38, 2 }
 0x13b   :  { %v1687_v31 = vpop.f32.mrf.mxu3 }
 0x13c   :  { %v1869_v33 = vadd.f32 %v1687_v31, %v1579_v48  ;;  %v8028_v31 = vld [vmem:[#allocation27_spill] sm:$0xff] }
 0x13d   :  { %3776 = vmatmul.msk.f32.gmra.mxu1 %vm389_vm2, %v8025_v32 }
 0x13e   :  { %v5691_v39 = vadd.f32 %v1985_v2, %v1869_v33  ;;  %3838 = vmatmul.msk.f32.gmra.mxu2 %vm389_vm2, %v5687_v52  ;;  %v5705_v33 = vsel %vm1071_vm3, %v1128_v29, %v1130_v61 }
 0x13f   :  { %v1988_v34 = vpop.f32.mrf.mxu0 }
 0x140   :  { %8026 = vst [vmem:[#allocation24_spill] sm:$0xff] %v5691_v39  ;;  %3904 = vmatmul.msk.f32.gmra.mxu3 %vm389_vm2, %v4801_v38 }
 0x141   :  { %v1400_v55 = vpop.f32.mrf.mxu2 }
 0x142   :  { %v1580_v16 = vadd.f32 %v1400_v55, %v898_v4  ;;  %v5700_v48 = vpop.f32.mrf.mxu1  ;;  %3970 = vmatmul.msk.f32.gmra.mxu0 %vm389_vm2, %v8028_v31  ;;  %v1133_v4 = vrot.slane %v8022_v21, 2  ;;  %v901_v55 = vadd.f32 %v5626_v12, %v5383_v19  ;;  %v8034_v12 = vld [vmem:[#allocation29_spill] sm:$0xff] }
 0x143   :  { %v1690_v2 = vpop.f32.mrf.mxu3 }
 0x144   :  { %v1870_v39 = vadd.f32 %v1690_v2, %v1580_v16  ;;  %v5724_v2 = vsel %vm1071_vm3, %v1132_v11, %v1133_v4 }
 0x145   :  { %3777 = vmatmul.msk.f32.gmra.mxu1 %vm389_vm2, %v8029_v53 }
 0x146   :  { %v5709_v26 = vadd.f32 %v1988_v34, %v1870_v39  ;;  %3839 = vmatmul.msk.f32.gmra.mxu2 %vm389_vm2, %v5705_v33  ;;  %v8031_v39 = vld [vmem:[#allocation32_spill] sm:$0xff] }
 0x147   :  { %v1991_v54 = vpop.f32.mrf.mxu0 }
 0x148   :  { %8030 = vst [vmem:[#allocation34_spill] sm:$0xff] %v5709_v26  ;;  %3905 = vmatmul.msk.f32.gmra.mxu3 %vm389_vm2, %v8022_v21  ;;  %v8032_v26 = vld [vmem:[#allocation45_spill] sm:$0xff]  ;;  %v1135_v21 = vrot.slane %v8034_v12, 2 }
 0x149   :  { %v1403_v29 = vpop.f32.mrf.mxu2 }
 0x14a   :  { %v1581_v61 = vadd.f32 %v1403_v29, %v901_v55  ;;  %v5719_v16 = vpop.f32.mrf.mxu1  ;;  %3971 = vmatmul.msk.f32.gmra.mxu0 %vm389_vm2, %v8031_v39  ;;  %v904_v55 = vadd.f32 %v5645_v10, %v5403_v56  ;;  %v8036_v39 = vld [vmem:[#allocation46_spill] sm:$0xff]  ;;  %v1137_v10 = vrot.slane %v8025_v32, 2 }
 0x14b   :  { %v1693_v34 = vpop.f32.mrf.mxu3 }
 0x14c   :  { %v1871_v38 = vadd.f32 %v1693_v34, %v1581_v61  ;;  %v8035_v34 = vld [vmem:[#allocation38_spill] sm:$0xff] }
 0x14d   :  { %3778 = vmatmul.msk.f32.gmra.mxu1 %vm389_vm2, %v8032_v26 }
 0x14e   :  { %v5728_v31 = vadd.f32 %v1991_v54, %v1871_v38  ;;  %3840 = vmatmul.msk.f32.gmra.mxu2 %vm389_vm2, %v5724_v2  ;;  %v5742_v38 = vsel %vm1071_vm3, %v1133_v4, %v1135_v21 }
 0x14f   :  { %v1994_v19 = vpop.f32.mrf.mxu0 }
 0x150   :  { %8033 = vst [vmem:[#allocation19_spill] sm:$0xff] %v5728_v31  ;;  %3906 = vmatmul.msk.f32.gmra.mxu3 %vm389_vm2, %v8025_v32 }
 0x151   :  { %v1406_v11 = vpop.f32.mrf.mxu2 }
 0x152   :  { %v1582_v29 = vadd.f32 %v1406_v11, %v904_v55  ;;  %v5737_v61 = vpop.f32.mrf.mxu1  ;;  %3972 = vmatmul.msk.f32.gmra.mxu0 %vm389_vm2, %v8035_v34  ;;  %v1138_v55 = vrot.slane %v8029_v53, 2  ;;  %v907_v11 = vadd.f32 %v5663_v35, %v5424_v5 }
 0x153   :  { %v1696_v54 = vpop.f32.mrf.mxu3 }
 0x154   :  { %v1872_v31 = vadd.f32 %v1696_v54, %v1582_v29  ;;  %v5761_v54 = vsel %vm1071_vm3, %v1137_v10, %v1138_v55  ;;  %v910_v10 = vadd.f32 %v5682_v23, %v5444_v42 }
 0x155   :  { %3779 = vmatmul.msk.f32.gmra.mxu1 %vm389_vm2, %v8036_v39 }
 0x156   :  { %v5746_v12 = vadd.f32 %v1994_v19, %v1872_v31  ;;  %3841 = vmatmul.msk.f32.gmra.mxu2 %vm389_vm2, %v5742_v38  ;;  %v8038_v31 = vld [vmem:[#allocation43_spill] sm:$0xff] }
 0x157   :  { %v1997_v56 = vpop.f32.mrf.mxu0 }
 0x158   :  { %8037 = vst [vmem:[#allocation35_spill] sm:$0xff] %v5746_v12  ;;  %3907 = vmatmul.msk.f32.gmra.mxu3 %vm389_vm2, %v8029_v53  ;;  %v5766_v12 = vld [vmem:[%s7734_s0 + $0x168] sm:$0xff]  ;;  %v8040_v53 = vld [vmem:[#allocation40_spill] sm:$0xff] }
 0x159   :  { %v1409_v4 = vpop.f32.mrf.mxu2 }
 0x15a   :  { %v1583_v21 = vadd.f32 %v1409_v4, %v907_v11  ;;  %v5756_v29 = vpop.f32.mrf.mxu1  ;;  %3973 = vmatmul.msk.f32.gmra.mxu0 %vm389_vm2, %v8038_v31  ;;  %v1140_v11 = vrot.slane %v8040_v53, 2  ;;  %v8041_v31 = vld [vmem:[#allocation49_spill] sm:$0xff]  ;;  %v5789_v53 = vld [vmem:[%s7734_s0 + $0x170] sm:$0xff] }
 0x15b   :  { %v1699_v19 = vpop.f32.mrf.mxu3 }
 0x15c   :  { %v1873_v32 = vadd.f32 %v1699_v19, %v1583_v21 }
 0x15d   :  { %3780 = vmatmul.msk.f32.gmra.mxu1 %vm389_vm2, %v5766_v12 }
 0x15e   :  { %v5770_v5 = vadd.f32 %v1997_v56, %v1873_v32  ;;  %3842 = vmatmul.msk.f32.gmra.mxu2 %vm389_vm2, %v5761_v54  ;;  %v5784_v32 = vsel %vm1071_vm3, %v1138_v55, %v1140_v11  ;;  %v1143_v55 = vrot.slane %v8036_v39, 2  ;;  %v913_v11 = vadd.f32 %v5700_v48, %v5465_v7 }
 0x15f   :  { %v2000_v35 = vpop.f32.mrf.mxu0 }
 0x160   :  { %8039 = vst [vmem:[#allocation45_spill] sm:$0xff] %v5770_v5  ;;  %3908 = vmatmul.msk.f32.gmra.mxu3 %vm389_vm2, %v8032_v26 }
 0x161   :  { %v1412_v4 = vpop.f32.mrf.mxu2 }
 0x162   :  { %v1584_v21 = vadd.f32 %v1412_v4, %v910_v10  ;;  %v5779_v19 = vpop.f32.mrf.mxu1  ;;  %3974 = vmatmul.msk.f32.gmra.mxu0 %vm389_vm2, %v8041_v31  ;;  %v1142_v10 = vrot.slane %v8032_v26, 2  ;;  %v5813_v31 = vld [vmem:[%s7734_s0 + $0x1b0] sm:$0xff] }
 0x163   :  { %v1702_v56 = vpop.f32.mrf.mxu3 }
 0x164   :  { %v1874_v5 = vadd.f32 %v1702_v56, %v1584_v21 }
 0x165   :  { %3781 = vmatmul.msk.f32.gmra.mxu1 %vm389_vm2, %v5789_v53 }
 0x166   :  { %v5793_v42 = vadd.f32 %v2000_v35, %v1874_v5  ;;  %3843 = vmatmul.msk.f32.gmra.mxu2 %vm389_vm2, %v5784_v32  ;;  %v8043_v5 = vld [vmem:[#allocation54_spill] sm:$0xff] }
 0x167   :  { %v2003_v23 = vpop.f32.mrf.mxu0 }
 0x168   :  { %8042 = vst [vmem:[#allocation29_spill] sm:$0xff] %v5793_v42  ;;  %3909 = vmatmul.msk.f32.gmra.mxu3 %vm389_vm2, %v8036_v39  ;;  %v5808_v42 = vsel %vm1071_vm3, %v1142_v10, %v1143_v55  ;;  %v8046_v39 = vld [vmem:[#allocation51_spill] sm:$0xff]  ;;  %v916_v10 = vadd.f32 %v5719_v16, %v5485_v17 }
 0x169   :  { %v1415_v4 = vpop.f32.mrf.mxu2  ;;  %8044 = vst [vmem:[#allocation46_spill] sm:$0xff] %v5808_v42 }
 0x16a   :  { %v1585_v21 = vadd.f32 %v1415_v4, %v913_v11  ;;  %v5803_v56 = vpop.f32.mrf.mxu1  ;;  %3975 = vmatmul.msk.f32.gmra.mxu0 %vm389_vm2, %v8043_v5  ;;  %v1145_v11 = vrot.slane %v8046_v39, 2  ;;  %v8047_v5 = vld [vmem:[#allocation6_spill] sm:$0xff]  ;;  %v5836_v39 = vld [vmem:[%s7734_s0 + $0x1b8] sm:$0xff] }
 0x16b   :  { %v1705_v35 = vpop.f32.mrf.mxu3 }
 0x16c   :  { %v1875_v26 = vadd.f32 %v1705_v35, %v1585_v21 }
 0x16d   :  { %3782 = vmatmul.msk.f32.gmra.mxu1 %vm389_vm2, %v5813_v31 }
 0x16e   :  { %v5817_v7 = vadd.f32 %v2003_v23, %v1875_v26  ;;  %3844 = vmatmul.msk.f32.gmra.mxu2 %vm389_vm2, %v5808_v42  ;;  %v5831_v26 = vsel %vm1071_vm3, %v1143_v55, %v1145_v11  ;;  %v1148_v55 = vrot.slane %v5789_v53, 2  ;;  %v919_v11 = vadd.f32 %v5737_v61, %v5504_v43 }
 0x16f   :  { %v2006_v48 = vpop.f32.mrf.mxu0  ;;  %8048 = vst [vmem:[#allocation51_spill] sm:$0xff] %v5831_v26 }
 0x170   :  { %8045 = vst [vmem:[#allocation40_spill] sm:$0xff] %v5817_v7  ;;  %3910 = vmatmul.msk.f32.gmra.mxu3 %vm389_vm2, %v5766_v12 }
 0x171   :  { %v1418_v4 = vpop.f32.mrf.mxu2 }
 0x172   :  { %v1586_v21 = vadd.f32 %v1418_v4, %v916_v10  ;;  %v5826_v35 = vpop.f32.mrf.mxu1  ;;  %3976 = vmatmul.msk.f32.gmra.mxu0 %vm389_vm2, %v8047_v5  ;;  %v1147_v10 = vrot.slane %v5766_v12, 2  ;;  %v70_v4 = vld [vmem:[%s7734_s0 + $0x188] sm:$0xff]  ;;  %v69_v12 = vld [vmem:[%s7734_s0 + $0x180] sm:$0xff] }
 0x173   :  { %v1708_v23 = vpop.f32.mrf.mxu3  ;;  %v1930_v61 = vrot.slane %v69_v12, 1 }
 0x174   :  { %v1876_v7 = vadd.f32 %v1708_v23, %v1586_v21  ;;  %v8050_v23 = vld [vmem:[#allocation9_spill] sm:$0xff]  ;;  %v5861_v43 = vsel %vm1071_vm3, %v1147_v10, %v1148_v55  ;;  %v4294_v10 = vld [vmem:[%s7734_s0 + $0x178] sm:$0x3] }
 0x175   :  { %3783 = vmatmul.msk.f32.gmra.mxu1 %vm389_vm2, %v5836_v39  ;;  %8051 = vst [vmem:[#allocation114_spill] sm:$0xff] %v5861_v43 }
 0x176   :  { %v5840_v17 = vadd.f32 %v2006_v48, %v1876_v7  ;;  %3845 = vmatmul.msk.f32.gmra.mxu2 %vm389_vm2, %v5831_v26  ;;  %v1150_v26 = vrot.slane %v4294_v10, 2 }
 0x177   :  { %v2009_v16 = vpop.f32.mrf.mxu0 }
 0x178   :  { %8049 = vst [vmem:[#allocation113_spill] sm:$0xff] %v5840_v17  ;;  %3911 = vmatmul.msk.f32.gmra.mxu3 %vm389_vm2, %v5789_v53  ;;  %v1931_v53 = vrot.slane %v70_v4, 1 }
 0x179   :  { %v1421_v7 = vpop.f32.mrf.mxu2 }
 0x17a   :  { %v1587_v48 = vadd.f32 %v1421_v7, %v919_v11  ;;  %v5853_v21 = vpop.f32.mrf.mxu1  ;;  %3977 = vmatmul.msk.f32.gmra.mxu0 %vm389_vm2, %v8050_v23  ;;  %v5866_v11 = vld [vmem:[%s7734_s0 + $0x1c8] sm:$0xff] }
 0x17b   :  { %v1711_v17 = vpop.f32.mrf.mxu3 }
 0x17c   :  { %v1877_v5 = vadd.f32 %v1711_v17, %v1587_v48  ;;  %v5878_v17 = vsel %vm226_vm1, %v1930_v61, %v1931_v53  ;;  %v922_v48 = vadd.f32 %v5756_v29, %v5522_v47  ;;  %v5891_v61 = vsel %vm1071_vm3, %v1148_v55, %v1150_v26  ;;  %v5896_v47 = vld [vmem:[%s7734_s0 + $0x1d0] sm:$0xff] }
 0x17d   :  { %3784 = vmatmul.msk.f32.gmra.mxu1 %vm389_vm2, %v5866_v11  ;;  %v1153_v26 = vrot.slane %v5836_v39, 2  ;;  %v4297_v39 = vld [vmem:[%s7734_s0 + $0x1c0] sm:$0x3] }
 0x17e   :  { %v5870_v7 = vadd.f32 %v2009_v16, %v1877_v5  ;;  %3846 = vmatmul.msk.f32.gmra.mxu2 %vm389_vm2, %v5861_v43  ;;  %v71_v5 = vld [vmem:[%s7734_s0 + $0x190] sm:$0x3] }
 0x17f   :  { %v2012_v23 = vpop.f32.mrf.mxu0  ;;  %v1933_v34 = vrot.slane %v71_v5, 1 }
 0x180   :  { %8052 = vst [vmem:[#allocation115_spill] sm:$0xff] %v5870_v7  ;;  %3912 = vmatmul.msk.f32.gmra.mxu3 %vm389_vm2, %v69_v12 }
 0x181   :  { %v1424_v16 = vpop.f32.mrf.mxu2  ;;  %v5907_v55 = vsel %vm226_vm1, %v1931_v53, %v1933_v34  ;;  %v5920_v34 = vld [vmem:[%s7734_s0 + $0x1e0] sm:$0xff]  ;;  %v928_v53 = vadd.f32 %v5803_v56, %v5561_v18 }
 0x182   :  { %v1588_v7 = vadd.f32 %v1424_v16, %v922_v48  ;;  %v5886_v43 = vpop.f32.mrf.mxu1  ;;  %3978 = vmatmul.msk.f32.gmra.mxu0 %vm389_vm2, %v5878_v17  ;;  %v1152_v48 = vrot.slane %v5813_v31, 2 }
 0x183   :  { %v1714_v10 = vpop.f32.mrf.mxu3 }
 0x184   :  { %v1878_v42 = vadd.f32 %v1714_v10, %v1588_v7  ;;  %v925_v7 = vadd.f32 %v5779_v19, %v5541_v13  ;;  %v1154_v31 = vsel %vm1071_vm3, %v1152_v48, %v1153_v26 }
 0x185   :  { %3785 = vmatmul.msk.f32.gmra.mxu1 %vm389_vm2, %v5896_v47 }
 0x186   :  { %v5900_v29 = vadd.f32 %v2012_v23, %v1878_v42  ;;  %3847 = vmatmul.msk.f32.gmra.mxu2 %vm389_vm2, %v5891_v61 }
 0x187   :  { %v2015_v12 = vpop.f32.mrf.mxu0 }
 0x188   :  { %3913 = vmatmul.msk.f32.gmra.mxu3 %vm389_vm2, %v70_v4  ;;  %v1155_v4 = vrot.slane %v4297_v39, 2  ;;  %v1157_v39 = vrot.slane %v5866_v11, 2 }
 0x189   :  { %v1427_v5 = vpop.f32.mrf.mxu2 }
 0x18a   :  { %v1589_v16 = vadd.f32 %v1427_v5, %v925_v7  ;;  %v5912_v42 = vpop.f32.mrf.mxu1  ;;  %3979 = vmatmul.msk.f32.gmra.mxu0 %vm389_vm2, %v5907_v55 }
 0x18b   :  { %v1717_v23 = vpop.f32.mrf.mxu3 }
 0x18c   :  { %v1879_v10 = vadd.f32 %v1717_v23, %v1589_v16  ;;  %v1156_v23 = vsel %vm1071_vm3, %v1153_v26, %v1155_v4  ;;  %v931_v26 = vadd.f32 %v5826_v35, %v5223_v8 }
 0x18d   :  { %3786 = vmatmul.msk.f32.gmra.mxu1 %vm389_vm2, %v5920_v34 }
 0x18e   :  { %v5924_v13 = vadd.f32 %v2015_v12, %v1879_v10  ;;  %3848 = vmatmul.msk.f32.gmra.mxu2 %vm389_vm2, %v1154_v31  ;;  %v8053_v12 = vld [vmem:[#allocation14_spill] sm:$0xff] }
 0x18f   :  { %v2018_v19 = vpop.f32.mrf.mxu0  ;;  %v5942_v10 = vld [vmem:[%s7734_s0 + $0x1e8] sm:$0xff] }
 0x190   :  { %3914 = vmatmul.msk.f32.gmra.mxu3 %vm389_vm2, %v5866_v11 }
 0x191   :  { %v1430_v48 = vpop.f32.mrf.mxu2 }
 0x192   :  { %v1590_v7 = vadd.f32 %v1430_v48, %v928_v53  ;;  %v5934_v5 = vpop.f32.mrf.mxu1  ;;  %3980 = vmatmul.msk.f32.gmra.mxu0 %vm389_vm2, %v8053_v12  ;;  %v1158_v53 = vrot.slane %v5896_v47, 2  ;;  %v8054_v12 = vld [vmem:[#allocation18_spill] sm:$0xff] }
 0x193   :  { %v1720_v16 = vpop.f32.mrf.mxu3 }
 0x194   :  { %v1880_v31 = vadd.f32 %v1720_v16, %v1590_v7  ;;  %v5960_v16 = vsel %vm1071_vm3, %v1157_v39, %v1158_v53  ;;  %v934_v39 = vadd.f32 %v5853_v21, %v5253_v59 }
 0x195   :  { %3787 = vmatmul.msk.f32.gmra.mxu1 %vm389_vm2, %v5942_v10 }
 0x196   :  { %v5946_v18 = vadd.f32 %v2018_v19, %v1880_v31  ;;  %3849 = vmatmul.msk.f32.gmra.mxu2 %vm389_vm2, %v1156_v23  ;;  %v5965_v23 = vld [vmem:[%s7734_s0 + $0x1f8] sm:$0xff] }
 0x197   :  { %v2021_v56 = vpop.f32.mrf.mxu0 }
 0x198   :  { %3915 = vmatmul.msk.f32.gmra.mxu3 %vm389_vm2, %v5896_v47  ;;  %v4300_v47 = vld [vmem:[%s7734_s0 + $0x1d8] sm:$0x3] }
 0x199   :  { %v1433_v4 = vpop.f32.mrf.mxu2  ;;  %v1160_v31 = vrot.slane %v4300_v47, 2  ;;  %v5990_v47 = vld [vmem:[%s7734_s0 + $0x200] sm:$0xff] }
 0x19a   :  { %v1591_v48 = vadd.f32 %v1433_v4, %v931_v26  ;;  %v5955_v7 = vpop.f32.mrf.mxu1  ;;  %3981 = vmatmul.msk.f32.gmra.mxu0 %vm389_vm2, %v8054_v12 }
 0x19b   :  { %v1723_v19 = vpop.f32.mrf.mxu3 }
 0x19c   :  { %v1881_v11 = vadd.f32 %v1723_v19, %v1591_v48  ;;  %v5985_v19 = vsel %vm1071_vm3, %v1158_v53, %v1160_v31  ;;  %v1163_v53 = vrot.slane %v5942_v10, 2  ;;  %v937_v31 = vadd.f32 %v5886_v43, %v5270_v46 }
 0x19d   :  { %3788 = vmatmul.msk.f32.gmra.mxu1 %vm389_vm2, %v5965_v23 }
 0x19e   :  { %v5969_v8 = vadd.f32 %v2021_v56, %v1881_v11  ;;  %3850 = vmatmul.msk.f32.gmra.mxu2 %vm389_vm2, %v5960_v16  ;;  %v8056_v56 = vld [vmem:[#allocation23_spill] sm:$0xff] }
 0x19f   :  { %v2024_v35 = vpop.f32.mrf.mxu0 }
 0x1a0   :  { %8055 = vst [vmem:[#allocation14_spill] sm:$0xff] %v5969_v8  ;;  %3916 = vmatmul.msk.f32.gmra.mxu3 %vm389_vm2, %v5920_v34  ;;  %v6014_v8 = vld [vmem:[%s7734_s0 + $0x210] sm:$0xff] }
 0x1a1   :  { %v1436_v26 = vpop.f32.mrf.mxu2 }
 0x1a2   :  { %v1592_v4 = vadd.f32 %v1436_v26, %v934_v39  ;;  %v5980_v48 = vpop.f32.mrf.mxu1  ;;  %3982 = vmatmul.msk.f32.gmra.mxu0 %vm389_vm2, %v8056_v56  ;;  %v1162_v39 = vrot.slane %v5920_v34, 2 }
 0x1a3   :  { %v1726_v12 = vpop.f32.mrf.mxu3 }
 0x1a4   :  { %v1882_v11 = vadd.f32 %v1726_v12, %v1592_v4 }
 0x1a5   :  { %3789 = vmatmul.msk.f32.gmra.mxu1 %vm389_vm2, %v5990_v47 }
 0x1a6   :  { %v5994_v59 = vadd.f32 %v2024_v35, %v1882_v11  ;;  %3851 = vmatmul.msk.f32.gmra.mxu2 %vm389_vm2, %v5985_v19  ;;  %v8058_v35 = vld [vmem:[#allocation28_spill] sm:$0xff] }
 0x1a7   :  { %v2027_v21 = vpop.f32.mrf.mxu0 }
 0x1a8   :  { %8057 = vst [vmem:[#allocation18_spill] sm:$0xff] %v5994_v59  ;;  %3917 = vmatmul.msk.f32.gmra.mxu3 %vm389_vm2, %v5942_v10  ;;  %v6009_v59 = vsel %vm1071_vm3, %v1162_v39, %v1163_v53  ;;  %v4303_v10 = vld [vmem:[%s7734_s0 + $0x1f0] sm:$0x3] }
 0x1a9   :  { %v1439_v26 = vpop.f32.mrf.mxu2  ;;  %v1165_v39 = vrot.slane %v4303_v10, 2  ;;  %v6039_v10 = vld [vmem:[%s7734_s0 + $0x218] sm:$0xff] }
 0x1aa   :  { %v1593_v4 = vadd.f32 %v1439_v26, %v937_v31  ;;  %v6004_v12 = vpop.f32.mrf.mxu1  ;;  %3983 = vmatmul.msk.f32.gmra.mxu0 %vm389_vm2, %v8058_v35  ;;  %v940_v31 = vadd.f32 %v5912_v42, %v5288_v0 }
 0x1ab   :  { %v1729_v11 = vpop.f32.mrf.mxu3 }
 0x1ac   :  { %v1883_v34 = vadd.f32 %v1729_v11, %v1593_v4 }
 0x1ad   :  { %3790 = vmatmul.msk.f32.gmra.mxu1 %vm389_vm2, %v6014_v8 }
 0x1ae   :  { %v6018_v46 = vadd.f32 %v2027_v21, %v1883_v34  ;;  %3852 = vmatmul.msk.f32.gmra.mxu2 %vm389_vm2, %v6009_v59  ;;  %v8060_v21 = vld [vmem:[#allocation33_spill] sm:$0xff] }
 0x1af   :  { %v2030_v43 = vpop.f32.mrf.mxu0 }
 0x1b0   :  { %8059 = vst [vmem:[#allocation23_spill] sm:$0xff] %v6018_v46  ;;  %3918 = vmatmul.msk.f32.gmra.mxu3 %vm389_vm2, %v5965_v23  ;;  %v6034_v46 = vsel %vm1071_vm3, %v1163_v53, %v1165_v39  ;;  %v1168_v53 = vrot.slane %v5990_v47, 2  ;;  %v943_v39 = vadd.f32 %v5934_v5, %v5308_v25 }
 0x1b1   :  { %v1442_v26 = vpop.f32.mrf.mxu2 }
 0x1b2   :  { %v1594_v4 = vadd.f32 %v1442_v26, %v940_v31  ;;  %v6029_v11 = vpop.f32.mrf.mxu1  ;;  %3984 = vmatmul.msk.f32.gmra.mxu0 %vm389_vm2, %v8060_v21  ;;  %v1167_v31 = vrot.slane %v5965_v23, 2  ;;  %v6063_v21 = vld [vmem:[%s7734_s0 + $0x228] sm:$0xff] }
 0x1b3   :  { %v1732_v34 = vpop.f32.mrf.mxu3 }
 0x1b4   :  { %v1884_v35 = vadd.f32 %v1732_v34, %v1594_v4 }
 0x1b5   :  { %3791 = vmatmul.msk.f32.gmra.mxu1 %vm389_vm2, %v6039_v10 }
 0x1b6   :  { %v6043_v0 = vadd.f32 %v2030_v43, %v1884_v35  ;;  %3853 = vmatmul.msk.f32.gmra.mxu2 %vm389_vm2, %v6034_v46  ;;  %v8062_v35 = vld [vmem:[#allocation39_spill] sm:$0xff] }
 0x1b7   :  { %v2033_v42 = vpop.f32.mrf.mxu0 }
 0x1b8   :  { %8061 = vst [vmem:[#allocation116_spill] sm:$0xff] %v6043_v0  ;;  %3919 = vmatmul.msk.f32.gmra.mxu3 %vm389_vm2, %v5990_v47  ;;  %v6058_v0 = vsel %vm1071_vm3, %v1167_v31, %v1168_v53  ;;  %v4306_v47 = vld [vmem:[%s7734_s0 + $0x208] sm:$0x3] }
 0x1b9   :  { %v1445_v26 = vpop.f32.mrf.mxu2  ;;  %v1170_v31 = vrot.slane %v4306_v47, 2  ;;  %v6088_v47 = vld [vmem:[%s7734_s0 + $0x230] sm:$0xff] }
 0x1ba   :  { %v1595_v4 = vadd.f32 %v1445_v26, %v943_v39  ;;  %v6053_v34 = vpop.f32.mrf.mxu1  ;;  %3985 = vmatmul.msk.f32.gmra.mxu0 %vm389_vm2, %v8062_v35  ;;  %v946_v39 = vadd.f32 %v5955_v7, %v5329_v20 }
 0x1bb   :  { %v1735_v43 = vpop.f32.mrf.mxu3 }
 0x1bc   :  { %v1885_v23 = vadd.f32 %v1735_v43, %v1595_v4 }
 0x1bd   :  { %3792 = vmatmul.msk.f32.gmra.mxu1 %vm389_vm2, %v6063_v21 }
 0x1be   :  { %v6067_v25 = vadd.f32 %v2033_v42, %v1885_v23  ;;  %3854 = vmatmul.msk.f32.gmra.mxu2 %vm389_vm2, %v6058_v0  ;;  %v8064_v42 = vld [vmem:[#allocation44_spill] sm:$0xff] }
 0x1bf   :  { %v2036_v5 = vpop.f32.mrf.mxu0 }
 0x1c0   :  { %8063 = vst [vmem:[#allocation117_spill] sm:$0xff] %v6067_v25  ;;  %3920 = vmatmul.msk.f32.gmra.mxu3 %vm389_vm2, %v6014_v8  ;;  %v6083_v25 = vsel %vm1071_vm3, %v1168_v53, %v1170_v31  ;;  %v1173_v53 = vrot.slane %v6039_v10, 2  ;;  %v949_v31 = vadd.f32 %v5980_v48, %v5349_v15 }
 0x1c1   :  { %v1448_v26 = vpop.f32.mrf.mxu2 }
 0x1c2   :  { %v1596_v4 = vadd.f32 %v1448_v26, %v946_v39  ;;  %v6078_v43 = vpop.f32.mrf.mxu1  ;;  %3986 = vmatmul.msk.f32.gmra.mxu0 %vm389_vm2, %v8064_v42  ;;  %v1172_v39 = vrot.slane %v6014_v8, 2  ;;  %v6112_v42 = vld [vmem:[%s7734_s0 + $0x240] sm:$0xff] }
 0x1c3   :  { %v1738_v23 = vpop.f32.mrf.mxu3 }
 0x1c4   :  { %v1886_v35 = vadd.f32 %v1738_v23, %v1596_v4 }
 0x1c5   :  { %3793 = vmatmul.msk.f32.gmra.mxu1 %vm389_vm2, %v6088_v47 }
 0x1c6   :  { %v6092_v20 = vadd.f32 %v2036_v5, %v1886_v35  ;;  %3855 = vmatmul.msk.f32.gmra.mxu2 %vm389_vm2, %v6083_v25  ;;  %v8066_v35 = vld [vmem:[#allocation50_spill] sm:$0xff] }
 0x1c7   :  { %v2039_v7 = vpop.f32.mrf.mxu0 }
 0x1c8   :  { %8065 = vst [vmem:[#allocation118_spill] sm:$0xff] %v6092_v20  ;;  %3921 = vmatmul.msk.f32.gmra.mxu3 %vm389_vm2, %v6039_v10  ;;  %v6107_v20 = vsel %vm1071_vm3, %v1172_v39, %v1173_v53  ;;  %v4309_v10 = vld [vmem:[%s7734_s0 + $0x220] sm:$0x3] }
 0x1c9   :  { %v1451_v26 = vpop.f32.mrf.mxu2  ;;  %v1175_v39 = vrot.slane %v4309_v10, 2  ;;  %v6137_v10 = vld [vmem:[%s7734_s0 + $0x248] sm:$0xff] }
 0x1ca   :  { %v1597_v4 = vadd.f32 %v1451_v26, %v949_v31  ;;  %v6102_v23 = vpop.f32.mrf.mxu1  ;;  %3987 = vmatmul.msk.f32.gmra.mxu0 %vm389_vm2, %v8066_v35  ;;  %v952_v31 = vadd.f32 %v6004_v12, %v5370_v14 }
 0x1cb   :  { %v1741_v5 = vpop.f32.mrf.mxu3 }
 0x1cc   :  { %v1887_v8 = vadd.f32 %v1741_v5, %v1597_v4 }
 0x1cd   :  { %3794 = vmatmul.msk.f32.gmra.mxu1 %vm389_vm2, %v6112_v42 }
 0x1ce   :  { %v6116_v15 = vadd.f32 %v2039_v7, %v1887_v8  ;;  %3856 = vmatmul.msk.f32.gmra.mxu2 %vm389_vm2, %v6107_v20  ;;  %v8068_v7 = vld [vmem:[#allocation55_spill] sm:$0xff] }
 0x1cf   :  { %v2042_v48 = vpop.f32.mrf.mxu0 }
 0x1d0   :  { %8067 = vst [vmem:[#allocation119_spill] sm:$0xff] %v6116_v15  ;;  %3922 = vmatmul.msk.f32.gmra.mxu3 %vm389_vm2, %v6063_v21  ;;  %v6132_v15 = vsel %vm1071_vm3, %v1173_v53, %v1175_v39  ;;  %v1178_v53 = vrot.slane %v6088_v47, 2  ;;  %v955_v39 = vadd.f32 %v6029_v11, %v5390_v45 }
 0x1d1   :  { %v1454_v26 = vpop.f32.mrf.mxu2 }
 0x1d2   :  { %v1598_v4 = vadd.f32 %v1454_v26, %v952_v31  ;;  %v6127_v5 = vpop.f32.mrf.mxu1  ;;  %3988 = vmatmul.msk.f32.gmra.mxu0 %vm389_vm2, %v8068_v7  ;;  %v1177_v31 = vrot.slane %v6063_v21, 2  ;;  %v6161_v7 = vld [vmem:[%s7734_s0 + $0x258] sm:$0xff] }
 0x1d3   :  { %v1744_v8 = vpop.f32.mrf.mxu3 }
 0x1d4   :  { %v1888_v35 = vadd.f32 %v1744_v8, %v1598_v4 }
 0x1d5   :  { %3795 = vmatmul.msk.f32.gmra.mxu1 %vm389_vm2, %v6137_v10 }
 0x1d6   :  { %v6141_v14 = vadd.f32 %v2042_v48, %v1888_v35  ;;  %3857 = vmatmul.msk.f32.gmra.mxu2 %vm389_vm2, %v6132_v15  ;;  %v8070_v35 = vld [vmem:[#allocation58_spill] sm:$0xff] }
 0x1d7   :  { %v2045_v12 = vpop.f32.mrf.mxu0 }
 0x1d8   :  { %8069 = vst [vmem:[#allocation120_spill] sm:$0xff] %v6141_v14  ;;  %3923 = vmatmul.msk.f32.gmra.mxu3 %vm389_vm2, %v6088_v47  ;;  %v6156_v14 = vsel %vm1071_vm3, %v1177_v31, %v1178_v53  ;;  %v4312_v47 = vld [vmem:[%s7734_s0 + $0x238] sm:$0x3] }
 0x1d9   :  { %v1457_v26 = vpop.f32.mrf.mxu2  ;;  %v1180_v31 = vrot.slane %v4312_v47, 2  ;;  %v6186_v47 = vld [vmem:[%s7734_s0 + $0x260] sm:$0xff] }
 0x1da   :  { %v1599_v4 = vadd.f32 %v1457_v26, %v955_v39  ;;  %v6151_v8 = vpop.f32.mrf.mxu1  ;;  %3989 = vmatmul.msk.f32.gmra.mxu0 %vm389_vm2, %v8070_v35  ;;  %v958_v39 = vadd.f32 %v6053_v34, %v5411_v49 }
 0x1db   :  { %v1747_v48 = vpop.f32.mrf.mxu3 }
 0x1dc   :  { %v1889_v21 = vadd.f32 %v1747_v48, %v1599_v4 }
 0x1dd   :  { %3796 = vmatmul.msk.f32.gmra.mxu1 %vm389_vm2, %v6161_v7 }
 0x1de   :  { %v6165_v45 = vadd.f32 %v2045_v12, %v1889_v21  ;;  %3858 = vmatmul.msk.f32.gmra.mxu2 %vm389_vm2, %v6156_v14  ;;  %v8072_v12 = vld [vmem:[#allocation61_spill] sm:$0xff] }
 0x1df   :  { %v2048_v11 = vpop.f32.mrf.mxu0 }
 0x1e0   :  { %8071 = vst [vmem:[#allocation121_spill] sm:$0xff] %v6165_v45  ;;  %3924 = vmatmul.msk.f32.gmra.mxu3 %vm389_vm2, %v6112_v42  ;;  %v6181_v45 = vsel %vm1071_vm3, %v1178_v53, %v1180_v31  ;;  %v1183_v53 = vrot.slane %v6137_v10, 2  ;;  %v961_v31 = vadd.f32 %v6078_v43, %v5431_v36 }
 0x1e1   :  { %v1460_v26 = vpop.f32.mrf.mxu2 }
 0x1e2   :  { %v1600_v4 = vadd.f32 %v1460_v26, %v958_v39  ;;  %v6176_v48 = vpop.f32.mrf.mxu1  ;;  %3990 = vmatmul.msk.f32.gmra.mxu0 %vm389_vm2, %v8072_v12  ;;  %v1182_v39 = vrot.slane %v6112_v42, 2  ;;  %v6210_v12 = vld [vmem:[%s7734_s0 + $0x270] sm:$0xff] }
 0x1e3   :  { %v1750_v21 = vpop.f32.mrf.mxu3 }
 0x1e4   :  { %v1890_v35 = vadd.f32 %v1750_v21, %v1600_v4 }
 0x1e5   :  { %3797 = vmatmul.msk.f32.gmra.mxu1 %vm389_vm2, %v6186_v47 }
 0x1e6   :  { %v6190_v49 = vadd.f32 %v2048_v11, %v1890_v35  ;;  %3859 = vmatmul.msk.f32.gmra.mxu2 %vm389_vm2, %v6181_v45  ;;  %v8074_v35 = vld [vmem:[#allocation64_spill] sm:$0xff] }
 0x1e7   :  { %v2051_v34 = vpop.f32.mrf.mxu0 }
 0x1e8   :  { %8073 = vst [vmem:[#allocation122_spill] sm:$0xff] %v6190_v49  ;;  %3925 = vmatmul.msk.f32.gmra.mxu3 %vm389_vm2, %v6137_v10  ;;  %v6205_v49 = vsel %vm1071_vm3, %v1182_v39, %v1183_v53  ;;  %v4315_v10 = vld [vmem:[%s7734_s0 + $0x250] sm:$0x3] }
 0x1e9   :  { %v1463_v26 = vpop.f32.mrf.mxu2  ;;  %v1185_v39 = vrot.slane %v4315_v10, 2  ;;  %v6235_v10 = vld [vmem:[%s7734_s0 + $0x278] sm:$0xff] }
 0x1ea   :  { %v1601_v4 = vadd.f32 %v1463_v26, %v961_v31  ;;  %v6200_v21 = vpop.f32.mrf.mxu1  ;;  %3991 = vmatmul.msk.f32.gmra.mxu0 %vm389_vm2, %v8074_v35  ;;  %v964_v31 = vadd.f32 %v6102_v23, %v5452_v28 }
 0x1eb   :  { %v1753_v11 = vpop.f32.mrf.mxu3 }
 0x1ec   :  { %v1891_v42 = vadd.f32 %v1753_v11, %v1601_v4 }
 0x1ed   :  { %3798 = vmatmul.msk.f32.gmra.mxu1 %vm389_vm2, %v6210_v12 }
 0x1ee   :  { %v6214_v36 = vadd.f32 %v2051_v34, %v1891_v42  ;;  %3860 = vmatmul.msk.f32.gmra.mxu2 %vm389_vm2, %v6205_v49  ;;  %v8076_v34 = vld [vmem:[#allocation67_spill] sm:$0xff] }
 0x1ef   :  { %v2054_v43 = vpop.f32.mrf.mxu0 }
 0x1f0   :  { %8075 = vst [vmem:[#allocation123_spill] sm:$0xff] %v6214_v36  ;;  %3926 = vmatmul.msk.f32.gmra.mxu3 %vm389_vm2, %v6161_v7  ;;  %v6230_v36 = vsel %vm1071_vm3, %v1183_v53, %v1185_v39  ;;  %v1188_v53 = vrot.slane %v6186_v47, 2  ;;  %v967_v39 = vadd.f32 %v6127_v5, %v5472_v9 }
 0x1f1   :  { %v1466_v26 = vpop.f32.mrf.mxu2 }
 0x1f2   :  { %v1602_v4 = vadd.f32 %v1466_v26, %v964_v31  ;;  %v6225_v11 = vpop.f32.mrf.mxu1  ;;  %3992 = vmatmul.msk.f32.gmra.mxu0 %vm389_vm2, %v8076_v34  ;;  %v1187_v31 = vrot.slane %v6161_v7, 2  ;;  %v6259_v34 = vld [vmem:[%s7734_s0 + $0x288] sm:$0xff] }
 0x1f3   :  { %v1756_v42 = vpop.f32.mrf.mxu3 }
 0x1f4   :  { %v1892_v35 = vadd.f32 %v1756_v42, %v1602_v4 }
 0x1f5   :  { %3799 = vmatmul.msk.f32.gmra.mxu1 %vm389_vm2, %v6235_v10 }
 0x1f6   :  { %v6239_v28 = vadd.f32 %v2054_v43, %v1892_v35  ;;  %3861 = vmatmul.msk.f32.gmra.mxu2 %vm389_vm2, %v6230_v36  ;;  %v8078_v35 = vld [vmem:[#allocation7_spill] sm:$0xff] }
 0x1f7   :  { %v2057_v23 = vpop.f32.mrf.mxu0 }
 0x1f8   :  { %8077 = vst [vmem:[#allocation124_spill] sm:$0xff] %v6239_v28  ;;  %3927 = vmatmul.msk.f32.gmra.mxu3 %vm389_vm2, %v6186_v47  ;;  %v6254_v28 = vsel %vm1071_vm3, %v1187_v31, %v1188_v53  ;;  %v4318_v47 = vld [vmem:[%s7734_s0 + $0x268] sm:$0x3] }
 0x1f9   :  { %v1469_v26 = vpop.f32.mrf.mxu2  ;;  %8079 = vst [vmem:[#allocation125_spill] sm:$0xff] %v6254_v28  ;;  %v1190_v31 = vrot.slane %v4318_v47, 2  ;;  %v6284_v47 = vld [vmem:[%s7734_s0 + $0x290] sm:$0xff] }
 0x1fa   :  { %v1603_v4 = vadd.f32 %v1469_v26, %v967_v39  ;;  %v6249_v42 = vpop.f32.mrf.mxu1  ;;  %3993 = vmatmul.msk.f32.gmra.mxu0 %vm389_vm2, %v8078_v35  ;;  %v8081_v39 = vld [vmem:[#allocation70_spill] sm:$0xff] }
 0x1fb   :  { %v1759_v43 = vpop.f32.mrf.mxu3  ;;  %v970_v26 = vadd.f32 %v6151_v8, %v8081_v39 }
 0x1fc   :  { %v1893_v7 = vadd.f32 %v1759_v43, %v1603_v4 }
 0x1fd   :  { %3800 = vmatmul.msk.f32.gmra.mxu1 %vm389_vm2, %v6259_v34 }
 0x1fe   :  { %v6263_v9 = vadd.f32 %v2057_v23, %v1893_v7  ;;  %3862 = vmatmul.msk.f32.gmra.mxu2 %vm389_vm2, %v6254_v28  ;;  %v8082_v23 = vld [vmem:[#allocation10_spill] sm:$0xff] }
 0x1ff   :  { %v2060_v5 = vpop.f32.mrf.mxu0 }
 0x200   :  { %8080 = vst [vmem:[#allocation126_spill] sm:$0xff] %v6263_v9  ;;  %3928 = vmatmul.msk.f32.gmra.mxu3 %vm389_vm2, %v6210_v12  ;;  %v6279_v9 = vsel %vm1071_vm3, %v1188_v53, %v1190_v31  ;;  %v1193_v53 = vrot.slane %v6235_v10, 2  ;;  %v8085_v31 = vld [vmem:[#allocation72_spill] sm:$0xff] }
 0x201   :  { %v1472_v4 = vpop.f32.mrf.mxu2  ;;  %8083 = vst [vmem:[#allocation70_spill] sm:$0xff] %v6279_v9 }
 0x202   :  { %v1604_v43 = vadd.f32 %v1472_v4, %v970_v26  ;;  %v6274_v35 = vpop.f32.mrf.mxu1  ;;  %3994 = vmatmul.msk.f32.gmra.mxu0 %vm389_vm2, %v8082_v23  ;;  %v1192_v26 = vrot.slane %v6210_v12, 2  ;;  %v973_v4 = vadd.f32 %v6176_v48, %v8085_v31 }
 0x203   :  { %v1762_v7 = vpop.f32.mrf.mxu3 }
 0x204   :  { %v1894_v28 = vadd.f32 %v1762_v7, %v1604_v43 }
 0x205   :  { %3801 = vmatmul.msk.f32.gmra.mxu1 %vm389_vm2, %v6284_v47 }
 0x206   :  { %v6288_v8 = vadd.f32 %v2060_v5, %v1894_v28  ;;  %3863 = vmatmul.msk.f32.gmra.mxu2 %vm389_vm2, %v6279_v9  ;;  %v8086_v28 = vld [vmem:[#allocation11_spill] sm:$0xff]  ;;  %v6308_v9 = vld [vmem:[%s7734_s0 + $0x2a0] sm:$0xff] }
 0x207   :  { %v2063_v39 = vpop.f32.mrf.mxu0 }
 0x208   :  { %8084 = vst [vmem:[#allocation127_spill] sm:$0xff] %v6288_v8  ;;  %3929 = vmatmul.msk.f32.gmra.mxu3 %vm389_vm2, %v6235_v10  ;;  %v6303_v8 = vsel %vm1071_vm3, %v1192_v26, %v1193_v53  ;;  %v4321_v26 = vld [vmem:[%s7734_s0 + $0x280] sm:$0x3] }
 0x209   :  { %v1475_v43 = vpop.f32.mrf.mxu2  ;;  %v1195_v31 = vrot.slane %v4321_v26, 2  ;;  %v6333_v26 = vld [vmem:[%s7734_s0 + $0x2a8] sm:$0xff] }
 0x20a   :  { %v1605_v7 = vadd.f32 %v1475_v43, %v973_v4  ;;  %v6298_v23 = vpop.f32.mrf.mxu1  ;;  %3995 = vmatmul.msk.f32.gmra.mxu0 %vm389_vm2, %v8086_v28  ;;  %v976_v4 = vadd.f32 %v6200_v21, %v5286_v57 }
 0x20b   :  { %v1765_v5 = vpop.f32.mrf.mxu3 }
 0x20c   :  { %v1895_v12 = vadd.f32 %v1765_v5, %v1605_v7 }
 0x20d   :  { %3802 = vmatmul.msk.f32.gmra.mxu1 %vm389_vm2, %v6308_v9 }
 0x20e   :  { %v6312_v48 = vadd.f32 %v2063_v39, %v1895_v12  ;;  %3864 = vmatmul.msk.f32.gmra.mxu2 %vm389_vm2, %v6303_v8  ;;  %v8088_v39 = vld [vmem:[#allocation13_spill] sm:$0xff] }
 0x20f   :  { %v2066_v10 = vpop.f32.mrf.mxu0 }
 0x210   :  { %8087 = vst [vmem:[#allocation72_spill] sm:$0xff] %v6312_v48  ;;  %3930 = vmatmul.msk.f32.gmra.mxu3 %vm389_vm2, %v6259_v34  ;;  %v6328_v48 = vsel %vm1071_vm3, %v1193_v53, %v1195_v31  ;;  %v1198_v53 = vrot.slane %v6284_v47, 2  ;;  %v979_v31 = vadd.f32 %v6225_v11, %v5306_v3 }
 0x211   :  { %v1478_v43 = vpop.f32.mrf.mxu2 }
 0x212   :  { %v1606_v7 = vadd.f32 %v1478_v43, %v976_v4  ;;  %v6323_v5 = vpop.f32.mrf.mxu1  ;;  %3996 = vmatmul.msk.f32.gmra.mxu0 %vm389_vm2, %v8088_v39  ;;  %v1197_v4 = vrot.slane %v6259_v34, 2  ;;  %v6357_v39 = vld [vmem:[%s7734_s0 + $0x2b8] sm:$0xff] }
 0x213   :  { %v1768_v12 = vpop.f32.mrf.mxu3 }
 0x214   :  { %v1896_v28 = vadd.f32 %v1768_v12, %v1606_v7 }
 0x215   :  { %3803 = vmatmul.msk.f32.gmra.mxu1 %vm389_vm2, %v6333_v26 }
 0x216   :  { %v6337_v57 = vadd.f32 %v2066_v10, %v1896_v28  ;;  %3865 = vmatmul.msk.f32.gmra.mxu2 %vm389_vm2, %v6328_v48  ;;  %v8090_v28 = vld [vmem:[#allocation15_spill] sm:$0xff] }
 0x217   :  { %v2069_v21 = vpop.f32.mrf.mxu0 }
 0x218   :  { %8089 = vst [vmem:[#allocation128_spill] sm:$0xff] %v6337_v57  ;;  %3931 = vmatmul.msk.f32.gmra.mxu3 %vm389_vm2, %v6284_v47  ;;  %v6352_v57 = vsel %vm1071_vm3, %v1197_v4, %v1198_v53  ;;  %v4324_v47 = vld [vmem:[%s7734_s0 + $0x298] sm:$0x3] }
 0x219   :  { %v1481_v43 = vpop.f32.mrf.mxu2  ;;  %v1200_v4 = vrot.slane %v4324_v47, 2  ;;  %v6382_v47 = vld [vmem:[%s7734_s0 + $0x2c0] sm:$0xff] }
 0x21a   :  { %v1607_v7 = vadd.f32 %v1481_v43, %v979_v31  ;;  %v6347_v12 = vpop.f32.mrf.mxu1  ;;  %3997 = vmatmul.msk.f32.gmra.mxu0 %vm389_vm2, %v8090_v28  ;;  %v982_v31 = vadd.f32 %v6249_v42, %v5327_v50 }
 0x21b   :  { %v1771_v10 = vpop.f32.mrf.mxu3 }
 0x21c   :  { %v1897_v34 = vadd.f32 %v1771_v10, %v1607_v7 }
 0x21d   :  { %3804 = vmatmul.msk.f32.gmra.mxu1 %vm389_vm2, %v6357_v39 }
 0x21e   :  { %v6361_v3 = vadd.f32 %v2069_v21, %v1897_v34  ;;  %3866 = vmatmul.msk.f32.gmra.mxu2 %vm389_vm2, %v6352_v57  ;;  %v8092_v21 = vld [vmem:[#allocation20_spill] sm:$0xff] }
 0x21f   :  { %v2072_v11 = vpop.f32.mrf.mxu0 }
 0x220   :  { %8091 = vst [vmem:[#allocation129_spill] sm:$0xff] %v6361_v3  ;;  %3932 = vmatmul.msk.f32.gmra.mxu3 %vm389_vm2, %v6308_v9  ;;  %v6377_v3 = vsel %vm1071_vm3, %v1198_v53, %v1200_v4  ;;  %v1203_v53 = vrot.slane %v6333_v26, 2  ;;  %v8095_v4 = vld [vmem:[#allocation80_spill] sm:$0xff] }
 0x221   :  { %v1484_v43 = vpop.f32.mrf.mxu2  ;;  %8093 = vst [vmem:[#allocation130_spill] sm:$0xff] %v6377_v3 }
 0x222   :  { %v1608_v7 = vadd.f32 %v1484_v43, %v982_v31  ;;  %v6372_v10 = vpop.f32.mrf.mxu1  ;;  %3998 = vmatmul.msk.f32.gmra.mxu0 %vm389_vm2, %v8092_v21  ;;  %v1202_v31 = vrot.slane %v6308_v9, 2  ;;  %v985_v43 = vadd.f32 %v6274_v35, %v8095_v4 }
 0x223   :  { %v1774_v34 = vpop.f32.mrf.mxu3 }
 0x224   :  { %v1898_v28 = vadd.f32 %v1774_v34, %v1608_v7 }
 0x225   :  { %3805 = vmatmul.msk.f32.gmra.mxu1 %vm389_vm2, %v6382_v47 }
 0x226   :  { %v6386_v50 = vadd.f32 %v2072_v11, %v1898_v28  ;;  %3867 = vmatmul.msk.f32.gmra.mxu2 %vm389_vm2, %v6377_v3  ;;  %v8096_v28 = vld [vmem:[#allocation25_spill] sm:$0xff]  ;;  %v6406_v3 = vld [vmem:[%s7734_s0 + $0x2d0] sm:$0xff] }
 0x227   :  { %v2075_v42 = vpop.f32.mrf.mxu0 }
 0x228   :  { %8094 = vst [vmem:[#allocation131_spill] sm:$0xff] %v6386_v50  ;;  %3933 = vmatmul.msk.f32.gmra.mxu3 %vm389_vm2, %v6333_v26  ;;  %v6401_v50 = vsel %vm1071_vm3, %v1202_v31, %v1203_v53  ;;  %v4327_v31 = vld [vmem:[%s7734_s0 + $0x2b0] sm:$0x3] }
 0x229   :  { %v1487_v7 = vpop.f32.mrf.mxu2  ;;  %v1205_v4 = vrot.slane %v4327_v31, 2  ;;  %v6431_v31 = vld [vmem:[%s7734_s0 + $0x2d8] sm:$0xff] }
 0x22a   :  { %v1609_v34 = vadd.f32 %v1487_v7, %v985_v43  ;;  %v6396_v21 = vpop.f32.mrf.mxu1  ;;  %3999 = vmatmul.msk.f32.gmra.mxu0 %vm389_vm2, %v8096_v28  ;;  %v988_v43 = vadd.f32 %v6298_v23, %v5368_v63 }
 0x22b   :  { %v1777_v11 = vpop.f32.mrf.mxu3 }
 0x22c   :  { %v1899_v9 = vadd.f32 %v1777_v11, %v1609_v34 }
 0x22d   :  { %3806 = vmatmul.msk.f32.gmra.mxu1 %vm389_vm2, %v6406_v3 }
 0x22e   :  { %v6410_v35 = vadd.f32 %v2075_v42, %v1899_v9  ;;  %3868 = vmatmul.msk.f32.gmra.mxu2 %vm389_vm2, %v6401_v50  ;;  %v8098_v42 = vld [vmem:[#allocation30_spill] sm:$0xff] }
 0x22f   :  { %v2078_v26 = vpop.f32.mrf.mxu0 }
 0x230   :  { %8097 = vst [vmem:[#allocation80_spill] sm:$0xff] %v6410_v35  ;;  %3934 = vmatmul.msk.f32.gmra.mxu3 %vm389_vm2, %v6357_v39  ;;  %v6426_v35 = vsel %vm1071_vm3, %v1203_v53, %v1205_v4  ;;  %v1208_v53 = vrot.slane %v6382_v47, 2  ;;  %v8101_v4 = vld [vmem:[#allocation85_spill] sm:$0xff] }
 0x231   :  { %v1490_v7 = vpop.f32.mrf.mxu2  ;;  %8099 = vst [vmem:[#allocation132_spill] sm:$0xff] %v6426_v35 }
 0x232   :  { %v1610_v34 = vadd.f32 %v1490_v7, %v988_v43  ;;  %v6421_v11 = vpop.f32.mrf.mxu1  ;;  %4000 = vmatmul.msk.f32.gmra.mxu0 %vm389_vm2, %v8098_v42  ;;  %v1207_v43 = vrot.slane %v6357_v39, 2  ;;  %v991_v7 = vadd.f32 %v6323_v5, %v8101_v4 }
 0x233   :  { %v1780_v9 = vpop.f32.mrf.mxu3 }
 0x234   :  { %v1900_v28 = vadd.f32 %v1780_v9, %v1610_v34 }
 0x235   :  { %3807 = vmatmul.msk.f32.gmra.mxu1 %vm389_vm2, %v6431_v31 }
 0x236   :  { %v6435_v63 = vadd.f32 %v2078_v26, %v1900_v28  ;;  %3869 = vmatmul.msk.f32.gmra.mxu2 %vm389_vm2, %v6426_v35  ;;  %v8102_v28 = vld [vmem:[#allocation36_spill] sm:$0xff]  ;;  %v6455_v35 = vld [vmem:[%s7734_s0 + $0x2e8] sm:$0xff] }
 0x237   :  { %v2081_v23 = vpop.f32.mrf.mxu0 }
 0x238   :  { %8100 = vst [vmem:[#allocation133_spill] sm:$0xff] %v6435_v63  ;;  %3935 = vmatmul.msk.f32.gmra.mxu3 %vm389_vm2, %v6382_v47  ;;  %v6450_v63 = vsel %vm1071_vm3, %v1207_v43, %v1208_v53  ;;  %v4330_v43 = vld [vmem:[%s7734_s0 + $0x2c8] sm:$0x3] }
 0x239   :  { %v1493_v34 = vpop.f32.mrf.mxu2  ;;  %v1210_v4 = vrot.slane %v4330_v43, 2  ;;  %v6480_v43 = vld [vmem:[%s7734_s0 + $0x2f0] sm:$0xff] }
 0x23a   :  { %v1611_v9 = vadd.f32 %v1493_v34, %v991_v7  ;;  %v6445_v42 = vpop.f32.mrf.mxu1  ;;  %4001 = vmatmul.msk.f32.gmra.mxu0 %vm389_vm2, %v8102_v28  ;;  %v994_v7 = vadd.f32 %v6347_v12, %v5409_v22 }
 0x23b   :  { %v1783_v26 = vpop.f32.mrf.mxu3 }
 0x23c   :  { %v1901_v39 = vadd.f32 %v1783_v26, %v1611_v9 }
 0x23d   :  { %3808 = vmatmul.msk.f32.gmra.mxu1 %vm389_vm2, %v6455_v35 }
 0x23e   :  { %v6459_v5 = vadd.f32 %v2081_v23, %v1901_v39  ;;  %3870 = vmatmul.msk.f32.gmra.mxu2 %vm389_vm2, %v6450_v63  ;;  %v8104_v23 = vld [vmem:[#allocation41_spill] sm:$0xff] }
 0x23f   :  { %v2084_v47 = vpop.f32.mrf.mxu0 }
 0x240   :  { %8103 = vst [vmem:[#allocation85_spill] sm:$0xff] %v6459_v5  ;;  %3936 = vmatmul.msk.f32.gmra.mxu3 %vm389_vm2, %v6406_v3  ;;  %v6475_v5 = vsel %vm1071_vm3, %v1208_v53, %v1210_v4  ;;  %v1213_v53 = vrot.slane %v6431_v31, 2  ;;  %v8107_v4 = vld [vmem:[#allocation90_spill] sm:$0xff] }
 0x241   :  { %v1496_v34 = vpop.f32.mrf.mxu2  ;;  %8105 = vst [vmem:[#allocation134_spill] sm:$0xff] %v6475_v5 }
 0x242   :  { %v1612_v9 = vadd.f32 %v1496_v34, %v994_v7  ;;  %v6470_v26 = vpop.f32.mrf.mxu1  ;;  %4002 = vmatmul.msk.f32.gmra.mxu0 %vm389_vm2, %v8104_v23  ;;  %v1212_v7 = vrot.slane %v6406_v3, 2  ;;  %v997_v34 = vadd.f32 %v6372_v10, %v8107_v4 }
 0x243   :  { %v1786_v39 = vpop.f32.mrf.mxu3 }
 0x244   :  { %v1902_v28 = vadd.f32 %v1786_v39, %v1612_v9 }
 0x245   :  { %3809 = vmatmul.msk.f32.gmra.mxu1 %vm389_vm2, %v6480_v43 }
 0x246   :  { %v6484_v22 = vadd.f32 %v2084_v47, %v1902_v28  ;;  %3871 = vmatmul.msk.f32.gmra.mxu2 %vm389_vm2, %v6475_v5  ;;  %v8108_v28 = vld [vmem:[#allocation47_spill] sm:$0xff]  ;;  %v6504_v5 = vld [vmem:[%s7734_s0 + $0x300] sm:$0xff] }
 0x247   :  { %v2087_v12 = vpop.f32.mrf.mxu0 }
 0x248   :  { %8106 = vst [vmem:[#allocation135_spill] sm:$0xff] %v6484_v22  ;;  %3937 = vmatmul.msk.f32.gmra.mxu3 %vm389_vm2, %v6431_v31  ;;  %v6499_v22 = vsel %vm1071_vm3, %v1212_v7, %v1213_v53  ;;  %v4333_v7 = vld [vmem:[%s7734_s0 + $0x2e0] sm:$0x3] }
 0x249   :  { %v1499_v9 = vpop.f32.mrf.mxu2  ;;  %8109 = vst [vmem:[#allocation90_spill] sm:$0xff] %v6499_v22  ;;  %v1215_v4 = vrot.slane %v4333_v7, 2  ;;  %v6529_v7 = vld [vmem:[%s7734_s0 + $0x308] sm:$0xff] }
 0x24a   :  { %v1613_v39 = vadd.f32 %v1499_v9, %v997_v34  ;;  %v6494_v23 = vpop.f32.mrf.mxu1  ;;  %4003 = vmatmul.msk.f32.gmra.mxu0 %vm389_vm2, %v8108_v28  ;;  %v1000_v34 = vadd.f32 %v6396_v21, %v5450_v41 }
 0x24b   :  { %v1789_v47 = vpop.f32.mrf.mxu3 }
 0x24c   :  { %v1903_v3 = vadd.f32 %v1789_v47, %v1613_v39 }
 0x24d   :  { %3810 = vmatmul.msk.f32.gmra.mxu1 %vm389_vm2, %v6504_v5 }
 0x24e   :  { %v6508_v10 = vadd.f32 %v2087_v12, %v1903_v3  ;;  %3872 = vmatmul.msk.f32.gmra.mxu2 %vm389_vm2, %v6499_v22  ;;  %v8111_v12 = vld [vmem:[#allocation52_spill] sm:$0xff] }
 0x24f   :  { %v2090_v31 = vpop.f32.mrf.mxu0 }
 0x250   :  { %8110 = vst [vmem:[#allocation136_spill] sm:$0xff] %v6508_v10  ;;  %3938 = vmatmul.msk.f32.gmra.mxu3 %vm389_vm2, %v6455_v35  ;;  %v6524_v10 = vsel %vm1071_vm3, %v1213_v53, %v1215_v4  ;;  %v1218_v53 = vrot.slane %v6480_v43, 2  ;;  %v8114_v4 = vld [vmem:[#allocation95_spill] sm:$0xff] }
 0x251   :  { %v1502_v9 = vpop.f32.mrf.mxu2  ;;  %8112 = vst [vmem:[#allocation137_spill] sm:$0xff] %v6524_v10 }
 0x252   :  { %v1614_v39 = vadd.f32 %v1502_v9, %v1000_v34  ;;  %v6519_v47 = vpop.f32.mrf.mxu1  ;;  %4004 = vmatmul.msk.f32.gmra.mxu0 %vm389_vm2, %v8111_v12  ;;  %v1217_v34 = vrot.slane %v6455_v35, 2  ;;  %v1003_v9 = vadd.f32 %v6421_v11, %v8114_v4 }
 0x253   :  { %v1792_v3 = vpop.f32.mrf.mxu3 }
 0x254   :  { %v1904_v28 = vadd.f32 %v1792_v3, %v1614_v39 }
 0x255   :  { %3811 = vmatmul.msk.f32.gmra.mxu1 %vm389_vm2, %v6529_v7 }
 0x256   :  { %v6533_v41 = vadd.f32 %v2090_v31, %v1904_v28  ;;  %3873 = vmatmul.msk.f32.gmra.mxu2 %vm389_vm2, %v6524_v10  ;;  %v8115_v28 = vld [vmem:[#allocation56_spill] sm:$0xff] }
 0x257   :  { %v2093_v21 = vpop.f32.mrf.mxu0  ;;  %v6553_v10 = vld [vmem:[%s7734_s0 + $0x318] sm:$0xff] }
 0x258   :  { %8113 = vst [vmem:[#allocation138_spill] sm:$0xff] %v6533_v41  ;;  %3939 = vmatmul.msk.f32.gmra.mxu3 %vm389_vm2, %v6480_v43  ;;  %v6548_v41 = vsel %vm1071_vm3, %v1217_v34, %v1218_v53  ;;  %v4336_v34 = vld [vmem:[%s7734_s0 + $0x2f8] sm:$0x3] }
 0x259   :  { %v1505_v39 = vpop.f32.mrf.mxu2  ;;  %8116 = vst [vmem:[#allocation95_spill] sm:$0xff] %v6548_v41  ;;  %v1220_v4 = vrot.slane %v4336_v34, 2  ;;  %v6578_v34 = vld [vmem:[%s7734_s0 + $0x320] sm:$0xff] }
 0x25a   :  { %v1615_v3 = vadd.f32 %v1505_v39, %v1003_v9  ;;  %v6543_v12 = vpop.f32.mrf.mxu1  ;;  %4005 = vmatmul.msk.f32.gmra.mxu0 %vm389_vm2, %v8115_v28  ;;  %v1006_v9 = vadd.f32 %v6445_v42, %v5491_v58 }
 0x25b   :  { %v1795_v31 = vpop.f32.mrf.mxu3  ;;  %v6573_v28 = vsel %vm1071_vm3, %v1218_v53, %v1220_v4  ;;  %v1223_v53 = vrot.slane %v6529_v7, 2  ;;  %v8121_v4 = vld [vmem:[#allocation100_spill] sm:$0xff] }
 0x25c   :  { %v1905_v35 = vadd.f32 %v1795_v31, %v1615_v3  ;;  %8119 = vst [vmem:[#allocation140_spill] sm:$0xff] %v6573_v28 }
 0x25d   :  { %3812 = vmatmul.msk.f32.gmra.mxu1 %vm389_vm2, %v6553_v10 }
 0x25e   :  { %v6557_v11 = vadd.f32 %v2093_v21, %v1905_v35  ;;  %3874 = vmatmul.msk.f32.gmra.mxu2 %vm389_vm2, %v6548_v41  ;;  %v8118_v21 = vld [vmem:[#allocation59_spill] sm:$0xff] }
 0x25f   :  { %v2096_v43 = vpop.f32.mrf.mxu0 }
 0x260   :  { %8117 = vst [vmem:[#allocation139_spill] sm:$0xff] %v6557_v11  ;;  %3940 = vmatmul.msk.f32.gmra.mxu3 %vm389_vm2, %v6504_v5 }
 0x261   :  { %v1508_v39 = vpop.f32.mrf.mxu2 }
 0x262   :  { %v1616_v3 = vadd.f32 %v1508_v39, %v1006_v9  ;;  %v6568_v31 = vpop.f32.mrf.mxu1  ;;  %4006 = vmatmul.msk.f32.gmra.mxu0 %vm389_vm2, %v8118_v21  ;;  %v1222_v9 = vrot.slane %v6504_v5, 2  ;;  %v1009_v39 = vadd.f32 %v6470_v26, %v8121_v4 }
 0x263   :  { %v1798_v35 = vpop.f32.mrf.mxu3 }
 0x264   :  { %v1906_v11 = vadd.f32 %v1798_v35, %v1616_v3 }
 0x265   :  { %3813 = vmatmul.msk.f32.gmra.mxu1 %vm389_vm2, %v6578_v34 }
 0x266   :  { %v6582_v58 = vadd.f32 %v2096_v43, %v1906_v11  ;;  %3875 = vmatmul.msk.f32.gmra.mxu2 %vm389_vm2, %v6573_v28  ;;  %v8122_v11 = vld [vmem:[#allocation62_spill] sm:$0xff]  ;;  %v8124_v28 = vld [vmem:[#allocation75_spill] sm:$0xff] }
 0x267   :  { %v2099_v42 = vpop.f32.mrf.mxu0 }
 0x268   :  { %8120 = vst [vmem:[#allocation141_spill] sm:$0xff] %v6582_v58  ;;  %3941 = vmatmul.msk.f32.gmra.mxu3 %vm389_vm2, %v6529_v7  ;;  %v6597_v58 = vsel %vm1071_vm3, %v1222_v9, %v1223_v53  ;;  %v4338_v7 = vld [vmem:[%s7734_s0 + $0x310] sm:$0x3] }
 0x269   :  { %v1511_v3 = vpop.f32.mrf.mxu2  ;;  %8123 = vst [vmem:[#allocation100_spill] sm:$0xff] %v6597_v58  ;;  %v1225_v4 = vrot.slane %v4338_v7, 2 }
 0x26a   :  { %v1617_v35 = vadd.f32 %v1511_v3, %v1009_v39  ;;  %v6592_v21 = vpop.f32.mrf.mxu1  ;;  %4007 = vmatmul.msk.f32.gmra.mxu0 %vm389_vm2, %v8122_v11  ;;  %v8126_v39 = vld [vmem:[#allocation103_spill] sm:$0xff] }
 0x26b   :  { %v1801_v43 = vpop.f32.mrf.mxu3  ;;  %v1012_v3 = vadd.f32 %v6494_v23, %v8126_v39  ;;  %v1227_v39 = vrot.slane %v6553_v10, 2 }
 0x26c   :  { %v1907_v5 = vadd.f32 %v1801_v43, %v1617_v35 }
 0x26d   :  { %4014 = vmatmul.msk.f32.vlgmr.msra.gmra.mxu1 %vm389_vm2, %v8124_v28 }
 0x26e   :  { %v6601_v41 = vadd.f32 %v2099_v42, %v1907_v5  ;;  %3876 = vmatmul.msk.f32.gmra.mxu2 %vm389_vm2, %v6597_v58  ;;  %v8127_v42 = vld [vmem:[#allocation65_spill] sm:$0xff]  ;;  %v6617_v5 = vsel %vm1071_vm3, %v1223_v53, %v1225_v4  ;;  %v8132_v4 = vld [vmem:[#allocation68_spill] sm:$0xff] }
 0x26f   :  { %v2102_v26 = vpop.f32.mrf.mxu0  ;;  %8128 = vst [vmem:[#allocation103_spill] sm:$0xff] %v6617_v5  ;;  %v8137_v58 = vld [vmem:[#allocation109_spill] sm:$0xff] }
 0x270   :  { %8125 = vst [vmem:[#allocation75_spill] sm:$0xff] %v6601_v41  ;;  %3942 = vmatmul.msk.f32.gmra.mxu3 %vm389_vm2, %v6553_v10  ;;  %v8129_v41 = vld [vmem:[#allocation77_spill] sm:$0xff]  ;;  %v123_v10 = vld [vmem:[%s7734_s0 + $0x330] sm:$0xff] }
 0x271   :  { %v1514_v9 = vpop.f32.mrf.mxu2 }
 0x272   :  { %v1618_v35 = vadd.f32 %v1514_v9, %v1012_v3  ;;  %v6612_v28 = vpop.f32.mrf.mxu1  ;;  %4008 = vmatmul.msk.f32.gmra.mxu0 %vm389_vm2, %v8127_v42  ;;  %v1228_v3 = vrot.slane %v6578_v34, 2  ;;  %v8131_v9 = vld [vmem:[#allocation106_spill] sm:$0xff] }
 0x273   :  { %v1804_v43 = vpop.f32.mrf.mxu3  ;;  %v1015_v42 = vadd.f32 %v6519_v47, %v8131_v9 }
 0x274   :  { %v1908_v11 = vadd.f32 %v1804_v43, %v1618_v35  ;;  %v6642_v47 = vsel %vm1071_vm3, %v1227_v39, %v1228_v3 }
 0x275   :  { %4015 = vmatmul.msk.f32.gmra.mxu1 %vm389_vm2, %v8129_v41  ;;  %v124_v41 = vld [vmem:[%s7734_s0 + $0x338] sm:$0xff]  ;;  %8133 = vst [vmem:[#allocation106_spill] sm:$0xff] %v6642_v47 }
 0x276   :  { %v6621_v7 = vadd.f32 %v2102_v26, %v1908_v11  ;;  %3877 = vmatmul.msk.f32.gmra.mxu2 %vm389_vm2, %v6617_v5  ;;  %v1936_v43 = vrot.slane %v124_v41, 1 }
 0x277   :  { %v2105_v23 = vpop.f32.mrf.mxu0 }
 0x278   :  { %8130 = vst [vmem:[#allocation77_spill] sm:$0xff] %v6621_v7  ;;  %3943 = vmatmul.msk.f32.gmra.mxu3 %vm389_vm2, %v6578_v34  ;;  %v1935_v34 = vrot.slane %v123_v10, 1  ;;  %v8134_v7 = vld [vmem:[#allocation79_spill] sm:$0xff] }
 0x279   :  { %v1517_v53 = vpop.f32.mrf.mxu2 }
 0x27a   :  { %v1619_v11 = vadd.f32 %v1517_v53, %v1015_v42  ;;  %v6634_v26 = vpop.f32.mrf.mxu1  ;;  %4009 = vmatmul.msk.f32.gmra.mxu0 %vm389_vm2, %v8132_v4  ;;  %v4339_v4 = vld [vmem:[%s7734_s0 + $0x328] sm:$0x3]  ;;  %v6654_v39 = vsel %vm226_vm1, %v1935_v34, %v1936_v43 }
 0x27b   :  { %v1807_v35 = vpop.f32.mrf.mxu3  ;;  %v1230_v5 = vrot.slane %v4339_v4, 2  ;;  %8136 = vst [vmem:[#allocation142_spill] sm:$0xff] %v6654_v39 }
 0x27c   :  { %v1909_v9 = vadd.f32 %v1807_v35, %v1619_v11  ;;  %v1018_v11 = vadd.f32 %v6543_v12, %v8137_v58  ;;  %v8138_v12 = vld [vmem:[#allocation82_spill] sm:$0xff] }
 0x27d   :  { %4016 = vmatmul.msk.f32.gmra.mxu1 %vm389_vm2, %v8134_v7  ;;  %v6667_v34 = vsel %vm1071_vm3, %v1228_v3, %v1230_v5 }
 0x27e   :  { %v6646_v42 = vadd.f32 %v2105_v23, %v1909_v9  ;;  %3878 = vmatmul.msk.f32.gmra.mxu2 %vm389_vm2, %v6642_v47  ;;  %v125_v23 = vld [vmem:[%s7734_s0 + $0x340] sm:$0x3] }
 0x27f   :  { %v2108_v53 = vpop.f32.mrf.mxu0  ;;  %v1938_v47 = vrot.slane %v125_v23, 1 }
 0x280   :  { %8135 = vst [vmem:[#allocation79_spill] sm:$0xff] %v6646_v42  ;;  %3944 = vmatmul.msk.f32.gmra.mxu3 %vm389_vm2, %v123_v10 }
 0x281   :  { %v1520_v35 = vpop.f32.mrf.mxu2 }
 0x282   :  { %v1620_v9 = vadd.f32 %v1520_v35, %v1018_v11  ;;  %v6662_v42 = vpop.f32.mrf.mxu1  ;;  %4010 = vmatmul.msk.f32.gmra.mxu0 %vm389_vm2, %v6654_v39  ;;  %v6676_v11 = vsel %vm226_vm1, %v1936_v43, %v1938_v47  ;;  %v8140_v35 = vld [vmem:[#allocation71_spill] sm:$0xff] }
 0x283   :  { %v1810_v4 = vpop.f32.mrf.mxu3  ;;  %8139 = vst [vmem:[#allocation109_spill] sm:$0xff] %v6676_v11  ;;  %v1021_v39 = vadd.f32 %v6568_v31, %v8140_v35  ;;  %v4340_v47 = vld [vmem:[%s7734_s0 + $0x30] sm:$0xff] }
 0x284   :  { %v1910_v22 = vadd.f32 %v1810_v4, %v1620_v9  ;;  %v8141_v9 = vld [vmem:[#allocation84_spill] sm:$0xff] }
 0x285   :  { %4017 = vmatmul.msk.f32.gmra.mxu1 %vm389_vm2, %v8138_v12 }
 0x286   :  { %v6671_v58 = vadd.f32 %v2108_v53, %v1910_v22  ;;  %3879 = vmatmul.msk.f32.gmra.mxu2 %vm389_vm2, %v6667_v34 }
 0x287   :  { %v2111_v10 = vpop.f32.mrf.mxu0 }
 0x288   :  { %3945 = vmatmul.msk.f32.gmra.mxu3 %vm389_vm2, %v124_v41  ;;  %v8142_v41 = vld [vmem:[#allocation73_spill] sm:$0xff] }
 0x289   :  { %v1523_v5 = vpop.f32.mrf.mxu2  ;;  %v1024_v43 = vadd.f32 %v6592_v21, %v8142_v41  ;;  %v4341_v21 = vld [vmem:[%s7734_s0 + $0x38] sm:$0xff]  ;;  %v8146_v41 = vld [vmem:[#allocation74_spill] sm:$0xff] }
 0x28a   :  { %v1621_v3 = vadd.f32 %v1523_v5, %v1021_v39  ;;  %v1035_v23 = vpop.f32.mrf.mxu1  ;;  %4011 = vmatmul.msk.f32.gmra.mxu0 %vm389_vm2, %v6676_v11  ;;  %v8143_v39 = vld [vmem:[#allocation16_spill] sm:$0xff] }
 0x28b   :  { %v1813_v22 = vpop.f32.mrf.mxu3 }
 0x28c   :  { %v1911_v53 = vadd.f32 %v1813_v22, %v1621_v3 }
 0x28d   :  { %4018 = vmatmul.msk.f32.gmra.mxu1 %vm389_vm2, %v8141_v9 }
 0x28e   :  { %v6685_v4 = vadd.f32 %v2111_v10, %v1911_v53  ;;  %4080 = vmatmul.msk.f32.vlgmr.msra.gmra.mxu2 %vm389_vm2, %v4340_v47  ;;  %v8144_v53 = vld [vmem:[#allocation87_spill] sm:$0xff] }
 0x28f   :  { %v2114_v31 = vpop.f32.mrf.mxu0 }
 0x290   :  { %4146 = vmatmul.msk.f32.vlgmr.msra.gmra.mxu3 %vm389_vm2, %v8143_v39  ;;  %v8147_v39 = vld [vmem:[#allocation21_spill] sm:$0xff] }
 0x291   :  { %v1526_v35 = vpop.f32.mrf.mxu2 }
 0x292   :  { %v1622_v5 = vadd.f32 %v1526_v35, %v1024_v43  ;;  %v1038_v3 = vpop.f32.mrf.mxu1  ;;  %4212 = vmatmul.msk.f32.vlgmr.msra.gmra.mxu0 %vm389_vm2, %v8134_v7  ;;  %v1027_v43 = vadd.f32 %v6612_v28, %v8146_v41  ;;  %v4342_v28 = vld [vmem:[%s7734_s0 + $0x48] sm:$0xff]  ;;  %v8150_v41 = vld [vmem:[#allocation76_spill] sm:$0xff] }
 0x293   :  { %v1816_v10 = vpop.f32.mrf.mxu3 }
 0x294   :  { %v1912_v22 = vadd.f32 %v1816_v10, %v1622_v5 }
 0x295   :  { %4019 = vmatmul.msk.f32.gmra.mxu1 %vm389_vm2, %v8144_v53 }
 0x296   :  { %v6699_v11 = vadd.f32 %v2114_v31, %v1912_v22  ;;  %4081 = vmatmul.msk.f32.gmra.mxu2 %vm389_vm2, %v4341_v21  ;;  %v8148_v22 = vld [vmem:[#allocation89_spill] sm:$0xff] }
 0x297   :  { %v2117_v47 = vpop.f32.mrf.mxu0 }
 0x298   :  { %8145 = vst [vmem:[#allocation82_spill] sm:$0xff] %v6699_v11  ;;  %4147 = vmatmul.msk.f32.gmra.mxu3 %vm389_vm2, %v8147_v39  ;;  %v8151_v39 = vld [vmem:[#allocation26_spill] sm:$0xff] }
 0x299   :  { %v1529_v7 = vpop.f32.mrf.mxu2 }
 0x29a   :  { %v1623_v35 = vadd.f32 %v1529_v7, %v1027_v43  ;;  %v1041_v5 = vpop.f32.mrf.mxu1  ;;  %4213 = vmatmul.msk.f32.gmra.mxu0 %vm389_vm2, %v8138_v12  ;;  %v1030_v43 = vadd.f32 %v6634_v26, %v8150_v41  ;;  %v4343_v26 = vld [vmem:[%s7734_s0 + $0x50] sm:$0xff] }
 0x29b   :  { %v1819_v31 = vpop.f32.mrf.mxu3  ;;  %v8154_v41 = vld [vmem:[#allocation78_spill] sm:$0xff] }
 0x29c   :  { %v1913_v10 = vadd.f32 %v1819_v31, %v1623_v35 }
 0x29d   :  { %4020 = vmatmul.msk.f32.gmra.mxu1 %vm389_vm2, %v8148_v22 }
 0x29e   :  { %v6713_v11 = vadd.f32 %v2117_v47, %v1913_v10  ;;  %4082 = vmatmul.msk.f32.gmra.mxu2 %vm389_vm2, %v4342_v28  ;;  %v8152_v10 = vld [vmem:[#allocation92_spill] sm:$0xff] }
 0x29f   :  { %v2120_v21 = vpop.f32.mrf.mxu0 }
 0x2a0   :  { %8149 = vst [vmem:[#allocation71_spill] sm:$0xff] %v6713_v11  ;;  %4148 = vmatmul.msk.f32.gmra.mxu3 %vm389_vm2, %v8151_v39  ;;  %v8155_v39 = vld [vmem:[#allocation31_spill] sm:$0xff] }
 0x2a1   :  { %v1532_v12 = vpop.f32.mrf.mxu2 }
 0x2a2   :  { %v1624_v7 = vadd.f32 %v1532_v12, %v1030_v43  ;;  %v1044_v35 = vpop.f32.mrf.mxu1  ;;  %4214 = vmatmul.msk.f32.gmra.mxu0 %vm389_vm2, %v8141_v9  ;;  %v1033_v43 = vadd.f32 %v6662_v42, %v8154_v41  ;;  %v4344_v42 = vld [vmem:[%s7734_s0 + $0x60] sm:$0xff] }
 0x2a3   :  { %v1822_v47 = vpop.f32.mrf.mxu3  ;;  %v8158_v41 = vld [vmem:[#allocation81_spill] sm:$0xff] }
 0x2a4   :  { %v1914_v31 = vadd.f32 %v1822_v47, %v1624_v7 }
 0x2a5   :  { %4021 = vmatmul.msk.f32.gmra.mxu1 %vm389_vm2, %v8152_v10 }
 0x2a6   :  { %v6727_v11 = vadd.f32 %v2120_v21, %v1914_v31  ;;  %4083 = vmatmul.msk.f32.gmra.mxu2 %vm389_vm2, %v4343_v26  ;;  %v8156_v31 = vld [vmem:[#allocation94_spill] sm:$0xff] }
 0x2a7   :  { %v2123_v28 = vpop.f32.mrf.mxu0 }
 0x2a8   :  { %8153 = vst [vmem:[#allocation84_spill] sm:$0xff] %v6727_v11  ;;  %4149 = vmatmul.msk.f32.gmra.mxu3 %vm389_vm2, %v8155_v39  ;;  %v8159_v39 = vld [vmem:[#allocation37_spill] sm:$0xff] }
 0x2a9   :  { %v1535_v9 = vpop.f32.mrf.mxu2 }
 0x2aa   :  { %v1625_v12 = vadd.f32 %v1535_v9, %v1033_v43  ;;  %v1047_v7 = vpop.f32.mrf.mxu1  ;;  %4215 = vmatmul.msk.f32.gmra.mxu0 %vm389_vm2, %v8144_v53  ;;  %v1036_v43 = vadd.f32 %v1035_v23, %v8158_v41  ;;  %v4345_v23 = vld [vmem:[%s7734_s0 + $0x68] sm:$0xff]  ;;  %v8162_v41 = vld [vmem:[#allocation83_spill] sm:$0xff] }
 0x2ab   :  { %v1825_v21 = vpop.f32.mrf.mxu3 }
 0x2ac   :  { %v1915_v47 = vadd.f32 %v1825_v21, %v1625_v12 }
 0x2ad   :  { %4022 = vmatmul.msk.f32.gmra.mxu1 %vm389_vm2, %v8156_v31 }
 0x2ae   :  { %v6741_v11 = vadd.f32 %v2123_v28, %v1915_v47  ;;  %4084 = vmatmul.msk.f32.gmra.mxu2 %vm389_vm2, %v4344_v42  ;;  %v8160_v47 = vld [vmem:[#allocation97_spill] sm:$0xff] }
 0x2af   :  { %v2126_v26 = vpop.f32.mrf.mxu0 }
 0x2b0   :  { %8157 = vst [vmem:[#allocation73_spill] sm:$0xff] %v6741_v11  ;;  %4150 = vmatmul.msk.f32.gmra.mxu3 %vm389_vm2, %v8159_v39  ;;  %v8163_v39 = vld [vmem:[#allocation42_spill] sm:$0xff] }
 0x2b1   :  { %v1538_v53 = vpop.f32.mrf.mxu2 }
 0x2b2   :  { %v1626_v9 = vadd.f32 %v1538_v53, %v1036_v43  ;;  %v1050_v12 = vpop.f32.mrf.mxu1  ;;  %4216 = vmatmul.msk.f32.gmra.mxu0 %vm389_vm2, %v8148_v22  ;;  %v1039_v43 = vadd.f32 %v1038_v3, %v8162_v41  ;;  %v4346_v3 = vld [vmem:[%s7734_s0 + $0x78] sm:$0xff]  ;;  %v8166_v41 = vld [vmem:[#allocation86_spill] sm:$0xff] }
 0x2b3   :  { %v1828_v28 = vpop.f32.mrf.mxu3 }
 0x2b4   :  { %v1916_v21 = vadd.f32 %v1828_v28, %v1626_v9 }
 0x2b5   :  { %4023 = vmatmul.msk.f32.gmra.mxu1 %vm389_vm2, %v8160_v47 }
 0x2b6   :  { %v6754_v11 = vadd.f32 %v2126_v26, %v1916_v21  ;;  %4085 = vmatmul.msk.f32.gmra.mxu2 %vm389_vm2, %v4345_v23  ;;  %v8164_v21 = vld [vmem:[#allocation99_spill] sm:$0xff] }
 0x2b7   :  { %v2129_v42 = vpop.f32.mrf.mxu0 }
 0x2b8   :  { %8161 = vst [vmem:[#allocation16_spill] sm:$0xff] %v6754_v11  ;;  %4151 = vmatmul.msk.f32.gmra.mxu3 %vm389_vm2, %v8163_v39  ;;  %v8167_v39 = vld [vmem:[#allocation48_spill] sm:$0xff] }
 0x2b9   :  { %v1541_v22 = vpop.f32.mrf.mxu2 }
 0x2ba   :  { %v1627_v53 = vadd.f32 %v1541_v22, %v1039_v43  ;;  %v1053_v9 = vpop.f32.mrf.mxu1  ;;  %4217 = vmatmul.msk.f32.gmra.mxu0 %vm389_vm2, %v8152_v10  ;;  %v1042_v43 = vadd.f32 %v1041_v5, %v8166_v41  ;;  %v4347_v5 = vld [vmem:[%s7734_s0 + $0x80] sm:$0xff] }
 0x2bb   :  { %v1831_v26 = vpop.f32.mrf.mxu3  ;;  %v8170_v41 = vld [vmem:[#allocation88_spill] sm:$0xff] }
 0x2bc   :  { %v1917_v28 = vadd.f32 %v1831_v26, %v1627_v53 }
 0x2bd   :  { %4024 = vmatmul.msk.f32.gmra.mxu1 %vm389_vm2, %v8164_v21 }
 0x2be   :  { %v6767_v11 = vadd.f32 %v2129_v42, %v1917_v28  ;;  %4086 = vmatmul.msk.f32.gmra.mxu2 %vm389_vm2, %v4346_v3  ;;  %v8168_v28 = vld [vmem:[#allocation102_spill] sm:$0xff] }
 0x2bf   :  { %v2132_v23 = vpop.f32.mrf.mxu0 }
 0x2c0   :  { %8165 = vst [vmem:[#allocation87_spill] sm:$0xff] %v6767_v11  ;;  %4152 = vmatmul.msk.f32.gmra.mxu3 %vm389_vm2, %v8167_v39  ;;  %v8171_v39 = vld [vmem:[#allocation53_spill] sm:$0xff] }
 0x2c1   :  { %v1544_v10 = vpop.f32.mrf.mxu2 }
 0x2c2   :  { %v1628_v22 = vadd.f32 %v1544_v10, %v1042_v43  ;;  %v1056_v53 = vpop.f32.mrf.mxu1  ;;  %4218 = vmatmul.msk.f32.gmra.mxu0 %vm389_vm2, %v8156_v31  ;;  %v1045_v43 = vadd.f32 %v1044_v35, %v8170_v41  ;;  %v4348_v35 = vld [vmem:[%s7734_s0 + $0x90] sm:$0xff] }
 0x2c3   :  { %v1834_v42 = vpop.f32.mrf.mxu3  ;;  %v8174_v41 = vld [vmem:[#allocation91_spill] sm:$0xff] }
 0x2c4   :  { %v1918_v26 = vadd.f32 %v1834_v42, %v1628_v22 }
 0x2c5   :  { %4025 = vmatmul.msk.f32.gmra.mxu1 %vm389_vm2, %v8168_v28 }
 0x2c6   :  { %v6780_v11 = vadd.f32 %v2132_v23, %v1918_v26  ;;  %4087 = vmatmul.msk.f32.gmra.mxu2 %vm389_vm2, %v4347_v5  ;;  %v8172_v26 = vld [vmem:[#allocation105_spill] sm:$0xff] }
 0x2c7   :  { %v2135_v3 = vpop.f32.mrf.mxu0 }
 0x2c8   :  { %8169 = vst [vmem:[#allocation74_spill] sm:$0xff] %v6780_v11  ;;  %4153 = vmatmul.msk.f32.gmra.mxu3 %vm389_vm2, %v8171_v39  ;;  %v8175_v39 = vld [vmem:[#allocation57_spill] sm:$0xff] }
 0x2c9   :  { %v1547_v31 = vpop.f32.mrf.mxu2 }
 0x2ca   :  { %v1629_v10 = vadd.f32 %v1547_v31, %v1045_v43  ;;  %v1059_v22 = vpop.f32.mrf.mxu1  ;;  %4219 = vmatmul.msk.f32.gmra.mxu0 %vm389_vm2, %v8160_v47  ;;  %v1048_v43 = vadd.f32 %v1047_v7, %v8174_v41  ;;  %v4349_v7 = vld [vmem:[%s7734_s0 + $0x98] sm:$0xff]  ;;  %v8178_v41 = vld [vmem:[#allocation93_spill] sm:$0xff] }
 0x2cb   :  { %v1837_v23 = vpop.f32.mrf.mxu3 }
 0x2cc   :  { %v1919_v42 = vadd.f32 %v1837_v23, %v1629_v10 }
 0x2cd   :  { %4026 = vmatmul.msk.f32.gmra.mxu1 %vm389_vm2, %v8172_v26 }
 0x2ce   :  { %v6793_v11 = vadd.f32 %v2135_v3, %v1919_v42  ;;  %4088 = vmatmul.msk.f32.gmra.mxu2 %vm389_vm2, %v4348_v35  ;;  %v8176_v42 = vld [vmem:[#allocation108_spill] sm:$0xff] }
 0x2cf   :  { %v2138_v5 = vpop.f32.mrf.mxu0 }
 0x2d0   :  { %8173 = vst [vmem:[#allocation21_spill] sm:$0xff] %v6793_v11  ;;  %4154 = vmatmul.msk.f32.gmra.mxu3 %vm389_vm2, %v8175_v39  ;;  %v8179_v39 = vld [vmem:[#allocation60_spill] sm:$0xff] }
 0x2d1   :  { %v1550_v47 = vpop.f32.mrf.mxu2 }
 0x2d2   :  { %v1630_v31 = vadd.f32 %v1550_v47, %v1048_v43  ;;  %v1062_v10 = vpop.f32.mrf.mxu1  ;;  %4220 = vmatmul.msk.f32.gmra.mxu0 %vm389_vm2, %v8164_v21  ;;  %v1051_v43 = vadd.f32 %v1050_v12, %v8178_v41  ;;  %v4350_v12 = vld [vmem:[%s7734_s0 + $0xa8] sm:$0xff]  ;;  %v8181_v41 = vld [vmem:[#allocation96_spill] sm:$0xff] }
 0x2d3   :  { %v1840_v3 = vpop.f32.mrf.mxu3 }
 0x2d4   :  { %v1920_v23 = vadd.f32 %v1840_v3, %v1630_v31 }
 0x2d5   :  { %4027 = vmatmul.msk.f32.gmra.mxu1 %vm389_vm2, %v8176_v42 }
 0x2d6   :  { %v6806_v11 = vadd.f32 %v2138_v5, %v1920_v23  ;;  %4089 = vmatmul.msk.f32.gmra.mxu2 %vm389_vm2, %v4349_v7  ;;  %v8180_v23 = vld [vmem:[#allocation111_spill] sm:$0xff] }
 0x2d7   :  { %v2141_v35 = vpop.f32.mrf.mxu0 }
 0x2d8   :  { %8177 = vst [vmem:[#allocation89_spill] sm:$0xff] %v6806_v11  ;;  %4155 = vmatmul.msk.f32.gmra.mxu3 %vm389_vm2, %v8179_v39  ;;  %v8182_v39 = vld [vmem:[#allocation63_spill] sm:$0xff] }
 0x2d9   :  { %v1553_v21 = vpop.f32.mrf.mxu2 }
 0x2da   :  { %v1631_v47 = vadd.f32 %v1553_v21, %v1051_v43  ;;  %v1065_v31 = vpop.f32.mrf.mxu1  ;;  %4221 = vmatmul.msk.f32.gmra.mxu0 %vm389_vm2, %v8168_v28  ;;  %v1054_v43 = vadd.f32 %v1053_v9, %v8181_v41  ;;  %v4351_v9 = vld [vmem:[%s7734_s0 + $0xb0] sm:$0xff] }
 0x2db   :  { %v1843_v5 = vpop.f32.mrf.mxu3  ;;  %v8183_v41 = vld [vmem:[#allocation98_spill] sm:$0xff] }
 0x2dc   :  { %v1921_v3 = vadd.f32 %v1843_v5, %v1631_v47 }
 0x2dd   :  { %4028 = vmatmul.msk.f32.gmra.mxu1 %vm389_vm2, %v8180_v23 }
 0x2de   :  { %v6819_v11 = vadd.f32 %v2141_v35, %v1921_v3  ;;  %4090 = vmatmul.msk.f32.gmra.mxu2 %vm389_vm2, %v4350_v12 }
 0x2df   :  { %v2144_v7 = vpop.f32.mrf.mxu0 }
 0x2e0   :  { %4156 = vmatmul.msk.f32.gmra.mxu3 %vm389_vm2, %v8182_v39  ;;  %v8184_v39 = vld [vmem:[#allocation66_spill] sm:$0xff] }
 0x2e1   :  { %v1556_v28 = vpop.f32.mrf.mxu2 }
 0x2e2   :  { %v1632_v21 = vadd.f32 %v1556_v28, %v1054_v43  ;;  %v1068_v47 = vpop.f32.mrf.mxu1  ;;  %4222 = vmatmul.msk.f32.gmra.mxu0 %vm389_vm2, %v8172_v26  ;;  %v1057_v43 = vadd.f32 %v1056_v53, %v8183_v41  ;;  %v4352_v53 = vld [vmem:[%s7734_s0 + $0xc0] sm:$0xff] }
 0x2e3   :  { %v1846_v35 = vpop.f32.mrf.mxu3  ;;  %v8185_v41 = vld [vmem:[#allocation101_spill] sm:$0xff] }
 0x2e4   :  { %v1922_v5 = vadd.f32 %v1846_v35, %v1632_v21 }
 0x2e5   :  { %4029 = vmatmul.msk.f32.gmra.mxu1 %vm389_vm2, %v5596_v27 }
 0x2e6   :  { %v6832_v3 = vadd.f32 %v2144_v7, %v1922_v5  ;;  %4091 = vmatmul.msk.f32.gmra.mxu2 %vm389_vm2, %v4351_v9 }
 0x2e7   :  { %v2147_v12 = vpop.f32.mrf.mxu0 }
 0x2e8   :  { %4157 = vmatmul.msk.f32.gmra.mxu3 %vm389_vm2, %v8184_v39  ;;  %v8186_v39 = vld [vmem:[#allocation69_spill] sm:$0xff] }
 0x2e9   :  { %v1559_v26 = vpop.f32.mrf.mxu2 }
 0x2ea   :  { %v1633_v28 = vadd.f32 %v1559_v26, %v1057_v43  ;;  %v6841_v21 = vpop.f32.mrf.mxu1  ;;  %4223 = vmatmul.msk.f32.gmra.mxu0 %vm389_vm2, %v8176_v42  ;;  %v1060_v43 = vadd.f32 %v1059_v22, %v8185_v41  ;;  %v4353_v22 = vld [vmem:[%s7734_s0 + $0xc8] sm:$0xff]  ;;  %v8187_v41 = vld [vmem:[#allocation104_spill] sm:$0xff] }
 0x2eb   :  { %v1849_v7 = vpop.f32.mrf.mxu3 }
 0x2ec   :  { %v1923_v35 = vadd.f32 %v1849_v7, %v1633_v28 }
 0x2ed   :  { %4030 = vmatmul.msk.f32.gmra.mxu1 %vm389_vm2, %v5614_v62 }
 0x2ee   :  { %v6847_v5 = vadd.f32 %v2147_v12, %v1923_v35  ;;  %4092 = vmatmul.msk.f32.gmra.mxu2 %vm389_vm2, %v4352_v53 }
 0x2ef   :  { %v2150_v9 = vpop.f32.mrf.mxu0 }
 0x2f0   :  { %4158 = vmatmul.msk.f32.gmra.mxu3 %vm389_vm2, %v8186_v39  ;;  %v8188_v39 = vld [vmem:[#allocation5_spill] sm:$0xff] }
 0x2f1   :  { %v1562_v42 = vpop.f32.mrf.mxu2 }
 0x2f2   :  { %v1634_v26 = vadd.f32 %v1562_v42, %v1060_v43  ;;  %v6856_v28 = vpop.f32.mrf.mxu1  ;;  %4224 = vmatmul.msk.f32.gmra.mxu0 %vm389_vm2, %v8180_v23  ;;  %v1063_v43 = vadd.f32 %v1062_v10, %v8187_v41  ;;  %v4354_v10 = vld [vmem:[%s7734_s0 + $0xd8] sm:$0xff] }
 0x2f3   :  { %v1852_v12 = vpop.f32.mrf.mxu3  ;;  %v8189_v41 = vld [vmem:[#allocation107_spill] sm:$0xff] }
 0x2f4   :  { %v1924_v7 = vadd.f32 %v1852_v12, %v1634_v26 }
 0x2f5   :  { %4031 = vmatmul.msk.f32.gmra.mxu1 %vm389_vm2, %v5631_v24 }
 0x2f6   :  { %v6862_v35 = vadd.f32 %v2150_v9, %v1924_v7  ;;  %4093 = vmatmul.msk.f32.gmra.mxu2 %vm389_vm2, %v4353_v22 }
 0x2f7   :  { %v2153_v53 = vpop.f32.mrf.mxu0 }
 0x2f8   :  { %4159 = vmatmul.msk.f32.gmra.mxu3 %vm389_vm2, %v8188_v39  ;;  %v8190_v39 = vld [vmem:[#allocation8_spill] sm:$0xff] }
 0x2f9   :  { %v1565_v23 = vpop.f32.mrf.mxu2 }
 0x2fa   :  { %v1635_v42 = vadd.f32 %v1565_v23, %v1063_v43  ;;  %v6871_v26 = vpop.f32.mrf.mxu1  ;;  %4225 = vmatmul.msk.f32.gmra.mxu0 %vm389_vm2, %v5596_v27  ;;  %v1066_v43 = vadd.f32 %v1065_v31, %v8189_v41  ;;  %v4355_v31 = vld [vmem:[%s7734_s0 + $0xe0] sm:$0xff]  ;;  %v8191_v41 = vld [vmem:[#allocation110_spill] sm:$0xff] }
 0x2fb   :  { %v1855_v9 = vpop.f32.mrf.mxu3 }
 0x2fc   :  { %v1925_v12 = vadd.f32 %v1855_v9, %v1635_v42 }
 0x2fd   :  { %4032 = vmatmul.msk.f32.gmra.mxu1 %vm389_vm2, %v5650_v40 }
 0x2fe   :  { %v6877_v7 = vadd.f32 %v2153_v53, %v1925_v12  ;;  %4094 = vmatmul.msk.f32.gmra.mxu2 %vm389_vm2, %v4354_v10 }
 0x2ff   :  { %v2156_v22 = vpop.f32.mrf.mxu0 }
 0x300   :  { %4160 = vmatmul.msk.f32.gmra.mxu3 %vm389_vm2, %v8190_v39 }
 0x301   :  { %v1568_v27 = vpop.f32.mrf.mxu2 }
 0x302   :  { %v1636_v23 = vadd.f32 %v1568_v27, %v1066_v43  ;;  %v6886_v42 = vpop.f32.mrf.mxu1  ;;  %4226 = vmatmul.msk.f32.gmra.mxu0 %vm389_vm2, %v5614_v62  ;;  %v1069_v43 = vadd.f32 %v1068_v47, %v8191_v41 }
 0x303   :  { %v1858_v53 = vpop.f32.mrf.mxu3 }
 0x304   :  { %v1926_v9 = vadd.f32 %v1858_v53, %v1636_v23  ;;  %v3636_v53 = vld [vmem:[%s7737_s3 + $0x78] sm:$0xff] }
 0x305   :  { %4033 = vmatmul.msk.f32.gmra.mxu1 %vm389_vm2, %v5668_v44 }
 0x306   :  { %v6892_v12 = vadd.f32 %v2156_v22, %v1926_v9  ;;  %4095 = vmatmul.msk.f32.gmra.mxu2 %vm389_vm2, %v4355_v31  ;;  %3646 = vmatpush.msrb.mxu1 %v3636_v53 }
 0x307   :  { %v2159_v10 = vpop.f32.mrf.mxu0 }
 0x308   :  { %4161 = vmatmul.msk.f32.gmra.mxu3 %vm389_vm2, %v4610_v51  ;;  %v4356_v51 = vld [vmem:[%s7734_s0 + $0xf0] sm:$0xff] }
 0x309   :  { %v1571_v62 = vpop.f32.mrf.mxu2 }
 0x30a   :  { %v1637_v39 = vadd.f32 %v1571_v62, %v1069_v43  ;;  %v6901_v27 = vpop.f32.mrf.mxu1  ;;  %4227 = vmatmul.msk.f32.gmra.mxu0 %vm389_vm2, %v5631_v24  ;;  %v2458_v24 = vadd.f32 %v6841_v21, %v5600_v60  ;;  %v4357_v60 = vld [vmem:[%s7734_s0 + $0xf8] sm:$0xff]  ;;  %v2459_v21 = vadd.f32 %v6856_v28, %v5618_v1  ;;  %v4358_v28 = vld [vmem:[%s7734_s0 + $0x108] sm:$0xff] }
 0x30b   :  { %v1861_v22 = vpop.f32.mrf.mxu3 }
 0x30c   :  { %v1927_v23 = vadd.f32 %v1861_v22, %v1637_v39  ;;  %v6937_v22 = vld [vmem:[%s7736_s2] ss:$0 sm:$0xff] }
 0x30d   :  { %4034 = vmatmul.msk.f32.gmra.mxu1 %vm389_vm2, %v5687_v52 }
 0x30e   :  { %v6910_v47 = vadd.f32 %v2159_v10, %v1927_v23  ;;  %4096 = vmatmul.msk.f32.gmra.mxu2 %vm389_vm2, %v4356_v51 }
 0x30f   :  { %v3150_v9 = vpop.f32.mrf.mxu0 }
 0x310   :  { %4162 = vmatmul.msk.f32.gmra.mxu3 %vm389_vm2, %v4654_v6 }
 0x311   :  { %v2556_v31 = vpop.f32.mrf.mxu2 }
 0x312   :  { %v2748_v41 = vadd.f32 %v2556_v31, %v2458_v24  ;;  %v6920_v43 = vpop.f32.mrf.mxu1  ;;  %4228 = vmatmul.msk.f32.gmra.mxu0 %vm389_vm2, %v5650_v40  ;;  %v2460_v31 = vadd.f32 %v6871_v26, %v5635_v37  ;;  %v4359_v26 = vld [vmem:[%s7734_s0 + $0x110] sm:$0xff] }
 0x313   :  { %v2854_v10 = vpop.f32.mrf.mxu3 }
 0x314   :  { %v3046_v62 = vadd.f32 %v2854_v10, %v2748_v41  ;;  %v8192_v41 = vld [vmem:[#allocation17_spill] sm:$0xff] }
 0x315   :  { %4035 = vmatmul.msk.f32.gmra.mxu1 %vm389_vm2, %v5705_v33 }
 0x316   :  { %v3342_v39 = vadd.f32 %v3150_v9, %v3046_v62  ;;  %4097 = vmatmul.msk.f32.gmra.mxu2 %vm389_vm2, %v4357_v60 }
 0x317   :  { %v3153_v6 = vpop.f32.mrf.mxu0 }
 0x318   :  { %4163 = vmatmul.msk.f32.gmra.mxu3 %vm389_vm2, %v4697_v30  ;;  %v3410_v1 = vadd.f32 %v6937_v22, %v3342_v39 }
 0x319   :  { %v2559_v40 = vpop.f32.mrf.mxu2 }
 0x31a   :  { %v2749_v23 = vadd.f32 %v2559_v40, %v2459_v21  ;;  %v6939_v53 = vpop.f32.mrf.mxu1  ;;  %4229 = vmatmul.msk.f32.gmra.mxu0 %vm389_vm2, %v5668_v44  ;;  %v3474_v62 = vmax.f32 %v3410_v1, 0.0 }
 0x31b   :  { %v2857_v51 = vpop.f32.mrf.mxu3 }
 0x31c   :  { %v3047_v9 = vadd.f32 %v2857_v51, %v2749_v23 }
 0x31d   :  { %4036 = vmatmul.msk.f32.gmra.mxu1 %vm389_vm2, %v5724_v2 }
 0x31e   :  { %v3343_v30 = vadd.f32 %v3153_v6, %v3047_v9  ;;  %4098 = vmatmul.msk.f32.gmra.mxu2 %vm389_vm2, %v4358_v28  ;;  %v8193_v9 = vld [vmem:[#allocation112_spill] sm:$0xff] }
 0x31f   :  { %v3156_v24 = vpop.f32.mrf.mxu0  ;;  %v2461_v1 = vadd.f32 %v6886_v42, %v8193_v9  ;;  %v3635_v42 = vld [vmem:[%s7737_s3 + $0x70] sm:$0xff] }
 0x320   :  { %v3411_v44 = vadd.f32 %v6937_v22, %v3343_v30  ;;  %4164 = vmatmul.msk.f32.gmra.mxu3 %vm389_vm2, %v8192_v41  ;;  %3647 = vmatpush.msrb.mxu1 %v3635_v42 }
 0x321   :  { %v2562_v10 = vpop.f32.mrf.mxu2 }
 0x322   :  { %v3475_v60 = vmax.f32 %v3411_v44, 0.0  ;;  %v2750_v39 = vadd.f32 %v2562_v10, %v2460_v31  ;;  %v6955_v6 = vpop.f32.mrf.mxu1  ;;  %4230 = vmatmul.msk.f32.gmra.mxu0 %vm389_vm2, %v5687_v52  ;;  %v8194_v52 = vld [vmem:[#allocation22_spill] sm:$0xff] }
 0x323   :  { %v2860_v21 = vpop.f32.mrf.mxu3 }
 0x324   :  { %v3538_v40 = vadd.f32 %v3475_v60, %v3474_v62  ;;  %v3048_v23 = vadd.f32 %v2860_v21, %v2750_v39  ;;  %v4360_v39 = vld [vmem:[%s7734_s0 + $0x120] sm:$0xff] }
 0x325   :  { %4037 = vmatmul.msk.f32.gmra.mxu1 %vm389_vm2, %v5742_v38 }
 0x326   :  { %v3344_v37 = vadd.f32 %v3156_v24, %v3048_v23  ;;  %4099 = vmatmul.msk.f32.gmra.mxu2 %vm389_vm2, %v4359_v26 }
 0x327   :  { %v3159_v51 = vpop.f32.mrf.mxu0 }
 0x328   :  { %v3412_v30 = vadd.f32 %v6937_v22, %v3344_v37  ;;  %4165 = vmatmul.msk.f32.gmra.mxu3 %vm389_vm2, %v8194_v52  ;;  %v8196_v37 = vld [vmem:[#allocation27_spill] sm:$0xff] }
 0x329   :  { %v2565_v28 = vpop.f32.mrf.mxu2 }
 0x32a   :  { %v3476_v31 = vmax.f32 %v3412_v30, 0.0  ;;  %v2751_v44 = vadd.f32 %v2565_v28, %v2461_v1  ;;  %v6970_v41 = vpop.f32.mrf.mxu1  ;;  %4231 = vmatmul.msk.f32.gmra.mxu0 %vm389_vm2, %v5705_v33  ;;  %v8195_v33 = vld [vmem:[#allocation12_spill] sm:$0xff] }
 0x32b   :  { %v2863_v24 = vpop.f32.mrf.mxu3 }
 0x32c   :  { %v3539_v10 = vadd.f32 %v3538_v40, %v3476_v31  ;;  %v3049_v62 = vadd.f32 %v2863_v24, %v2751_v44  ;;  %v2462_v40 = vadd.f32 %v6901_v27, %v8195_v33  ;;  %v4361_v31 = vld [vmem:[%s7734_s0 + $0x128] sm:$0xff]  ;;  %v8197_v24 = vld [vmem:[#allocation24_spill] sm:$0xff] }
 0x32d   :  { %4038 = vmatmul.msk.f32.gmra.mxu1 %vm389_vm2, %v5761_v54 }
 0x32e   :  { %v3345_v60 = vadd.f32 %v3159_v51, %v3049_v62  ;;  %4100 = vmatmul.msk.f32.gmra.mxu2 %vm389_vm2, %v4360_v39  ;;  %v2463_v62 = vadd.f32 %v6920_v43, %v8197_v24 }
 0x32f   :  { %v3162_v21 = vpop.f32.mrf.mxu0 }
 0x330   :  { %v3413_v23 = vadd.f32 %v6937_v22, %v3345_v60  ;;  %4166 = vmatmul.msk.f32.gmra.mxu3 %vm389_vm2, %v8196_v37  ;;  %v8199_v37 = vld [vmem:[#allocation46_spill] sm:$0xff] }
 0x331   :  { %v2568_v26 = vpop.f32.mrf.mxu2 }
 0x332   :  { %v3477_v9 = vmax.f32 %v3413_v23, 0.0  ;;  %v2752_v1 = vadd.f32 %v2568_v26, %v2462_v40  ;;  %v6988_v51 = vpop.f32.mrf.mxu1  ;;  %4232 = vmatmul.msk.f32.gmra.mxu0 %vm389_vm2, %v5724_v2  ;;  %v8198_v2 = vld [vmem:[#allocation32_spill] sm:$0xff] }
 0x333   :  { %v2866_v30 = vpop.f32.mrf.mxu3  ;;  %v4362_v26 = vld [vmem:[%s7734_s0 + $0x138] sm:$0xff] }
 0x334   :  { %v3540_v52 = vadd.f32 %v3539_v10, %v3477_v9  ;;  %v3050_v28 = vadd.f32 %v2866_v30, %v2752_v1  ;;  %v8200_v1 = vld [vmem:[#allocation34_spill] sm:$0xff] }
 0x335   :  { %4039 = vmatmul.msk.f32.gmra.mxu1 %vm389_vm2, %v5784_v32  ;;  %v2464_v30 = vadd.f32 %v6939_v53, %v8200_v1 }
 0x336   :  { %v3346_v27 = vadd.f32 %v3162_v21, %v3050_v28  ;;  %4101 = vmatmul.msk.f32.gmra.mxu2 %vm389_vm2, %v4361_v31 }
 0x337   :  { %v3165_v44 = vpop.f32.mrf.mxu0 }
 0x338   :  { %v3414_v42 = vadd.f32 %v6937_v22, %v3346_v27  ;;  %4167 = vmatmul.msk.f32.gmra.mxu3 %vm389_vm2, %v8198_v2  ;;  %v8202_v2 = vld [vmem:[#allocation51_spill] sm:$0xff] }
 0x339   :  { %v2571_v10 = vpop.f32.mrf.mxu2 }
 0x33a   :  { %v3478_v60 = vmax.f32 %v3414_v42, 0.0  ;;  %v2753_v39 = vadd.f32 %v2571_v10, %v2463_v62  ;;  %v7003_v33 = vpop.f32.mrf.mxu1  ;;  %4233 = vmatmul.msk.f32.gmra.mxu0 %vm389_vm2, %v5742_v38  ;;  %v8201_v38 = vld [vmem:[#allocation38_spill] sm:$0xff]  ;;  %v4363_v10 = vld [vmem:[%s7734_s0 + $0x140] sm:$0xff] }
 0x33b   :  { %v2869_v21 = vpop.f32.mrf.mxu3 }
 0x33c   :  { %v3541_v40 = vadd.f32 %v3540_v52, %v3478_v60  ;;  %v3051_v23 = vadd.f32 %v2869_v21, %v2753_v39  ;;  %v8203_v39 = vld [vmem:[#allocation19_spill] sm:$0xff] }
 0x33d   :  { %4040 = vmatmul.msk.f32.gmra.mxu1 %vm389_vm2, %v8199_v37  ;;  %v2465_v21 = vadd.f32 %v6955_v6, %v8203_v39  ;;  %v3634_v6 = vld [vmem:[%s7737_s3 + $0x68] sm:$0xff] }
 0x33e   :  { %v3347_v43 = vadd.f32 %v3165_v44, %v3051_v23  ;;  %4102 = vmatmul.msk.f32.gmra.mxu2 %vm389_vm2, %v4362_v26  ;;  %3648 = vmatpush.msrb.mxu1 %v3634_v6 }
 0x33f   :  { %v3168_v9 = vpop.f32.mrf.mxu0 }
 0x340   :  { %v3415_v28 = vadd.f32 %v6937_v22, %v3347_v43  ;;  %4168 = vmatmul.msk.f32.gmra.mxu3 %vm389_vm2, %v8201_v38  ;;  %v8205_v38 = vld [vmem:[#allocation114_spill] sm:$0xff] }
 0x341   :  { %v2574_v52 = vpop.f32.mrf.mxu2 }
 0x342   :  { %v3479_v27 = vmax.f32 %v3415_v28, 0.0  ;;  %v2754_v31 = vadd.f32 %v2574_v52, %v2464_v30  ;;  %v7018_v24 = vpop.f32.mrf.mxu1  ;;  %4234 = vmatmul.msk.f32.gmra.mxu0 %vm389_vm2, %v5761_v54  ;;  %v8204_v54 = vld [vmem:[#allocation43_spill] sm:$0xff] }
 0x343   :  { %v2872_v44 = vpop.f32.mrf.mxu3 }
 0x344   :  { %v3542_v62 = vadd.f32 %v3541_v40, %v3479_v27  ;;  %v3052_v42 = vadd.f32 %v2872_v44, %v2754_v31  ;;  %v4364_v27 = vld [vmem:[%s7734_s0 + $0x150] sm:$0xff] }
 0x345   :  { %4041 = vmatmul.msk.f32.gmra.mxu1 %vm389_vm2, %v8202_v2 }
 0x346   :  { %v3348_v53 = vadd.f32 %v3168_v9, %v3052_v42  ;;  %4103 = vmatmul.msk.f32.gmra.mxu2 %vm389_vm2, %v4363_v10  ;;  %v8207_v42 = vld [vmem:[#allocation49_spill] sm:$0xff] }
 0x347   :  { %v3171_v60 = vpop.f32.mrf.mxu0 }
 0x348   :  { %v3416_v23 = vadd.f32 %v6937_v22, %v3348_v53  ;;  %4169 = vmatmul.msk.f32.gmra.mxu3 %vm389_vm2, %v8204_v54 }
 0x349   :  { %v2577_v40 = vpop.f32.mrf.mxu2 }
 0x34a   :  { %v3480_v43 = vmax.f32 %v3416_v23, 0.0  ;;  %v2755_v26 = vadd.f32 %v2577_v40, %v2465_v21  ;;  %v7033_v1 = vpop.f32.mrf.mxu1  ;;  %4235 = vmatmul.msk.f32.gmra.mxu0 %vm389_vm2, %v5784_v32  ;;  %v8206_v32 = vld [vmem:[#allocation35_spill] sm:$0xff] }
 0x34b   :  { %v2875_v9 = vpop.f32.mrf.mxu3  ;;  %v2466_v44 = vadd.f32 %v6970_v41, %v8206_v32  ;;  %v4365_v41 = vld [vmem:[%s7734_s0 + $0x180] sm:$0xff] }
 0x34c   :  { %v3543_v30 = vadd.f32 %v3542_v62, %v3480_v43  ;;  %v3053_v28 = vadd.f32 %v2875_v9, %v2755_v26  ;;  %v2226_v40 = vrot.slane %v4365_v41, 2  ;;  %v7063_v43 = vld [vmem:[%s7734_s0 + $0x188] sm:$0xff] }
 0x34d   :  { %4042 = vmatmul.msk.f32.gmra.mxu1 %vm389_vm2, %v8205_v38  ;;  %v2227_v26 = vrot.slane %v7063_v43, 2 }
 0x34e   :  { %v3349_v52 = vadd.f32 %v3171_v60, %v3053_v28  ;;  %4104 = vmatmul.msk.f32.gmra.mxu2 %vm389_vm2, %v4364_v27  ;;  %v8208_v28 = vld [vmem:[#allocation45_spill] sm:$0xff]  ;;  %v8209_v27 = vld [vmem:[#allocation54_spill] sm:$0xff] }
 0x34f   :  { %v3174_v31 = vpop.f32.mrf.mxu0  ;;  %v2467_v6 = vadd.f32 %v6988_v51, %v8208_v28  ;;  %v8211_v28 = vld [vmem:[#allocation6_spill] sm:$0xff] }
 0x350   :  { %v3417_v62 = vadd.f32 %v6937_v22, %v3349_v52  ;;  %4170 = vmatmul.msk.f32.gmra.mxu3 %vm389_vm2, %v8207_v42 }
 0x351   :  { %v2580_v53 = vpop.f32.mrf.mxu2 }
 0x352   :  { %v3481_v10 = vmax.f32 %v3417_v62, 0.0  ;;  %v2756_v39 = vadd.f32 %v2580_v53, %v2466_v44  ;;  %v7051_v60 = vpop.f32.mrf.mxu1  ;;  %4236 = vmatmul.msk.f32.gmra.mxu0 %vm389_vm2, %v8199_v37  ;;  %v4367_v37 = vld [vmem:[%s7734_s0 + $0x158] sm:$0xff] }
 0x353   :  { %v2878_v21 = vpop.f32.mrf.mxu3 }
 0x354   :  { %v3544_v23 = vadd.f32 %v3543_v30, %v3481_v10  ;;  %v3054_v54 = vadd.f32 %v2878_v21, %v2756_v39  ;;  %v4368_v21 = vld [vmem:[%s7734_s0 + $0x168] sm:$0xff] }
 0x355   :  { %4043 = vmatmul.msk.f32.gmra.mxu1 %vm389_vm2, %v5891_v61 }
 0x356   :  { %v3350_v9 = vadd.f32 %v3174_v31, %v3054_v54  ;;  %4105 = vmatmul.msk.f32.gmra.mxu2 %vm389_vm2, %v4367_v37  ;;  %v2228_v31 = vsel %vm1071_vm3, %v2226_v40, %v2227_v26  ;;  %v4369_v54 = vld [vmem:[%s7734_s0 + $0x190] sm:$0x3]  ;;  %v8210_v37 = vld [vmem:[#allocation29_spill] sm:$0xff] }
 0x357   :  { %v3177_v30 = vpop.f32.mrf.mxu0  ;;  %v2229_v40 = vrot.slane %v4369_v54, 2 }
 0x358   :  { %v3418_v52 = vadd.f32 %v6937_v22, %v3350_v9  ;;  %4171 = vmatmul.msk.f32.gmra.mxu3 %vm389_vm2, %v8209_v27 }
 0x359   :  { %v2583_v32 = vpop.f32.mrf.mxu2 }
 0x35a   :  { %v3482_v44 = vmax.f32 %v3418_v52, 0.0  ;;  %v2757_v62 = vadd.f32 %v2583_v32, %v2467_v6  ;;  %v7075_v42 = vpop.f32.mrf.mxu1  ;;  %4237 = vmatmul.msk.f32.gmra.mxu0 %vm389_vm2, %v8202_v2  ;;  %v2468_v2 = vadd.f32 %v7003_v33, %v8210_v37  ;;  %v2230_v32 = vsel %vm1071_vm3, %v2227_v26, %v2229_v40  ;;  %v8213_v40 = vld [vmem:[#allocation9_spill] sm:$0xff] }
 0x35b   :  { %v2881_v53 = vpop.f32.mrf.mxu3 }
 0x35c   :  { %v3545_v10 = vadd.f32 %v3544_v23, %v3482_v44  ;;  %v3055_v39 = vadd.f32 %v2881_v53, %v2757_v62 }
 0x35d   :  { %4044 = vmatmul.msk.f32.gmra.mxu1 %vm389_vm2, %v2228_v31 }
 0x35e   :  { %v3351_v51 = vadd.f32 %v3177_v30, %v3055_v39  ;;  %4106 = vmatmul.msk.f32.gmra.mxu2 %vm389_vm2, %v4368_v21  ;;  %v4370_v39 = vld [vmem:[%s7734_s0 + $0x170] sm:$0xff]  ;;  %v8212_v21 = vld [vmem:[#allocation40_spill] sm:$0xff] }
 0x35f   :  { %v3180_v9 = vpop.f32.mrf.mxu0  ;;  %v2469_v54 = vadd.f32 %v7018_v24, %v8212_v21  ;;  %v3633_v24 = vld [vmem:[%s7737_s3 + $0x60] sm:$0xff] }
 0x360   :  { %v3419_v23 = vadd.f32 %v6937_v22, %v3351_v51  ;;  %4172 = vmatmul.msk.f32.gmra.mxu3 %vm389_vm2, %v8211_v28  ;;  %3649 = vmatpush.msrb.mxu1 %v3633_v24 }
 0x361   :  { %v2586_v30 = vpop.f32.mrf.mxu2 }
 0x362   :  { %v3483_v6 = vmax.f32 %v3419_v23, 0.0  ;;  %v2758_v52 = vadd.f32 %v2586_v30, %v2468_v2  ;;  %v7093_v27 = vpop.f32.mrf.mxu1  ;;  %4238 = vmatmul.msk.f32.gmra.mxu0 %vm389_vm2, %v8205_v38 }
 0x363   :  { %v2884_v44 = vpop.f32.mrf.mxu3 }
 0x364   :  { %v3546_v62 = vadd.f32 %v3545_v10, %v3483_v6  ;;  %v3056_v53 = vadd.f32 %v2884_v44, %v2758_v52  ;;  %v8214_v52 = vld [vmem:[#allocation113_spill] sm:$0xff] }
 0x365   :  { %4045 = vmatmul.msk.f32.gmra.mxu1 %vm389_vm2, %v2230_v32  ;;  %v2470_v44 = vadd.f32 %v7033_v1, %v8214_v52  ;;  %v73_v1 = vld [vmem:[%s7734_s0 + $0x1a0] sm:$0xff]  ;;  %v74_v52 = vld [vmem:[%s7734_s0 + $0x1a8] sm:$0x3] }
 0x366   :  { %v3352_v33 = vadd.f32 %v3180_v9, %v3056_v53  ;;  %4107 = vmatmul.msk.f32.gmra.mxu2 %vm389_vm2, %v4370_v39  ;;  %v3111_v24 = vrot.slane %v73_v1, 2 }
 0x367   :  { %v3183_v51 = vpop.f32.mrf.mxu0 }
 0x368   :  { %v3420_v26 = vadd.f32 %v6937_v22, %v3352_v33  ;;  %4173 = vmatmul.msk.f32.gmra.mxu3 %vm389_vm2, %v8213_v40 }
 0x369   :  { %v2589_v38 = vpop.f32.mrf.mxu2 }
 0x36a   :  { %v3484_v10 = vmax.f32 %v3420_v26, 0.0  ;;  %v2759_v37 = vadd.f32 %v2589_v38, %v2469_v54  ;;  %v7108_v2 = vpop.f32.mrf.mxu1  ;;  %4239 = vmatmul.msk.f32.gmra.mxu0 %vm389_vm2, %v5891_v61 }
 0x36b   :  { %v2887_v9 = vpop.f32.mrf.mxu3 }
 0x36c   :  { %v3547_v23 = vadd.f32 %v3546_v62, %v3484_v10  ;;  %v3057_v28 = vadd.f32 %v2887_v9, %v2759_v37 }
 0x36d   :  { %4046 = vmatmul.msk.f32.gmra.mxu1 %vm389_vm2, %v5960_v16 }
 0x36e   :  { %v3353_v30 = vadd.f32 %v3183_v51, %v3057_v28  ;;  %4108 = vmatmul.msk.f32.gmra.mxu2 %vm389_vm2, %v4365_v41 }
 0x36f   :  { %v3186_v6 = vpop.f32.mrf.mxu0 }
 0x370   :  { %v3421_v61 = vadd.f32 %v6937_v22, %v3353_v30  ;;  %4174 = vmatmul.msk.f32.gmra.mxu3 %vm389_vm2, %v5878_v17  ;;  %v72_v17 = vld [vmem:[%s7734_s0 + $0x198] sm:$0xff] }
 0x371   :  { %v2592_v62 = vpop.f32.mrf.mxu2  ;;  %v2814_v38 = vrot.slane %v72_v17, 1  ;;  %v3110_v28 = vrot.slane %v72_v17, 2 }
 0x372   :  { %v3485_v53 = vmax.f32 %v3421_v61, 0.0  ;;  %v2760_v33 = vadd.f32 %v2592_v62, %v2470_v44  ;;  %v7123_v39 = vpop.f32.mrf.mxu1  ;;  %4240 = vmatmul.msk.f32.gmra.mxu0 %vm389_vm2, %v2228_v31  ;;  %v8215_v31 = vld [vmem:[#allocation115_spill] sm:$0xff]  ;;  %v2472_v61 = vadd.f32 %v7075_v42, %v5900_v29 }
 0x373   :  { %v2890_v16 = vpop.f32.mrf.mxu3  ;;  %v2471_v26 = vadd.f32 %v7051_v60, %v8215_v31 }
 0x374   :  { %v3548_v51 = vadd.f32 %v3547_v23, %v3485_v53  ;;  %v3058_v41 = vadd.f32 %v2890_v16, %v2760_v33  ;;  %v2817_v33 = vrot.slane %v74_v52, 1 }
 0x375   :  { %4047 = vmatmul.msk.f32.gmra.mxu1 %vm389_vm2, %v5985_v19 }
 0x376   :  { %v3354_v21 = vadd.f32 %v3186_v6, %v3058_v41  ;;  %4109 = vmatmul.msk.f32.gmra.mxu2 %vm389_vm2, %v7063_v43  ;;  %v2815_v43 = vrot.slane %v73_v1, 1 }
 0x377   :  { %v3189_v54 = vpop.f32.mrf.mxu0 }
 0x378   :  { %v3422_v40 = vadd.f32 %v6937_v22, %v3354_v21  ;;  %4175 = vmatmul.msk.f32.gmra.mxu3 %vm389_vm2, %v5907_v55  ;;  %v2816_v60 = vsel %vm226_vm1, %v2814_v38, %v2815_v43  ;;  %v2818_v29 = vsel %vm226_vm1, %v2815_v43, %v2817_v33 }
 0x379   :  { %v2595_v19 = vpop.f32.mrf.mxu2 }
 0x37a   :  { %v3486_v10 = vmax.f32 %v3422_v40, 0.0  ;;  %v2761_v37 = vadd.f32 %v2595_v19, %v2471_v26  ;;  %v7141_v9 = vpop.f32.mrf.mxu1  ;;  %4241 = vmatmul.msk.f32.gmra.mxu0 %vm389_vm2, %v2230_v32  ;;  %v3112_v32 = vsel %vm1071_vm3, %v3110_v28, %v3111_v24  ;;  %v2473_v19 = vadd.f32 %v7093_v27, %v5924_v13  ;;  %v4371_v27 = vld [vmem:[%s7734_s0 + $0x1e0] sm:$0xff] }
 0x37b   :  { %v2893_v23 = vpop.f32.mrf.mxu3 }
 0x37c   :  { %v3549_v30 = vadd.f32 %v3548_v51, %v3486_v10  ;;  %v3059_v6 = vadd.f32 %v2893_v23, %v2761_v37 }
 0x37d   :  { %4048 = vmatmul.msk.f32.gmra.mxu1 %vm389_vm2, %v6009_v59 }
 0x37e   :  { %v3355_v55 = vadd.f32 %v3189_v54, %v3059_v6  ;;  %4110 = vmatmul.msk.f32.gmra.mxu2 %vm389_vm2, %v72_v17  ;;  %v3113_v17 = vrot.slane %v74_v52, 2 }
 0x37f   :  { %v3192_v44 = vpop.f32.mrf.mxu0 }
 0x380   :  { %v3423_v62 = vadd.f32 %v6937_v22, %v3355_v55  ;;  %4176 = vmatmul.msk.f32.gmra.mxu3 %vm389_vm2, %v2816_v60  ;;  %v3114_v40 = vsel %vm1071_vm3, %v3111_v24, %v3113_v17  ;;  %v3632_v24 = vld [vmem:[%s7737_s3 + $0x58] sm:$0xff]  ;;  %v2474_v60 = vadd.f32 %v7108_v2, %v5946_v18  ;;  %v4372_v2 = vld [vmem:[%s7734_s0 + $0x1e8] sm:$0xff] }
 0x381   :  { %v2598_v53 = vpop.f32.mrf.mxu2  ;;  %3650 = vmatpush.msrb.mxu1 %v3632_v24 }
 0x382   :  { %v3487_v16 = vmax.f32 %v3423_v62, 0.0  ;;  %v2762_v51 = vadd.f32 %v2598_v53, %v2472_v61  ;;  %v7156_v41 = vpop.f32.mrf.mxu1  ;;  %4242 = vmatmul.msk.f32.gmra.mxu0 %vm389_vm2, %v3112_v32 }
 0x383   :  { %v2896_v21 = vpop.f32.mrf.mxu3 }
 0x384   :  { %v3550_v54 = vadd.f32 %v3549_v30, %v3487_v16  ;;  %v3060_v31 = vadd.f32 %v2896_v21, %v2762_v51  ;;  %v8216_v16 = vld [vmem:[#allocation14_spill] sm:$0xff] }
 0x385   :  { %4049 = vmatmul.msk.f32.gmra.mxu1 %vm389_vm2, %v6034_v46  ;;  %v2475_v51 = vadd.f32 %v7123_v39, %v8216_v16 }
 0x386   :  { %v3356_v42 = vadd.f32 %v3192_v44, %v3060_v31  ;;  %4111 = vmatmul.msk.f32.gmra.mxu2 %vm389_vm2, %v73_v1 }
 0x387   :  { %v3195_v26 = vpop.f32.mrf.mxu0 }
 0x388   :  { %v3424_v38 = vadd.f32 %v6937_v22, %v3356_v42  ;;  %4177 = vmatmul.msk.f32.gmra.mxu3 %vm389_vm2, %v2818_v29 }
 0x389   :  { %v2601_v10 = vpop.f32.mrf.mxu2 }
 0x38a   :  { %v3488_v37 = vmax.f32 %v3424_v38, 0.0  ;;  %v2763_v23 = vadd.f32 %v2601_v10, %v2473_v19  ;;  %v7168_v28 = vpop.f32.mrf.mxu1  ;;  %4243 = vmatmul.msk.f32.gmra.mxu0 %vm389_vm2, %v3114_v40  ;;  %v4373_v19 = vld [vmem:[%s7734_s0 + $0x1f8] sm:$0xff]  ;;  %v8218_v10 = vld [vmem:[#allocation18_spill] sm:$0xff] }
 0x38b   :  { %v2899_v43 = vpop.f32.mrf.mxu3 }
 0x38c   :  { %v3551_v30 = vadd.f32 %v3550_v54, %v3488_v37  ;;  %v3061_v1 = vadd.f32 %v2899_v43, %v2763_v23  ;;  %v2476_v37 = vadd.f32 %v7141_v9, %v8218_v10 }
 0x38d   :  { %4050 = vmatmul.msk.f32.gmra.mxu1 %vm389_vm2, %v6058_v0 }
 0x38e   :  { %v3357_v13 = vadd.f32 %v3195_v26, %v3061_v1  ;;  %4112 = vmatmul.msk.f32.gmra.mxu2 %vm389_vm2, %v4371_v27 }
 0x38f   :  { %v3198_v6 = vpop.f32.mrf.mxu0 }
 0x390   :  { %v3425_v55 = vadd.f32 %v6937_v22, %v3357_v13  ;;  %4178 = vmatmul.msk.f32.gmra.mxu3 %vm389_vm2, %v8056_v56 }
 0x391   :  { %v2604_v52 = vpop.f32.mrf.mxu2 }
 0x392   :  { %v3489_v44 = vmax.f32 %v3425_v55, 0.0  ;;  %v2764_v32 = vadd.f32 %v2604_v52, %v2474_v60  ;;  %v7185_v61 = vpop.f32.mrf.mxu1  ;;  %4244 = vmatmul.msk.f32.gmra.mxu0 %vm389_vm2, %v6009_v59  ;;  %v8217_v59 = vld [vmem:[#allocation28_spill] sm:$0xff]  ;;  %v8220_v52 = vld [vmem:[#allocation23_spill] sm:$0xff] }
 0x393   :  { %v2902_v62 = vpop.f32.mrf.mxu3  ;;  %v4374_v60 = vld [vmem:[%s7734_s0 + $0x200] sm:$0xff] }
 0x394   :  { %v3552_v53 = vadd.f32 %v3551_v30, %v3489_v44  ;;  %v3062_v33 = vadd.f32 %v2902_v62, %v2764_v32  ;;  %v2477_v44 = vadd.f32 %v7156_v41, %v8220_v52  ;;  %v3631_v41 = vld [vmem:[%s7737_s3 + $0x50] sm:$0xff]  ;;  %v4377_v52 = vld [vmem:[%s7734_s0 + $0x228] sm:$0xff] }
 0x395   :  { %4051 = vmatmul.msk.f32.gmra.mxu1 %vm389_vm2, %v6083_v25 }
 0x396   :  { %v3358_v18 = vadd.f32 %v3198_v6, %v3062_v33  ;;  %4113 = vmatmul.msk.f32.gmra.mxu2 %vm389_vm2, %v4372_v2  ;;  %3651 = vmatpush.msrb.mxu1 %v3631_v41 }
 0x397   :  { %v3201_v56 = vpop.f32.mrf.mxu0 }
 0x398   :  { %v3426_v21 = vadd.f32 %v6937_v22, %v3358_v18  ;;  %4179 = vmatmul.msk.f32.gmra.mxu3 %vm389_vm2, %v8217_v59 }
 0x399   :  { %v2607_v17 = vpop.f32.mrf.mxu2 }
 0x39a   :  { %v3490_v54 = vmax.f32 %v3426_v21, 0.0  ;;  %v2765_v31 = vadd.f32 %v2607_v17, %v2475_v51  ;;  %v7200_v29 = vpop.f32.mrf.mxu1  ;;  %4245 = vmatmul.msk.f32.gmra.mxu0 %vm389_vm2, %v6034_v46  ;;  %v8219_v46 = vld [vmem:[#allocation33_spill] sm:$0xff]  ;;  %v4375_v21 = vld [vmem:[%s7734_s0 + $0x210] sm:$0xff] }
 0x39b   :  { %v2905_v42 = vpop.f32.mrf.mxu3 }
 0x39c   :  { %v3553_v26 = vadd.f32 %v3552_v53, %v3490_v54  ;;  %v3063_v40 = vadd.f32 %v2905_v42, %v2765_v31  ;;  %v8223_v31 = vld [vmem:[#allocation44_spill] sm:$0xff] }
 0x39d   :  { %4052 = vmatmul.msk.f32.gmra.mxu1 %vm389_vm2, %v6107_v20 }
 0x39e   :  { %v3359_v39 = vadd.f32 %v3201_v56, %v3063_v40  ;;  %4114 = vmatmul.msk.f32.gmra.mxu2 %vm389_vm2, %v4373_v19 }
 0x39f   :  { %v3204_v38 = vpop.f32.mrf.mxu0 }
 0x3a0   :  { %v3427_v23 = vadd.f32 %v6937_v22, %v3359_v39  ;;  %4180 = vmatmul.msk.f32.gmra.mxu3 %vm389_vm2, %v8219_v46  ;;  %v8224_v46 = vld [vmem:[#allocation117_spill] sm:$0xff] }
 0x3a1   :  { %v2610_v43 = vpop.f32.mrf.mxu2 }
 0x3a2   :  { %v3491_v30 = vmax.f32 %v3427_v23, 0.0  ;;  %v2766_v1 = vadd.f32 %v2610_v43, %v2476_v37  ;;  %v7215_v24 = vpop.f32.mrf.mxu1  ;;  %4246 = vmatmul.msk.f32.gmra.mxu0 %vm389_vm2, %v6058_v0  ;;  %v8221_v0 = vld [vmem:[#allocation39_spill] sm:$0xff]  ;;  %v2479_v43 = vadd.f32 %v7185_v61, %v8224_v46 }
 0x3a3   :  { %v2908_v13 = vpop.f32.mrf.mxu3  ;;  %v4376_v37 = vld [vmem:[%s7734_s0 + $0x218] sm:$0xff] }
 0x3a4   :  { %v3554_v27 = vadd.f32 %v3553_v26, %v3491_v30  ;;  %v3064_v6 = vadd.f32 %v2908_v13, %v2766_v1 }
 0x3a5   :  { %4053 = vmatmul.msk.f32.gmra.mxu1 %vm389_vm2, %v6132_v15 }
 0x3a6   :  { %v3360_v9 = vadd.f32 %v3204_v38, %v3064_v6  ;;  %4115 = vmatmul.msk.f32.gmra.mxu2 %vm389_vm2, %v4374_v60 }
 0x3a7   :  { %v3207_v55 = vpop.f32.mrf.mxu0 }
 0x3a8   :  { %v3428_v32 = vadd.f32 %v6937_v22, %v3360_v9  ;;  %4181 = vmatmul.msk.f32.gmra.mxu3 %vm389_vm2, %v8221_v0 }
 0x3a9   :  { %v2613_v62 = vpop.f32.mrf.mxu2 }
 0x3aa   :  { %v3492_v53 = vmax.f32 %v3428_v32, 0.0  ;;  %v2767_v33 = vadd.f32 %v2613_v62, %v2477_v44  ;;  %v7230_v18 = vpop.f32.mrf.mxu1  ;;  %4247 = vmatmul.msk.f32.gmra.mxu0 %vm389_vm2, %v6083_v25  ;;  %v8222_v25 = vld [vmem:[#allocation116_spill] sm:$0xff]  ;;  %v8226_v32 = vld [vmem:[#allocation118_spill] sm:$0xff] }
 0x3ab   :  { %v2911_v2 = vpop.f32.mrf.mxu3  ;;  %v2478_v17 = vadd.f32 %v7168_v28, %v8222_v25  ;;  %v2480_v0 = vadd.f32 %v7200_v29, %v8226_v32  ;;  %v8228_v25 = vld [vmem:[#allocation119_spill] sm:$0xff] }
 0x3ac   :  { %v3555_v56 = vadd.f32 %v3554_v27, %v3492_v53  ;;  %v3065_v16 = vadd.f32 %v2911_v2, %v2767_v33 }
 0x3ad   :  { %4054 = vmatmul.msk.f32.gmra.mxu1 %vm389_vm2, %v6156_v14 }
 0x3ae   :  { %v3361_v51 = vadd.f32 %v3207_v55, %v3065_v16  ;;  %4116 = vmatmul.msk.f32.gmra.mxu2 %vm389_vm2, %v4375_v21  ;;  %v4378_v21 = vld [vmem:[%s7734_s0 + $0x230] sm:$0xff] }
 0x3af   :  { %v3210_v59 = vpop.f32.mrf.mxu0 }
 0x3b0   :  { %v3429_v54 = vadd.f32 %v6937_v22, %v3361_v51  ;;  %4182 = vmatmul.msk.f32.gmra.mxu3 %vm389_vm2, %v8223_v31 }
 0x3b1   :  { %v2616_v42 = vpop.f32.mrf.mxu2 }
 0x3b2   :  { %v3493_v26 = vmax.f32 %v3429_v54, 0.0  ;;  %v2768_v40 = vadd.f32 %v2616_v42, %v2478_v17  ;;  %v7248_v39 = vpop.f32.mrf.mxu1  ;;  %4248 = vmatmul.msk.f32.gmra.mxu0 %vm389_vm2, %v6107_v20  ;;  %v8225_v20 = vld [vmem:[#allocation50_spill] sm:$0xff]  ;;  %v2481_v17 = vadd.f32 %v7215_v24, %v8228_v25 }
 0x3b3   :  { %v2914_v19 = vpop.f32.mrf.mxu3  ;;  %v3630_v24 = vld [vmem:[%s7737_s3 + $0x48] sm:$0xff] }
 0x3b4   :  { %v3556_v38 = vadd.f32 %v3555_v56, %v3493_v26  ;;  %v3066_v10 = vadd.f32 %v2914_v19, %v2768_v40  ;;  %3652 = vmatpush.msrb.mxu1 %v3630_v24  ;;  %v8236_v25 = vld [vmem:[#allocation122_spill] sm:$0xff]  ;;  %v4382_v24 = vld [vmem:[%s7734_s0 + $0x260] sm:$0xff] }
 0x3b5   :  { %4055 = vmatmul.msk.f32.gmra.mxu1 %vm389_vm2, %v6181_v45 }
 0x3b6   :  { %v3362_v28 = vadd.f32 %v3210_v59, %v3066_v10  ;;  %4117 = vmatmul.msk.f32.gmra.mxu2 %vm389_vm2, %v4376_v37 }
 0x3b7   :  { %v3213_v23 = vpop.f32.mrf.mxu0 }
 0x3b8   :  { %v3430_v30 = vadd.f32 %v6937_v22, %v3362_v28  ;;  %4183 = vmatmul.msk.f32.gmra.mxu3 %vm389_vm2, %v8225_v20  ;;  %v8230_v28 = vld [vmem:[#allocation125_spill] sm:$0xff] }
 0x3b9   :  { %v2619_v1 = vpop.f32.mrf.mxu2  ;;  %v8232_v20 = vld [vmem:[#allocation61_spill] sm:$0xff] }
 0x3ba   :  { %v3494_v13 = vmax.f32 %v3430_v30, 0.0  ;;  %v2769_v27 = vadd.f32 %v2619_v1, %v2479_v43  ;;  %v7263_v6 = vpop.f32.mrf.mxu1  ;;  %4249 = vmatmul.msk.f32.gmra.mxu0 %vm389_vm2, %v6132_v15  ;;  %v8227_v15 = vld [vmem:[#allocation55_spill] sm:$0xff] }
 0x3bb   :  { %v2917_v9 = vpop.f32.mrf.mxu3 }
 0x3bc   :  { %v3557_v60 = vadd.f32 %v3556_v38, %v3494_v13  ;;  %v3067_v55 = vadd.f32 %v2917_v9, %v2769_v27 }
 0x3bd   :  { %4056 = vmatmul.msk.f32.gmra.mxu1 %vm389_vm2, %v6205_v49 }
 0x3be   :  { %v3363_v61 = vadd.f32 %v3213_v23, %v3067_v55  ;;  %4118 = vmatmul.msk.f32.gmra.mxu2 %vm389_vm2, %v4377_v52  ;;  %v4379_v23 = vld [vmem:[%s7734_s0 + $0x240] sm:$0xff]  ;;  %v8233_v52 = vld [vmem:[#allocation70_spill] sm:$0xff] }
 0x3bf   :  { %v3216_v44 = vpop.f32.mrf.mxu0 }
 0x3c0   :  { %v3431_v62 = vadd.f32 %v6937_v22, %v3363_v61  ;;  %4184 = vmatmul.msk.f32.gmra.mxu3 %vm389_vm2, %v8227_v15 }
 0x3c1   :  { %v2622_v53 = vpop.f32.mrf.mxu2 }
 0x3c2   :  { %v3495_v33 = vmax.f32 %v3431_v62, 0.0  ;;  %v2770_v2 = vadd.f32 %v2622_v53, %v2480_v0  ;;  %v7278_v56 = vpop.f32.mrf.mxu1  ;;  %4250 = vmatmul.msk.f32.gmra.mxu0 %vm389_vm2, %v6156_v14  ;;  %v8229_v14 = vld [vmem:[#allocation58_spill] sm:$0xff]  ;;  %v8234_v0 = vld [vmem:[#allocation121_spill] sm:$0xff] }
 0x3c3   :  { %v2920_v16 = vpop.f32.mrf.mxu3  ;;  %v2483_v62 = vadd.f32 %v7248_v39, %v8234_v0  ;;  %v8241_v0 = vld [vmem:[#allocation10_spill] sm:$0xff] }
 0x3c4   :  { %v3558_v41 = vadd.f32 %v3557_v60, %v3495_v33  ;;  %v3068_v51 = vadd.f32 %v2920_v16, %v2770_v2 }
 0x3c5   :  { %4057 = vmatmul.msk.f32.gmra.mxu1 %vm389_vm2, %v6230_v36 }
 0x3c6   :  { %v3364_v29 = vadd.f32 %v3216_v44, %v3068_v51  ;;  %4119 = vmatmul.msk.f32.gmra.mxu2 %vm389_vm2, %v4378_v21  ;;  %v4380_v44 = vld [vmem:[%s7734_s0 + $0x248] sm:$0xff]  ;;  %v4381_v21 = vld [vmem:[%s7734_s0 + $0x258] sm:$0xff] }
 0x3c7   :  { %v3219_v59 = vpop.f32.mrf.mxu0 }
 0x3c8   :  { %v3432_v54 = vadd.f32 %v6937_v22, %v3364_v29  ;;  %4185 = vmatmul.msk.f32.gmra.mxu3 %vm389_vm2, %v8229_v14 }
 0x3c9   :  { %v2625_v31 = vpop.f32.mrf.mxu2 }
 0x3ca   :  { %v3496_v42 = vmax.f32 %v3432_v54, 0.0  ;;  %v2771_v26 = vadd.f32 %v2625_v31, %v2481_v17  ;;  %v7293_v40 = vpop.f32.mrf.mxu1  ;;  %4251 = vmatmul.msk.f32.gmra.mxu0 %vm389_vm2, %v6181_v45  ;;  %v8231_v45 = vld [vmem:[#allocation120_spill] sm:$0xff]  ;;  %v2484_v17 = vadd.f32 %v7263_v6, %v8236_v25 }
 0x3cb   :  { %v2923_v19 = vpop.f32.mrf.mxu3  ;;  %v2482_v43 = vadd.f32 %v7230_v18, %v8231_v45 }
 0x3cc   :  { %v3559_v38 = vadd.f32 %v3558_v41, %v3496_v42  ;;  %v3069_v10 = vadd.f32 %v2923_v19, %v2771_v26 }
 0x3cd   :  { %4058 = vmatmul.msk.f32.gmra.mxu1 %vm389_vm2, %v8230_v28 }
 0x3ce   :  { %v3365_v37 = vadd.f32 %v3219_v59, %v3069_v10  ;;  %4120 = vmatmul.msk.f32.gmra.mxu2 %vm389_vm2, %v4379_v23  ;;  %v8238_v23 = vld [vmem:[#allocation123_spill] sm:$0xff] }
 0x3cf   :  { %v3222_v46 = vpop.f32.mrf.mxu0 }
 0x3d0   :  { %v3433_v30 = vadd.f32 %v6937_v22, %v3365_v37  ;;  %4186 = vmatmul.msk.f32.gmra.mxu3 %vm389_vm2, %v8232_v20 }
 0x3d1   :  { %v2628_v1 = vpop.f32.mrf.mxu2 }
 0x3d2   :  { %v3497_v13 = vmax.f32 %v3433_v30, 0.0  ;;  %v2772_v27 = vadd.f32 %v2628_v1, %v2482_v43  ;;  %v7311_v9 = vpop.f32.mrf.mxu1  ;;  %4252 = vmatmul.msk.f32.gmra.mxu0 %vm389_vm2, %v6205_v49  ;;  %v8235_v49 = vld [vmem:[#allocation64_spill] sm:$0xff] }
 0x3d3   :  { %v2926_v60 = vpop.f32.mrf.mxu3 }
 0x3d4   :  { %v3560_v55 = vadd.f32 %v3559_v38, %v3497_v13  ;;  %v3070_v61 = vadd.f32 %v2926_v60, %v2772_v27 }
 0x3d5   :  { %4059 = vmatmul.msk.f32.gmra.mxu1 %vm389_vm2, %v8233_v52 }
 0x3d6   :  { %v3366_v18 = vadd.f32 %v3222_v46, %v3070_v61  ;;  %4121 = vmatmul.msk.f32.gmra.mxu2 %vm389_vm2, %v4380_v44  ;;  %v2485_v46 = vadd.f32 %v7278_v56, %v8238_v23  ;;  %v3629_v56 = vld [vmem:[%s7737_s3 + $0x40] sm:$0xff]  ;;  %v4383_v61 = vld [vmem:[%s7734_s0 + $0x270] sm:$0xff] }
 0x3d7   :  { %v3225_v32 = vpop.f32.mrf.mxu0  ;;  %3653 = vmatpush.msrb.mxu1 %v3629_v56  ;;  %v8248_v56 = vld [vmem:[#allocation72_spill] sm:$0xff] }
 0x3d8   :  { %v3434_v15 = vadd.f32 %v6937_v22, %v3366_v18  ;;  %4187 = vmatmul.msk.f32.gmra.mxu3 %vm389_vm2, %v8235_v49 }
 0x3d9   :  { %v2631_v53 = vpop.f32.mrf.mxu2 }
 0x3da   :  { %v3498_v33 = vmax.f32 %v3434_v15, 0.0  ;;  %v2773_v2 = vadd.f32 %v2631_v53, %v2483_v62  ;;  %v7326_v16 = vpop.f32.mrf.mxu1  ;;  %4253 = vmatmul.msk.f32.gmra.mxu0 %vm389_vm2, %v6230_v36  ;;  %v8237_v36 = vld [vmem:[#allocation67_spill] sm:$0xff] }
 0x3db   :  { %v2929_v41 = vpop.f32.mrf.mxu3 }
 0x3dc   :  { %v3561_v51 = vadd.f32 %v3560_v55, %v3498_v33  ;;  %v3071_v29 = vadd.f32 %v2929_v41, %v2773_v2 }
 0x3dd   :  { %4060 = vmatmul.msk.f32.gmra.mxu1 %vm389_vm2, %v6303_v8 }
 0x3de   :  { %v3367_v39 = vadd.f32 %v3225_v32, %v3071_v29  ;;  %4122 = vmatmul.msk.f32.gmra.mxu2 %vm389_vm2, %v4381_v21  ;;  %v4384_v29 = vld [vmem:[%s7734_s0 + $0x278] sm:$0xff]  ;;  %v8243_v21 = vld [vmem:[#allocation126_spill] sm:$0xff] }
 0x3df   :  { %v3228_v59 = vpop.f32.mrf.mxu0 }
 0x3e0   :  { %v3435_v54 = vadd.f32 %v6937_v22, %v3367_v39  ;;  %4188 = vmatmul.msk.f32.gmra.mxu3 %vm389_vm2, %v8237_v36 }
 0x3e1   :  { %v2634_v14 = vpop.f32.mrf.mxu2 }
 0x3e2   :  { %v3499_v31 = vmax.f32 %v3435_v54, 0.0  ;;  %v2774_v42 = vadd.f32 %v2634_v14, %v2484_v17  ;;  %v7341_v26 = vpop.f32.mrf.mxu1  ;;  %4254 = vmatmul.msk.f32.gmra.mxu0 %vm389_vm2, %v8230_v28  ;;  %v8239_v28 = vld [vmem:[#allocation7_spill] sm:$0xff] }
 0x3e3   :  { %v2932_v19 = vpop.f32.mrf.mxu3 }
 0x3e4   :  { %v3562_v38 = vadd.f32 %v3561_v51, %v3499_v31  ;;  %v3072_v10 = vadd.f32 %v2932_v19, %v2774_v42  ;;  %v8242_v51 = vld [vmem:[#allocation130_spill] sm:$0xff] }
 0x3e5   :  { %4061 = vmatmul.msk.f32.gmra.mxu1 %vm389_vm2, %v6328_v48 }
 0x3e6   :  { %v3368_v6 = vadd.f32 %v3228_v59, %v3072_v10  ;;  %4123 = vmatmul.msk.f32.gmra.mxu2 %vm389_vm2, %v4382_v24  ;;  %v2487_v59 = vadd.f32 %v7311_v9, %v8243_v21 }
 0x3e7   :  { %v3231_v37 = vpop.f32.mrf.mxu0 }
 0x3e8   :  { %v3436_v45 = vadd.f32 %v6937_v22, %v3368_v6  ;;  %4189 = vmatmul.msk.f32.gmra.mxu3 %vm389_vm2, %v8239_v28  ;;  %v8245_v6 = vld [vmem:[#allocation127_spill] sm:$0xff] }
 0x3e9   :  { %v2637_v43 = vpop.f32.mrf.mxu2  ;;  %v2488_v24 = vadd.f32 %v7326_v16, %v8245_v6 }
 0x3ea   :  { %v3500_v30 = vmax.f32 %v3436_v45, 0.0  ;;  %v2775_v20 = vadd.f32 %v2637_v43, %v2485_v46  ;;  %v7356_v1 = vpop.f32.mrf.mxu1  ;;  %4255 = vmatmul.msk.f32.gmra.mxu0 %vm389_vm2, %v8233_v52  ;;  %v8240_v52 = vld [vmem:[#allocation124_spill] sm:$0xff] }
 0x3eb   :  { %v2935_v13 = vpop.f32.mrf.mxu3  ;;  %v2486_v44 = vadd.f32 %v7293_v40, %v8240_v52 }
 0x3ec   :  { %v3563_v27 = vadd.f32 %v3562_v38, %v3500_v30  ;;  %v3073_v60 = vadd.f32 %v2935_v13, %v2775_v20  ;;  %v4385_v38 = vld [vmem:[%s7734_s0 + $0x288] sm:$0xff]  ;;  %v8247_v13 = vld [vmem:[#allocation132_spill] sm:$0xff] }
 0x3ed   :  { %4062 = vmatmul.msk.f32.gmra.mxu1 %vm389_vm2, %v6352_v57 }
 0x3ee   :  { %v3369_v55 = vadd.f32 %v3231_v37, %v3073_v60  ;;  %4124 = vmatmul.msk.f32.gmra.mxu2 %vm389_vm2, %v4383_v61 }
 0x3ef   :  { %v3234_v18 = vpop.f32.mrf.mxu0 }
 0x3f0   :  { %v3437_v32 = vadd.f32 %v6937_v22, %v3369_v55  ;;  %4190 = vmatmul.msk.f32.gmra.mxu3 %vm389_vm2, %v8241_v0  ;;  %v2489_v55 = vadd.f32 %v7341_v26, %v8248_v56  ;;  %v3628_v26 = vld [vmem:[%s7737_s3 + $0x38] sm:$0xff] }
 0x3f1   :  { %v2640_v62 = vpop.f32.mrf.mxu2  ;;  %3654 = vmatpush.msrb.mxu1 %v3628_v26 }
 0x3f2   :  { %v3501_v15 = vmax.f32 %v3437_v32, 0.0  ;;  %v2776_v49 = vadd.f32 %v2640_v62, %v2486_v44  ;;  %v7374_v53 = vpop.f32.mrf.mxu1  ;;  %4256 = vmatmul.msk.f32.gmra.mxu0 %vm389_vm2, %v6303_v8  ;;  %v8244_v8 = vld [vmem:[#allocation11_spill] sm:$0xff] }
 0x3f3   :  { %v2938_v33 = vpop.f32.mrf.mxu3 }
 0x3f4   :  { %v3564_v2 = vadd.f32 %v3563_v27, %v3501_v15  ;;  %v3074_v41 = vadd.f32 %v2938_v33, %v2776_v49  ;;  %v4386_v27 = vld [vmem:[%s7734_s0 + $0x290] sm:$0xff]  ;;  %v4387_v33 = vld [vmem:[%s7734_s0 + $0x2a0] sm:$0xff] }
 0x3f5   :  { %4063 = vmatmul.msk.f32.gmra.mxu1 %vm389_vm2, %v8242_v51 }
 0x3f6   :  { %v3370_v40 = vadd.f32 %v3234_v18, %v3074_v41  ;;  %4125 = vmatmul.msk.f32.gmra.mxu2 %vm389_vm2, %v4384_v29  ;;  %v8250_v41 = vld [vmem:[#allocation128_spill] sm:$0xff] }
 0x3f7   :  { %v3237_v39 = vpop.f32.mrf.mxu0  ;;  %v8251_v29 = vld [vmem:[#allocation20_spill] sm:$0xff] }
 0x3f8   :  { %v3438_v25 = vadd.f32 %v6937_v22, %v3370_v40  ;;  %4191 = vmatmul.msk.f32.gmra.mxu3 %vm389_vm2, %v8244_v8 }
 0x3f9   :  { %v2643_v17 = vpop.f32.mrf.mxu2 }
 0x3fa   :  { %v3502_v54 = vmax.f32 %v3438_v25, 0.0  ;;  %v2777_v36 = vadd.f32 %v2643_v17, %v2487_v59  ;;  %v7389_v14 = vpop.f32.mrf.mxu1  ;;  %4257 = vmatmul.msk.f32.gmra.mxu0 %vm389_vm2, %v6328_v48  ;;  %v8246_v48 = vld [vmem:[#allocation13_spill] sm:$0xff] }
 0x3fb   :  { %v2941_v31 = vpop.f32.mrf.mxu3 }
 0x3fc   :  { %v3565_v42 = vadd.f32 %v3564_v2, %v3502_v54  ;;  %v3075_v19 = vadd.f32 %v2941_v31, %v2777_v36  ;;  %v8252_v36 = vld [vmem:[#allocation134_spill] sm:$0xff] }
 0x3fd   :  { %4064 = vmatmul.msk.f32.gmra.mxu1 %vm389_vm2, %v6401_v50 }
 0x3fe   :  { %v3371_v9 = vadd.f32 %v3237_v39, %v3075_v19  ;;  %4126 = vmatmul.msk.f32.gmra.mxu2 %vm389_vm2, %v4385_v38 }
 0x3ff   :  { %v3240_v10 = vpop.f32.mrf.mxu0 }
 0x400   :  { %v3439_v37 = vadd.f32 %v6937_v22, %v3371_v9  ;;  %4192 = vmatmul.msk.f32.gmra.mxu3 %vm389_vm2, %v8246_v48  ;;  %v8254_v9 = vld [vmem:[#allocation25_spill] sm:$0xff]  ;;  %v7462_v48 = vld [vmem:[%s7736_s2] ss:$0 sm:$0xff] }
 0x401   :  { %v2646_v23 = vpop.f32.mrf.mxu2 }
 0x402   :  { %v3503_v46 = vmax.f32 %v3439_v37, 0.0  ;;  %v2778_v45 = vadd.f32 %v2646_v23, %v2488_v24  ;;  %v7404_v28 = vpop.f32.mrf.mxu1  ;;  %4258 = vmatmul.msk.f32.gmra.mxu0 %vm389_vm2, %v6352_v57  ;;  %v8249_v57 = vld [vmem:[#allocation15_spill] sm:$0xff]  ;;  %v8255_v37 = vld [vmem:[#allocation90_spill] sm:$0xff] }
 0x403   :  { %v2944_v43 = vpop.f32.mrf.mxu3 }
 0x404   :  { %v3566_v30 = vadd.f32 %v3565_v42, %v3503_v46  ;;  %v3076_v20 = vadd.f32 %v2944_v43, %v2778_v45  ;;  %v8253_v42 = vld [vmem:[#allocation129_spill] sm:$0xff]  ;;  %v4390_v46 = vld [vmem:[%s7734_s0 + $0x2b8] sm:$0xff] }
 0x405   :  { %4065 = vmatmul.msk.f32.gmra.mxu1 %vm389_vm2, %v8247_v13  ;;  %v2491_v19 = vadd.f32 %v7374_v53, %v8253_v42  ;;  %v8256_v43 = vld [vmem:[#allocation131_spill] sm:$0xff] }
 0x406   :  { %v3372_v16 = vadd.f32 %v3240_v10, %v3076_v20  ;;  %4127 = vmatmul.msk.f32.gmra.mxu2 %vm389_vm2, %v4386_v27 }
 0x407   :  { %v3243_v60 = vpop.f32.mrf.mxu0 }
 0x408   :  { %v3440_v61 = vadd.f32 %v6937_v22, %v3372_v16  ;;  %4193 = vmatmul.msk.f32.gmra.mxu3 %vm389_vm2, %v8249_v57 }
 0x409   :  { %v2649_v18 = vpop.f32.mrf.mxu2 }
 0x40a   :  { %v3504_v52 = vmax.f32 %v3440_v61, 0.0  ;;  %v2779_v44 = vadd.f32 %v2649_v18, %v2489_v55  ;;  %v7419_v32 = vpop.f32.mrf.mxu1  ;;  %4259 = vmatmul.msk.f32.gmra.mxu0 %vm389_vm2, %v8242_v51  ;;  %v2490_v51 = vadd.f32 %v7356_v1, %v8250_v41 }
 0x40b   :  { %v2947_v0 = vpop.f32.mrf.mxu3 }
 0x40c   :  { %v3567_v62 = vadd.f32 %v3566_v30, %v3504_v52  ;;  %v3077_v15 = vadd.f32 %v2947_v0, %v2779_v44  ;;  %v2492_v30 = vadd.f32 %v7389_v14, %v8256_v43  ;;  %v8258_v52 = vld [vmem:[#allocation137_spill] sm:$0xff] }
 0x40d   :  { %4066 = vmatmul.msk.f32.gmra.mxu1 %vm389_vm2, %v6450_v63  ;;  %v4391_v44 = vld [vmem:[%s7734_s0 + $0x2c0] sm:$0xff] }
 0x40e   :  { %v3373_v49 = vadd.f32 %v3243_v60, %v3077_v15  ;;  %4128 = vmatmul.msk.f32.gmra.mxu2 %vm389_vm2, %v4387_v33  ;;  %v8266_v43 = vld [vmem:[#allocation85_spill] sm:$0xff] }
 0x40f   :  { %v3246_v2 = vpop.f32.mrf.mxu0 }
 0x410   :  { %v3441_v40 = vadd.f32 %v6937_v22, %v3373_v49  ;;  %4194 = vmatmul.msk.f32.gmra.mxu3 %vm389_vm2, %v8251_v29  ;;  %v4388_v22 = vld [vmem:[%s7734_s0 + $0x2a8] sm:$0xff] }
 0x411   :  { %v2652_v39 = vpop.f32.mrf.mxu2 }
 0x412   :  { %v3505_v21 = vmax.f32 %v3441_v40, 0.0  ;;  %v2780_v59 = vadd.f32 %v2652_v39, %v2490_v51  ;;  %v7437_v25 = vpop.f32.mrf.mxu1  ;;  %4260 = vmatmul.msk.f32.gmra.mxu0 %vm389_vm2, %v6401_v50  ;;  %v8261_v39 = vld [vmem:[#allocation95_spill] sm:$0xff] }
 0x413   :  { %v2950_v8 = vpop.f32.mrf.mxu3 }
 0x414   :  { %v7441_v17 = vadd.f32 %v3567_v62, %v3505_v21  ;;  %v3078_v54 = vadd.f32 %v2950_v8, %v2780_v59  ;;  %v8259_v62 = vld [vmem:[#allocation80_spill] sm:$0xff]  ;;  %v4392_v59 = vld [vmem:[%s7734_s0 + $0x2d0] sm:$0xff] }
 0x415   :  { %4067 = vmatmul.msk.f32.gmra.mxu1 %vm389_vm2, %v8252_v36  ;;  %v2493_v15 = vadd.f32 %v7404_v28, %v8259_v62  ;;  %v3627_v28 = vld [vmem:[%s7737_s3 + $0x30] sm:$0xff] }
 0x416   :  { %v3374_v1 = vadd.f32 %v3246_v2, %v3078_v54  ;;  %4129 = vmatmul.msk.f32.gmra.mxu2 %vm389_vm2, %v4388_v22  ;;  %3655 = vmatpush.msrb.mxu1 %v3627_v28  ;;  %v8262_v54 = vld [vmem:[#allocation133_spill] sm:$0xff] }
 0x417   :  { %v3249_v31 = vpop.f32.mrf.mxu0  ;;  %v8263_v22 = vld [vmem:[#allocation41_spill] sm:$0xff] }
 0x418   :  { %4195 = vmatmul.msk.f32.gmra.mxu3 %vm389_vm2, %v8254_v9  ;;  %v3442_v53 = vadd.f32 %v7462_v48, %v3374_v1 }
 0x419   :  { %v2655_v50 = vpop.f32.mrf.mxu2 }
 0x41a   :  { %v2781_v38 = vadd.f32 %v2655_v50, %v2491_v19  ;;  %v7453_v10 = vpop.f32.mrf.mxu1  ;;  %4261 = vmatmul.msk.f32.gmra.mxu0 %vm389_vm2, %v8247_v13  ;;  %v8257_v13 = vld [vmem:[#allocation30_spill] sm:$0xff]  ;;  %v3506_v27 = vmax.f32 %v3442_v53, 0.0  ;;  %v8264_v50 = vld [vmem:[#allocation139_spill] sm:$0xff] }
 0x41b   :  { %v2953_v6 = vpop.f32.mrf.mxu3 }
 0x41c   :  { %v3079_v24 = vadd.f32 %v2953_v6, %v2781_v38 }
 0x41d   :  { %4068 = vmatmul.msk.f32.gmra.mxu1 %vm389_vm2, %v8255_v37 }
 0x41e   :  { %v3375_v23 = vadd.f32 %v3249_v31, %v3079_v24  ;;  %4130 = vmatmul.msk.f32.gmra.mxu2 %vm389_vm2, %v4390_v46  ;;  %v4393_v46 = vld [vmem:[%s7734_s0 + $0x2d8] sm:$0xff] }
 0x41f   :  { %v3252_v45 = vpop.f32.mrf.mxu0 }
 0x420   :  { %v3443_v20 = vadd.f32 %v7462_v48, %v3375_v23  ;;  %4196 = vmatmul.msk.f32.gmra.mxu3 %vm389_vm2, %v8257_v13  ;;  %v8265_v23 = vld [vmem:[#allocation140_spill] sm:$0xff] }
 0x421   :  { %v2658_v16 = vpop.f32.mrf.mxu2 }
 0x422   :  { %v3507_v60 = vmax.f32 %v3443_v20, 0.0  ;;  %v2782_v56 = vadd.f32 %v2658_v16, %v2492_v30  ;;  %v7474_v55 = vpop.f32.mrf.mxu1  ;;  %4262 = vmatmul.msk.f32.gmra.mxu0 %vm389_vm2, %v6450_v63  ;;  %v8260_v63 = vld [vmem:[#allocation36_spill] sm:$0xff]  ;;  %v8267_v20 = vld [vmem:[#allocation47_spill] sm:$0xff] }
 0x423   :  { %v2956_v61 = vpop.f32.mrf.mxu3 }
 0x424   :  { %v3575_v57 = vadd.f32 %v3507_v60, %v3506_v27  ;;  %v3080_v18 = vadd.f32 %v2956_v61, %v2782_v56  ;;  %v8268_v56 = vld [vmem:[#allocation141_spill] sm:$0xff] }
 0x425   :  { %4069 = vmatmul.msk.f32.gmra.mxu1 %vm389_vm2, %v8258_v52 }
 0x426   :  { %v3376_v14 = vadd.f32 %v3252_v45, %v3080_v18  ;;  %4131 = vmatmul.msk.f32.gmra.mxu2 %vm389_vm2, %v4391_v44  ;;  %v8269_v44 = vld [vmem:[#allocation100_spill] sm:$0xff] }
 0x427   :  { %v3255_v0 = vpop.f32.mrf.mxu0 }
 0x428   :  { %v3444_v26 = vadd.f32 %v7462_v48, %v3376_v14  ;;  %4197 = vmatmul.msk.f32.gmra.mxu3 %vm389_vm2, %v8260_v63  ;;  %v8271_v63 = vld [vmem:[#allocation52_spill] sm:$0xff] }
 0x429   :  { %v2661_v49 = vpop.f32.mrf.mxu2 }
 0x42a   :  { %v3508_v33 = vmax.f32 %v3444_v26, 0.0  ;;  %v2783_v2 = vadd.f32 %v2661_v49, %v2493_v15  ;;  %v7489_v41 = vpop.f32.mrf.mxu1  ;;  %4263 = vmatmul.msk.f32.gmra.mxu0 %vm389_vm2, %v8252_v36  ;;  %v2494_v36 = vadd.f32 %v7419_v32, %v8262_v54  ;;  %v8270_v15 = vld [vmem:[#allocation135_spill] sm:$0xff] }
 0x42b   :  { %v2959_v51 = vpop.f32.mrf.mxu3  ;;  %v4395_v54 = vld [vmem:[%s7734_s0 + $0x2f0] sm:$0xff] }
 0x42c   :  { %v3576_v40 = vadd.f32 %v3575_v57, %v3508_v33  ;;  %v3081_v29 = vadd.f32 %v2959_v51, %v2783_v2 }
 0x42d   :  { %4070 = vmatmul.msk.f32.gmra.mxu1 %vm389_vm2, %v8261_v39 }
 0x42e   :  { %v3377_v21 = vadd.f32 %v3255_v0, %v3081_v29  ;;  %4132 = vmatmul.msk.f32.gmra.mxu2 %vm389_vm2, %v4392_v59  ;;  %v4394_v0 = vld [vmem:[%s7734_s0 + $0x2e8] sm:$0xff] }
 0x42f   :  { %v3258_v8 = vpop.f32.mrf.mxu0 }
 0x430   :  { %v3445_v1 = vadd.f32 %v7462_v48, %v3377_v21  ;;  %4198 = vmatmul.msk.f32.gmra.mxu3 %vm389_vm2, %v8263_v22 }
 0x431   :  { %v2664_v31 = vpop.f32.mrf.mxu2 }
 0x432   :  { %v3509_v42 = vmax.f32 %v3445_v1, 0.0  ;;  %v2784_v19 = vadd.f32 %v2664_v31, %v2494_v36  ;;  %v2389_v9 = vpop.f32.mrf.mxu1  ;;  %4264 = vmatmul.msk.f32.gmra.mxu0 %vm389_vm2, %v8255_v37  ;;  %v2495_v37 = vadd.f32 %v7437_v25, %v8266_v43  ;;  %v8274_v1 = vld [vmem:[#allocation136_spill] sm:$0xff] }
 0x433   :  { %v7510_v38 = vadd.f32 %v2389_v9, %v8264_v50  ;;  %v2962_v6 = vpop.f32.mrf.mxu3  ;;  %v8275_v31 = vld [vmem:[#allocation56_spill] sm:$0xff] }
 0x434   :  { %v3577_v24 = vadd.f32 %v3576_v40, %v3509_v42  ;;  %v3082_v53 = vadd.f32 %v2962_v6, %v2784_v19  ;;  %v8272_v40 = vld [vmem:[#allocation75_spill] sm:$0xff]  ;;  %v8276_v6 = vld [vmem:[#allocation77_spill] sm:$0xff] }
 0x435   :  { %4071 = vmatmul.msk.f32.gmra.mxu1 %vm389_vm2, %v8265_v23 }
 0x436   :  { %v3378_v32 = vadd.f32 %v3258_v8, %v3082_v53  ;;  %4133 = vmatmul.msk.f32.gmra.mxu2 %vm389_vm2, %v4393_v46  ;;  %v8273_v8 = vld [vmem:[#allocation103_spill] sm:$0xff] }
 0x437   :  { %v3261_v45 = vpop.f32.mrf.mxu0 }
 0x438   :  { %v3446_v30 = vadd.f32 %v7462_v48, %v3378_v32  ;;  %4199 = vmatmul.msk.f32.gmra.mxu3 %vm389_vm2, %v8267_v20 }
 0x439   :  { %v2667_v13 = vpop.f32.mrf.mxu2 }
 0x43a   :  { %v3510_v16 = vmax.f32 %v3446_v30, 0.0  ;;  %v2785_v27 = vadd.f32 %v2667_v13, %v2495_v37  ;;  %v2392_v60 = vpop.f32.mrf.mxu1  ;;  %4265 = vmatmul.msk.f32.gmra.mxu0 %vm389_vm2, %v8258_v52  ;;  %v2496_v52 = vadd.f32 %v7453_v10, %v8270_v15  ;;  %v4396_v37 = vld [vmem:[%s7734_s0 + $0x300] sm:$0xff]  ;;  %v8278_v30 = vld [vmem:[#allocation138_spill] sm:$0xff] }
 0x43b   :  { %v7526_v61 = vadd.f32 %v2392_v60, %v8268_v56  ;;  %v2965_v57 = vpop.f32.mrf.mxu3  ;;  %v2498_v20 = vadd.f32 %v7489_v41, %v8278_v30  ;;  %v4397_v41 = vld [vmem:[%s7734_s0 + $0x330] sm:$0xff] }
 0x43c   :  { %v3578_v18 = vadd.f32 %v3577_v24, %v3510_v16  ;;  %v3083_v14 = vadd.f32 %v2965_v57, %v2785_v27  ;;  %v8279_v16 = vld [vmem:[#allocation59_spill] sm:$0xff]  ;;  %v2231_v15 = vrot.slane %v4397_v41, 2 }
 0x43d   :  { %4072 = vmatmul.msk.f32.gmra.mxu1 %vm389_vm2, %v8269_v44 }
 0x43e   :  { %v3379_v25 = vadd.f32 %v3261_v45, %v3083_v14  ;;  %4134 = vmatmul.msk.f32.gmra.mxu2 %vm389_vm2, %v4394_v0  ;;  %v8277_v45 = vld [vmem:[#allocation106_spill] sm:$0xff] }
 0x43f   :  { %v3264_v62 = vpop.f32.mrf.mxu0 }
 0x440   :  { %v3447_v26 = vadd.f32 %v7462_v48, %v3379_v25  ;;  %4200 = vmatmul.msk.f32.gmra.mxu3 %vm389_vm2, %v8271_v63  ;;  %v4399_v63 = vld [vmem:[%s7734_s0 + $0x308] sm:$0xff] }
 0x441   :  { %v2670_v49 = vpop.f32.mrf.mxu2 }
 0x442   :  { %v3511_v33 = vmax.f32 %v3447_v26, 0.0  ;;  %v2786_v2 = vadd.f32 %v2670_v49, %v2496_v52  ;;  %v2395_v51 = vpop.f32.mrf.mxu1  ;;  %4266 = vmatmul.msk.f32.gmra.mxu0 %vm389_vm2, %v8261_v39  ;;  %v2497_v39 = vadd.f32 %v7474_v55, %v8274_v1  ;;  %v3626_v55 = vld [vmem:[%s7737_s3 + $0x28] sm:$0xff]  ;;  %v7587_v52 = vld [vmem:[%s7734_s0 + $0x338] sm:$0xff] }
 0x443   :  { %v7542_v29 = vadd.f32 %v2395_v51, %v8272_v40  ;;  %v2968_v28 = vpop.f32.mrf.mxu3  ;;  %3656 = vmatpush.msrb.mxu1 %v3626_v55 }
 0x444   :  { %v3579_v21 = vadd.f32 %v3578_v18, %v3511_v33  ;;  %v3084_v59 = vadd.f32 %v2968_v28, %v2786_v2  ;;  %v8280_v18 = vld [vmem:[#allocation79_spill] sm:$0xff]  ;;  %v8281_v2 = vld [vmem:[#allocation62_spill] sm:$0xff] }
 0x445   :  { %4073 = vmatmul.msk.f32.gmra.mxu1 %vm389_vm2, %v8273_v8 }
 0x446   :  { %v3380_v10 = vadd.f32 %v3264_v62, %v3084_v59  ;;  %4135 = vmatmul.msk.f32.gmra.mxu2 %vm389_vm2, %v4395_v54 }
 0x447   :  { %v3267_v36 = vpop.f32.mrf.mxu0 }
 0x448   :  { %v3448_v22 = vadd.f32 %v7462_v48, %v3380_v10  ;;  %4201 = vmatmul.msk.f32.gmra.mxu3 %vm389_vm2, %v8275_v31 }
 0x449   :  { %v2673_v42 = vpop.f32.mrf.mxu2 }
 0x44a   :  { %v3512_v19 = vmax.f32 %v3448_v22, 0.0  ;;  %v2787_v9 = vadd.f32 %v2673_v42, %v2497_v39  ;;  %v2398_v50 = vpop.f32.mrf.mxu1  ;;  %4267 = vmatmul.msk.f32.gmra.mxu0 %vm389_vm2, %v8265_v23  ;;  %v4400_v22 = vld [vmem:[%s7734_s0 + $0x318] sm:$0xff]  ;;  %v8282_v42 = vld [vmem:[#allocation65_spill] sm:$0xff] }
 0x44b   :  { %v7558_v24 = vadd.f32 %v2398_v50, %v8276_v6  ;;  %v2971_v53 = vpop.f32.mrf.mxu3 }
 0x44c   :  { %v3580_v32 = vadd.f32 %v3579_v21, %v3512_v19  ;;  %v3085_v46 = vadd.f32 %v2971_v53, %v2787_v9 }
 0x44d   :  { %4074 = vmatmul.msk.f32.gmra.mxu1 %vm389_vm2, %v8277_v45 }
 0x44e   :  { %v3381_v43 = vadd.f32 %v3267_v36, %v3085_v46  ;;  %4136 = vmatmul.msk.f32.gmra.mxu2 %vm389_vm2, %v4396_v37 }
 0x44f   :  { %v3270_v23 = vpop.f32.mrf.mxu0 }
 0x450   :  { %v3449_v13 = vadd.f32 %v7462_v48, %v3381_v43  ;;  %4202 = vmatmul.msk.f32.gmra.mxu3 %vm389_vm2, %v8279_v16 }
 0x451   :  { %v2676_v27 = vpop.f32.mrf.mxu2 }
 0x452   :  { %v3513_v60 = vmax.f32 %v3449_v13, 0.0  ;;  %v2788_v56 = vadd.f32 %v2676_v27, %v2498_v20  ;;  %v2401_v57 = vpop.f32.mrf.mxu1  ;;  %4268 = vmatmul.msk.f32.gmra.mxu0 %vm389_vm2, %v8269_v44  ;;  %v2232_v44 = vrot.slane %v7587_v52, 2  ;;  %v8283_v20 = vld [vmem:[#allocation68_spill] sm:$0xff]  ;;  %v8284_v27 = vld [vmem:[#allocation82_spill] sm:$0xff] }
 0x453   :  { %v7577_v14 = vadd.f32 %v2401_v57, %v8280_v18  ;;  %v2974_v25 = vpop.f32.mrf.mxu3 }
 0x454   :  { %v3581_v0 = vadd.f32 %v3580_v32, %v3513_v60  ;;  %v3086_v62 = vadd.f32 %v2974_v25, %v2788_v56  ;;  %v2233_v59 = vsel %vm1071_vm3, %v2231_v15, %v2232_v44  ;;  %v3625_v25 = vld [vmem:[%s7737_s3 + $0x20] sm:$0xff]  ;;  %v8285_v15 = vld [vmem:[#allocation142_spill] sm:$0xff] }
 0x455   :  { %4075 = vmatmul.msk.f32.gmra.mxu1 %vm389_vm2, %v6667_v34 }
 0x456   :  { %v3382_v26 = vadd.f32 %v3270_v23, %v3086_v62  ;;  %4137 = vmatmul.msk.f32.gmra.mxu2 %vm389_vm2, %v4399_v63  ;;  %v4402_v23 = vld [vmem:[%s7734_s0 + $0x320] sm:$0xff]  ;;  %3657 = vmatpush.msrb.mxu1 %v3625_v25 }
 0x457   :  { %v3273_v49 = vpop.f32.mrf.mxu0 }
 0x458   :  { %v3450_v33 = vadd.f32 %v7462_v48, %v3382_v26  ;;  %4203 = vmatmul.msk.f32.gmra.mxu3 %vm389_vm2, %v8281_v2 }
 0x459   :  { %v2679_v51 = vpop.f32.mrf.mxu2 }
 0x45a   :  { %v3514_v40 = vmax.f32 %v3450_v33, 0.0  ;;  %v2789_v28 = vadd.f32 %v2679_v51, %v7510_v38  ;;  %v2404_v21 = vpop.f32.mrf.mxu1  ;;  %4269 = vmatmul.msk.f32.gmra.mxu0 %vm389_vm2, %v8273_v8  ;;  %v4401_v38 = vld [vmem:[%s7734_s0 + $0x340] sm:$0x3] }
 0x45b   :  { %v7602_v10 = vadd.f32 %v2404_v21, %v6671_v58  ;;  %v2977_v54 = vpop.f32.mrf.mxu3  ;;  %v2234_v8 = vrot.slane %v4401_v38, 2 }
 0x45c   :  { %v3582_v36 = vadd.f32 %v3581_v0, %v3514_v40  ;;  %v3087_v1 = vadd.f32 %v2977_v54, %v2789_v28  ;;  %v126_v28 = vld [vmem:[%s7734_s0 + $0x348] sm:$0xff] }
 0x45d   :  { %4076 = vmatmul.msk.f32.gmra.mxu1 %vm389_vm2, %v2233_v59  ;;  %v2235_v53 = vsel %vm1071_vm3, %v2232_v44, %v2234_v8  ;;  %v8287_v54 = vld [vmem:[#allocation109_spill] sm:$0xff]  ;;  %v8288_v8 = vld [vmem:[#allocation84_spill] sm:$0xff] }
 0x45e   :  { %v3383_v39 = vadd.f32 %v3273_v49, %v3087_v1  ;;  %4138 = vmatmul.msk.f32.gmra.mxu2 %vm389_vm2, %v4400_v22  ;;  %v8286_v49 = vld [vmem:[#allocation71_spill] sm:$0xff]  ;;  %v2819_v1 = vrot.slane %v126_v28, 1 }
 0x45f   :  { %v3276_v31 = vpop.f32.mrf.mxu0 }
 0x460   :  { %v3451_v58 = vadd.f32 %v7462_v48, %v3383_v39  ;;  %4204 = vmatmul.msk.f32.gmra.mxu3 %vm389_vm2, %v8282_v42  ;;  %v3115_v42 = vrot.slane %v126_v28, 2 }
 0x461   :  { %v2682_v19 = vpop.f32.mrf.mxu2 }
 0x462   :  { %v3515_v9 = vmax.f32 %v3451_v58, 0.0  ;;  %v2790_v50 = vadd.f32 %v2682_v19, %v7526_v61  ;;  %v2407_v6 = vpop.f32.mrf.mxu1  ;;  %4270 = vmatmul.msk.f32.gmra.mxu0 %vm389_vm2, %v8277_v45 }
 0x463   :  { %v7620_v32 = vadd.f32 %v2407_v6, %v6685_v4  ;;  %v2980_v46 = vpop.f32.mrf.mxu3 }
 0x464   :  { %v3583_v55 = vadd.f32 %v3582_v36, %v3515_v9  ;;  %v3088_v43 = vadd.f32 %v2980_v46, %v2790_v50 }
 0x465   :  { %4077 = vmatmul.msk.f32.gmra.mxu1 %vm389_vm2, %v2235_v53 }
 0x466   :  { %v3384_v37 = vadd.f32 %v3276_v31, %v3088_v43  ;;  %4139 = vmatmul.msk.f32.gmra.mxu2 %vm389_vm2, %v4402_v23 }
 0x467   :  { %v3279_v61 = vpop.f32.mrf.mxu0 }
 0x468   :  { %v3452_v30 = vadd.f32 %v7462_v48, %v3384_v37  ;;  %4205 = vmatmul.msk.f32.gmra.mxu3 %vm389_vm2, %v8283_v20 }
 0x469   :  { %v2685_v4 = vpop.f32.mrf.mxu2 }
 0x46a   :  { %v3516_v45 = vmax.f32 %v3452_v30, 0.0  ;;  %v2791_v13 = vadd.f32 %v2685_v4, %v7542_v29  ;;  %v2410_v16 = vpop.f32.mrf.mxu1  ;;  %4271 = vmatmul.msk.f32.gmra.mxu0 %vm389_vm2, %v6667_v34  ;;  %v8289_v4 = vld [vmem:[#allocation73_spill] sm:$0xff] }
 0x46b   :  { %v7634_v60 = vadd.f32 %v2410_v16, %v8284_v27  ;;  %v2983_v56 = vpop.f32.mrf.mxu3 }
 0x46c   :  { %v3584_v57 = vadd.f32 %v3583_v55, %v3516_v45  ;;  %v3089_v18 = vadd.f32 %v2983_v56, %v2791_v13 }
 0x46e   :  { %v3385_v0 = vadd.f32 %v3279_v61, %v3089_v18  ;;  %4140 = vmatmul.msk.f32.gmra.mxu2 %vm389_vm2, %v4397_v41 }
 0x46f   :  { %v3282_v62 = vpop.f32.mrf.mxu0 }
 0x470   :  { %v3453_v29 = vadd.f32 %v7462_v48, %v3385_v0  ;;  %4206 = vmatmul.msk.f32.gmra.mxu3 %vm389_vm2, %v8285_v15 }
 0x471   :  { %v2688_v34 = vpop.f32.mrf.mxu2 }
 0x472   :  { %v3517_v44 = vmax.f32 %v3453_v29, 0.0  ;;  %v2792_v26 = vadd.f32 %v2688_v34, %v7558_v24  ;;  %v2413_v63 = vpop.f32.mrf.mxu1  ;;  %4272 = vmatmul.msk.f32.gmra.mxu0 %vm389_vm2, %v2233_v59  ;;  %v127_v24 = vld [vmem:[%s7734_s0 + $0x350] sm:$0xff] }
 0x473   :  { %v7646_v33 = vadd.f32 %v2413_v63, %v8286_v49  ;;  %v2986_v2 = vpop.f32.mrf.mxu3  ;;  %v2820_v39 = vrot.slane %v127_v24, 1  ;;  %v3116_v19 = vrot.slane %v127_v24, 2 }
 0x474   :  { %v3585_v51 = vadd.f32 %v3584_v57, %v3517_v44  ;;  %v3090_v40 = vadd.f32 %v2986_v2, %v2792_v26  ;;  %v8290_v44 = vld [vmem:[#allocation16_spill] sm:$0xff] }
 0x475   :  { %v2821_v6 = vsel %vm226_vm1, %v2819_v1, %v2820_v39 }
 0x476   :  { %v3386_v41 = vadd.f32 %v3282_v62, %v3090_v40  ;;  %4141 = vmatmul.msk.f32.gmra.mxu2 %vm389_vm2, %v7587_v52 }
 0x477   :  { %v3285_v21 = vpop.f32.mrf.mxu0 }
 0x478   :  { %v3454_v59 = vadd.f32 %v7462_v48, %v3386_v41  ;;  %4207 = vmatmul.msk.f32.gmra.mxu3 %vm389_vm2, %v8287_v54 }
 0x479   :  { %v2691_v36 = vpop.f32.mrf.mxu2 }
 0x47a   :  { %v3518_v22 = vmax.f32 %v3454_v59, 0.0  ;;  %v2793_v52 = vadd.f32 %v2691_v36, %v7577_v14  ;;  %v2416_v38 = vpop.f32.mrf.mxu1  ;;  %4273 = vmatmul.msk.f32.gmra.mxu0 %vm389_vm2, %v2235_v53  ;;  %v128_v14 = vld [vmem:[%s7734_s0 + $0x358] sm:$0x3]  ;;  %v3117_v53 = vsel %vm1071_vm3, %v3115_v42, %v3116_v19 }
 0x47b   :  { %v7662_v31 = vadd.f32 %v2416_v38, %v8288_v8  ;;  %v2989_v58 = vpop.f32.mrf.mxu3  ;;  %v2822_v23 = vrot.slane %v128_v14, 1  ;;  %v3118_v16 = vrot.slane %v128_v14, 2 }
 0x47c   :  { %v3586_v9 = vadd.f32 %v3585_v51, %v3518_v22  ;;  %v3091_v50 = vadd.f32 %v2989_v58, %v2793_v52  ;;  %v3624_v51 = vld [vmem:[%s7737_s3 + $0x18] sm:$0xff] }
 0x47d   :  { %v2823_v57 = vsel %vm226_vm1, %v2820_v39, %v2822_v23  ;;  %v3119_v0 = vsel %vm1071_vm3, %v3116_v19, %v3118_v16  ;;  %3658 = vmatpush.msrb.mxu1 %v3624_v51 }
 0x47e   :  { %v3387_v46 = vadd.f32 %v3285_v21, %v3091_v50  ;;  %4142 = vmatmul.msk.f32.gmra.mxu2 %vm389_vm2, %v126_v28 }
 0x47f   :  { %v3288_v55 = vpop.f32.mrf.mxu0 }
 0x480   :  { %v3455_v43 = vadd.f32 %v7462_v48, %v3387_v46  ;;  %4208 = vmatmul.msk.f32.gmra.mxu3 %vm389_vm2, %v2821_v6 }
 0x481   :  { %v2694_v37 = vpop.f32.mrf.mxu2 }
 0x482   :  { %v3519_v61 = vmax.f32 %v3455_v43, 0.0  ;;  %v2794_v30 = vadd.f32 %v2694_v37, %v7602_v10  ;;  %v2419_v20 = vpop.f32.mrf.mxu1  ;;  %4274 = vmatmul.msk.f32.gmra.mxu0 %vm389_vm2, %v3117_v53 }
 0x483   :  { %v2509_v45 = vadd.f32 %v2419_v20, %v8289_v4  ;;  %v2992_v13 = vpop.f32.mrf.mxu3 }
 0x484   :  { %v3587_v27 = vadd.f32 %v3586_v9, %v3519_v61  ;;  %v3092_v56 = vadd.f32 %v2992_v13, %v2794_v30 }
 0x486   :  { %v3388_v18 = vadd.f32 %v3288_v55, %v3092_v56  ;;  %4143 = vmatmul.msk.f32.gmra.mxu2 %vm389_vm2, %v127_v24 }
 0x487   :  { %v3291_v25 = vpop.f32.mrf.mxu0 }
 0x488   :  { %v3456_v62 = vadd.f32 %v7462_v48, %v3388_v18  ;;  %4209 = vmatmul.msk.f32.gmra.mxu3 %vm389_vm2, %v2823_v57  ;;  %v3623_v57 = vld [vmem:[%s7737_s3 + $0x10] sm:$0xff] }
 0x489   :  { %v2697_v10 = vpop.f32.mrf.mxu2  ;;  %3659 = vmatpush.msrb.mxu1 %v3623_v57 }
 0x48a   :  { %v3520_v29 = vmax.f32 %v3456_v62, 0.0  ;;  %v2795_v15 = vadd.f32 %v2697_v10, %v7620_v32  ;;  %v2422_v34 = vpop.f32.mrf.mxu1  ;;  %4275 = vmatmul.msk.f32.gmra.mxu0 %vm389_vm2, %v3119_v0 }
 0x48b   :  { %v2510_v26 = vadd.f32 %v2422_v34, %v8290_v44  ;;  %v2995_v63 = vpop.f32.mrf.mxu3 }
 0x48c   :  { %v3588_v49 = vadd.f32 %v3587_v27, %v3520_v29  ;;  %v3093_v2 = vadd.f32 %v2995_v63, %v2795_v15 }
 0x48e   :  { %v3389_v40 = vadd.f32 %v3291_v25, %v3093_v2 }
 0x48f   :  { %v3294_v41 = vpop.f32.mrf.mxu0 }
 0x490   :  { %v3457_v28 = vadd.f32 %v7462_v48, %v3389_v40 }
 0x491   :  { %v2700_v24 = vpop.f32.mrf.mxu2 }
 0x492   :  { %v3521_v21 = vmax.f32 %v3457_v28, 0.0  ;;  %v2796_v32 = vadd.f32 %v2700_v24, %v7634_v60  ;;  %v2425_v46 = vpop.f32.mrf.mxu1 }
 0x493   :  { %v2998_v59 = vpop.f32.mrf.mxu3 }
 0x494   :  { %v3589_v54 = vadd.f32 %v3588_v49, %v3521_v21  ;;  %v3094_v36 = vadd.f32 %v2998_v59, %v2796_v32  ;;  %v8291_v49 = vld [vmem:[#allocation87_spill] sm:$0xff] }
 0x495   :  { %v2511_v2 = vadd.f32 %v2425_v46, %v8291_v49 }
 0x496   :  { %v3390_v1 = vadd.f32 %v3294_v41, %v3094_v36 }
 0x497   :  { %v3297_v39 = vpop.f32.mrf.mxu0 }
 0x498   :  { %v3458_v22 = vadd.f32 %v7462_v48, %v3390_v1 }
 0x499   :  { %v2703_v52 = vpop.f32.mrf.mxu2 }
 0x49a   :  { %v3522_v38 = vmax.f32 %v3458_v22, 0.0  ;;  %v2797_v8 = vadd.f32 %v2703_v52, %v7646_v33  ;;  %v2428_v13 = vpop.f32.mrf.mxu1 }
 0x49b   :  { %v3001_v58 = vpop.f32.mrf.mxu3 }
 0x49c   :  { %v3590_v42 = vadd.f32 %v3589_v54, %v3522_v38  ;;  %v3095_v19 = vadd.f32 %v3001_v58, %v2797_v8 }
 0x49e   :  { %v3391_v9 = vadd.f32 %v3297_v39, %v3095_v19 }
 0x49f   :  { %v3300_v50 = vpop.f32.mrf.mxu0 }
 0x4a0   :  { %v3459_v6 = vadd.f32 %v7462_v48, %v3391_v9 }
 0x4a1   :  { %v2706_v60 = vpop.f32.mrf.mxu2 }
 0x4a2   :  { %v3523_v14 = vmax.f32 %v3459_v6, 0.0  ;;  %v2798_v55 = vadd.f32 %v2706_v60, %v7662_v31 }
 0x4a3   :  { %v3004_v53 = vpop.f32.mrf.mxu3 }
 0x4a4   :  { %v3591_v43 = vadd.f32 %v3590_v42, %v3523_v14  ;;  %v3096_v37 = vadd.f32 %v3004_v53, %v2798_v55 }
 0x4a6   :  { %v3392_v23 = vadd.f32 %v3300_v50, %v3096_v37  ;;  %v8293_v50 = vld [vmem:[#allocation21_spill] sm:$0xff] }
 0x4a7   :  { %v3303_v61 = vpop.f32.mrf.mxu0 }
 0x4a8   :  { %v3460_v30 = vadd.f32 %v7462_v48, %v3392_v23 }
 0x4a9   :  { %v2709_v33 = vpop.f32.mrf.mxu2 }
 0x4aa   :  { %v3524_v20 = vmax.f32 %v3460_v30, 0.0  ;;  %v2799_v4 = vadd.f32 %v2709_v33, %v2509_v45  ;;  %v2431_v45 = vpop.f32.mrf.mxu1 }
 0x4ab   :  { %v3007_v16 = vpop.f32.mrf.mxu3  ;;  %v2513_v6 = vadd.f32 %v2431_v45, %v8293_v50 }
 0x4ac   :  { %v3592_v27 = vadd.f32 %v3591_v43, %v3524_v20  ;;  %v3097_v56 = vadd.f32 %v3007_v16, %v2799_v4  ;;  %v8294_v20 = vld [vmem:[#allocation89_spill] sm:$0xff] }
 0x4ae   :  { %v3393_v31 = vadd.f32 %v3303_v61, %v3097_v56  ;;  %v3622_v61 = vld [vmem:[%s7737_s3 + $0x8] sm:$0xff] }
 0x4af   :  { %v3306_v18 = vpop.f32.mrf.mxu0  ;;  %3660 = vmatpush.msrb.mxu1 %v3622_v61 }
 0x4b0   :  { %v3461_v25 = vadd.f32 %v7462_v48, %v3393_v31 }
 0x4b1   :  { %v2712_v0 = vpop.f32.mrf.mxu2 }
 0x4b2   :  { %v3525_v62 = vmax.f32 %v3461_v25, 0.0  ;;  %v2800_v10 = vadd.f32 %v2712_v0, %v2510_v26  ;;  %v2434_v54 = vpop.f32.mrf.mxu1  ;;  %v8292_v26 = vld [vmem:[#allocation74_spill] sm:$0xff] }
 0x4b3   :  { %v3010_v29 = vpop.f32.mrf.mxu3  ;;  %v2512_v1 = vadd.f32 %v2428_v13, %v8292_v26  ;;  %v2514_v4 = vadd.f32 %v2434_v54, %v8294_v20 }
 0x4b4   :  { %v3593_v15 = vadd.f32 %v3592_v27, %v3525_v62  ;;  %v3098_v34 = vadd.f32 %v3010_v29, %v2800_v10 }
 0x4b6   :  { %v3394_v44 = vadd.f32 %v3306_v18, %v3098_v34 }
 0x4b7   :  { %v3309_v63 = vpop.f32.mrf.mxu0 }
 0x4b8   :  { %v3462_v51 = vadd.f32 %v7462_v48, %v3394_v44 }
 0x4b9   :  { %v2715_v40 = vpop.f32.mrf.mxu2 }
 0x4ba   :  { %v3526_v41 = vmax.f32 %v3462_v51, 0.0  ;;  %v2801_v28 = vadd.f32 %v2715_v40, %v2511_v2  ;;  %v2437_v60 = vpop.f32.mrf.mxu1 }
 0x4bb   :  { %v3013_v24 = vpop.f32.mrf.mxu3  ;;  %v2515_v10 = vadd.f32 %v2437_v60, %v6819_v11 }
 0x4bc   :  { %v3594_v21 = vadd.f32 %v3593_v15, %v3526_v41  ;;  %v3099_v32 = vadd.f32 %v3013_v24, %v2801_v28 }
 0x4be   :  { %v3395_v59 = vadd.f32 %v3309_v63, %v3099_v32 }
 0x4bf   :  { %v3312_v36 = vpop.f32.mrf.mxu0 }
 0x4c0   :  { %v3463_v39 = vadd.f32 %v7462_v48, %v3395_v59 }
 0x4c1   :  { %v2718_v22 = vpop.f32.mrf.mxu2 }
 0x4c2   :  { %v3527_v52 = vmax.f32 %v3463_v39, 0.0  ;;  %v2802_v38 = vadd.f32 %v2718_v22, %v2512_v1  ;;  %v2440_v57 = vpop.f32.mrf.mxu1 }
 0x4c3   :  { %v3016_v8 = vpop.f32.mrf.mxu3  ;;  %v2516_v41 = vadd.f32 %v2440_v57, %v6832_v3 }
 0x4c4   :  { %v3595_v58 = vadd.f32 %v3594_v21, %v3527_v52  ;;  %v3100_v42 = vadd.f32 %v3016_v8, %v2802_v38 }
 0x4c6   :  { %v3396_v19 = vadd.f32 %v3312_v36, %v3100_v42 }
 0x4c7   :  { %v3315_v9 = vpop.f32.mrf.mxu0 }
 0x4c8   :  { %v3464_v46 = vadd.f32 %v7462_v48, %v3396_v19  ;;  %v3621_v19 = vld [vmem:[%s7737_s3] sm:$0xff] }
 0x4c9   :  { %v2721_v14 = vpop.f32.mrf.mxu2  ;;  %3661 = vmatpush.msrb.mxu1 %v3621_v19 }
 0x4ca   :  { %v3528_v55 = vmax.f32 %v3464_v46, 0.0  ;;  %v2803_v53 = vadd.f32 %v2721_v14, %v2513_v6  ;;  %v2443_v2 = vpop.f32.mrf.mxu1 }
 0x4cb   :  { %v3019_v43 = vpop.f32.mrf.mxu3  ;;  %v2517_v39 = vadd.f32 %v2443_v2, %v6847_v5 }
 0x4cc   :  { %v3596_v37 = vadd.f32 %v3595_v58, %v3528_v55  ;;  %v3101_v23 = vadd.f32 %v3019_v43, %v2803_v53 }
 0x4ce   :  { %v3397_v30 = vadd.f32 %v3315_v9, %v3101_v23 }
 0x4cf   :  { %v3318_v33 = vpop.f32.mrf.mxu0 }
 0x4d0   :  { %v3465_v13 = vadd.f32 %v7462_v48, %v3397_v30 }
 0x4d1   :  { %v2724_v16 = vpop.f32.mrf.mxu2 }
 0x4d2   :  { %v3529_v27 = vmax.f32 %v3465_v13, 0.0  ;;  %v2804_v56 = vadd.f32 %v2724_v16, %v2514_v4  ;;  %v2446_v26 = vpop.f32.mrf.mxu1 }
 0x4d3   :  { %v3022_v31 = vpop.f32.mrf.mxu3  ;;  %v2518_v6 = vadd.f32 %v2446_v26, %v6862_v35 }
 0x4d4   :  { %v3597_v18 = vadd.f32 %v3596_v37, %v3529_v27  ;;  %v3102_v25 = vadd.f32 %v3022_v31, %v2804_v56 }
 0x4d6   :  { %v3398_v0 = vadd.f32 %v3318_v33, %v3102_v25 }
 0x4d7   :  { %v3321_v62 = vpop.f32.mrf.mxu0 }
 0x4d8   :  { %v3466_v29 = vadd.f32 %v7462_v48, %v3398_v0 }
 0x4d9   :  { %v2727_v15 = vpop.f32.mrf.mxu2 }
 0x4da   :  { %v3530_v34 = vmax.f32 %v3466_v29, 0.0  ;;  %v2805_v45 = vadd.f32 %v2727_v15, %v2515_v10  ;;  %v2449_v5 = vpop.f32.mrf.mxu1 }
 0x4db   :  { %v3025_v44 = vpop.f32.mrf.mxu3  ;;  %v2519_v30 = vadd.f32 %v2449_v5, %v6877_v7 }
 0x4dc   :  { %v3598_v63 = vadd.f32 %v3597_v18, %v3530_v34  ;;  %v3103_v49 = vadd.f32 %v3025_v44, %v2805_v45  ;;  %v4429_v44 = vmov 256.0  }
 0x4dd   :  { %4283 = vrcp.f32 %v4429_v44 }
 0x4de   :  { %v3399_v51 = vadd.f32 %v3321_v62, %v3103_v49 }
 0x4df   :  { %v3324_v40 = vpop.f32.mrf.mxu0 }
 0x4e0   :  { %v3467_v28 = vadd.f32 %v7462_v48, %v3399_v51 }
 0x4e1   :  { %v2730_v24 = vpop.f32.mrf.mxu2 }
 0x4e2   :  { %v3531_v21 = vmax.f32 %v3467_v28, 0.0  ;;  %v2806_v32 = vadd.f32 %v2730_v24, %v2516_v41  ;;  %v2452_v16 = vpop.f32.mrf.mxu1 }
 0x4e3   :  { %v3028_v59 = vpop.f32.mrf.mxu3  ;;  %v2520_v31 = vadd.f32 %v2452_v16, %v6892_v12  ;;  %v3569_v12 = vrot.slane %v7441_v17, 4  ;;  %v4284_v24 = vpop.eup %4283 }
 0x4e4   :  { %v3599_v11 = vadd.f32 %v3598_v63, %v3531_v21  ;;  %v3104_v54 = vadd.f32 %v3028_v59, %v2806_v32  ;;  %vm3617_vm4 = vweird.f32 %v4284_v24 }
 0x4e5   :  { %v3570_v59 = vadd.f32 %v3569_v12, %v7441_v17 }
 0x4e6   :  { %v3400_v36 = vadd.f32 %v3324_v40, %v3104_v54  ;;  %v3613_v54 = vmul.f32 256.0, %v4284_v24 }
 0x4e7   :  { %v3327_v1 = vpop.f32.mrf.mxu0  ;;  %v3571_v26 = vrot.slane %v3570_v59, 2 }
 0x4e8   :  { %v3468_v22 = vadd.f32 %v7462_v48, %v3400_v36 }
 0x4e9   :  { %v2733_v52 = vpop.f32.mrf.mxu2 }
 0x4ea   :  { %v3532_v38 = vmax.f32 %v3468_v22, 0.0  ;;  %v2807_v8 = vadd.f32 %v2733_v52, %v2517_v39  ;;  %v2455_v34 = vpop.f32.mrf.mxu1  ;;  %v3572_v22 = vadd.f32 %v3571_v26, %v3570_v59 }
 0x4eb   :  { %v3031_v58 = vpop.f32.mrf.mxu3  ;;  %v2521_v63 = vadd.f32 %v2455_v34, %v6910_v47 }
 0x4ec   :  { %v3600_v3 = vadd.f32 %v3599_v11, %v3532_v38  ;;  %v3105_v42 = vadd.f32 %v3031_v58, %v2807_v8  ;;  %v3573_v58 = vrot.slane %v3572_v22, 1 }
 0x4ee   :  { %v3401_v9 = vadd.f32 %v3327_v1, %v3105_v42  ;;  %v3614_v1 = vsub.f32 1.0, %v3613_v54 }
 0x4ef   :  { %v3330_v50 = vpop.f32.mrf.mxu0 }
 0x4f0   :  { %v3469_v46 = vadd.f32 %v7462_v48, %v3401_v9  ;;  %v3615_v38 = vmul.f32 %v4284_v24, %v3614_v1 }
 0x4f1   :  { %v2736_v60 = vpop.f32.mrf.mxu2 }
 0x4f2   :  { %v3533_v14 = vmax.f32 %v3469_v46, 0.0  ;;  %v2808_v55 = vadd.f32 %v2736_v60, %v2518_v6  ;;  %v3616_v42 = vadd.f32 %v4284_v24, %v3615_v38  ;;  %v4282_v60 = vld [vmem:[%s7738_s4] ss:$0 sm:$0xff] }
 0x4f3   :  { %v3034_v53 = vpop.f32.mrf.mxu3 }
 0x4f4   :  { %v3601_v43 = vadd.f32 %v3600_v3, %v3533_v14  ;;  %v3106_v37 = vadd.f32 %v3034_v53, %v2808_v55  ;;  %v3618_v17 = vsel %vm3617_vm4, %v4284_v24, %v3616_v42 }
 0x4f6   :  { %v3402_v23 = vadd.f32 %v3330_v50, %v3106_v37  ;;  %v3574_v50 = vadd.f32 %v3573_v58, %v3572_v22 }
 0x4f7   :  { %v3333_v61 = vpop.f32.mrf.mxu0 }
 0x4f8   :  { %v3470_v33 = vadd.f32 %v7462_v48, %v3402_v23  ;;  %v3619_v46 = vmul.f32 %v3618_v17, %v3574_v50 }
 0x4f9   :  { %v2739_v20 = vpop.f32.mrf.mxu2 }
 0x4fa   :  { %v3534_v4 = vmax.f32 %v3470_v33, 0.0  ;;  %v2809_v13 = vadd.f32 %v2739_v20, %v2519_v30 }
 0x4fb   :  { %v3037_v35 = vpop.f32.mrf.mxu3 }
 0x4fc   :  { %v3602_v27 = vadd.f32 %v3601_v43, %v3534_v4  ;;  %v3107_v56 = vadd.f32 %v3037_v35, %v2809_v13 }
 0x4fe   :  { %v3403_v57 = vadd.f32 %v3333_v61, %v3107_v56 }
 0x4ff   :  { %v3336_v0 = vpop.f32.mrf.mxu0 }
 0x500   :  { %v3471_v18 = vadd.f32 %v7462_v48, %v3403_v57 }
 0x501   :  { %v2742_v25 = vpop.f32.mrf.mxu2 }
 0x502   :  { %v3535_v62 = vmax.f32 %v3471_v18, 0.0  ;;  %v2810_v10 = vadd.f32 %v2742_v25, %v2520_v31 }
 0x503   :  { %v3040_v29 = vpop.f32.mrf.mxu3 }
 0x504   :  { %v3603_v7 = vadd.f32 %v3602_v27, %v3535_v62  ;;  %v3108_v15 = vadd.f32 %v3040_v29, %v2810_v10 }
 0x506   :  { %v3404_v45 = vadd.f32 %v3336_v0, %v3108_v15 }
 0x507   :  { %v3339_v28 = vpop.f32.mrf.mxu0 }
 0x508   :  { %v3472_v49 = vadd.f32 %v7462_v48, %v3404_v45 }
 0x509   :  { %v2745_v2 = vpop.f32.mrf.mxu2 }
 0x50a   :  { %v3536_v51 = vmax.f32 %v3472_v49, 0.0  ;;  %v2811_v40 = vadd.f32 %v2745_v2, %v2521_v63 }
 0x50b   :  { %v3043_v41 = vpop.f32.mrf.mxu3 }
 0x50c   :  { %v3604_v21 = vadd.f32 %v3603_v7, %v3536_v51  ;;  %v3109_v32 = vadd.f32 %v3043_v41, %v2811_v40 }
 0x50e   :  { %v3405_v11 = vadd.f32 %v3339_v28, %v3109_v32 }
 0x510   :  { %v3473_v36 = vadd.f32 %v7462_v48, %v3405_v11 }
 0x512   :  { %v3537_v47 = vmax.f32 %v3473_v36, 0.0 }
 0x514   :  { %v3605_v39 = vadd.f32 %v3604_v21, %v3537_v47 }
 0x516   :  { %v3606_v52 = vrot.slane %v3605_v39, 4 }
 0x518   :  { %v3607_v8 = vadd.f32 %v3606_v52, %v3605_v39 }
 0x51a   :  { %v3608_v3 = vrot.slane %v3607_v8, 2 }
 0x51c   :  { %v3609_v19 = vadd.f32 %v3608_v3, %v3607_v8 }
 0x51e   :  { %v3610_v9 = vrot.slane %v3609_v19, 1 }
 0x520   :  { %v3611_v6 = vadd.f32 %v3610_v9, %v3609_v19 }
 0x522   :  { %v3620_v48 = vmul.f32 %v3618_v17, %v3611_v6 }
 0x524   :  { %v3644_v5 = vsel %vm3643_vm5, %v3620_v48, %v3619_v46 }
 0x525   :  { %3662 = vmatmul.f32.vlgmr.msrb.gmra.mxu1 %v3644_v5 }
 0x5a2   :  { %v3663_v14 = vpop.f32.mrf.mxu1 }
 0x5a3   :  { %v3664_v55 = vadd.f32 %v4282_v60, %v3663_v14 }
 0x5a5   :  { %3666 = vst [vmem:[#allocation2] sm:$0x3] %v3664_v55 }
 0x5a6   :  { %3677 = dma.vmem_to_hbm [thread:$0]  %s3673_s9, 32, %s3675_s12, [#allocation3]  }
 0x5a7   :  { %4427 = dma.done.wait [#allocation3], 32  }
 0x5a8   :  { %4428 = vsyncadd [#allocation3], 4294967264 }
 0x5a9   :  { %3682 = vsyncpa [#allocation3], 1 }

</bundles_post_ra>
